<compile_context>
chip_gen: v7x
topology: tpu7x:2x2x1
jax: 0.10.0
libtpu: 0.0.40
codegen_flags: <defaults>
</compile_context>

<pallas_src>
import functools
import math

import jax
import jax.numpy as jnp
from jax.experimental import pallas as pl
from jax.experimental.pallas import tpu as pltpu


def attention_kernel(x_ref, wqkv_ref, bqkv_ref, wo_ref, bo_ref, out_ref, *rest,
                     num_heads, head_dim, seq_len, vis, compute_dtype):
    """One grid step = one batch element.

    x_ref:      (1, S_pad, H)                 VMEM (compute_dtype)
    wqkv_ref:   (H, 3H)                       VMEM (compute_dtype, q part pre-scaled)
    bqkv_ref:   (1, 3H)                       VMEM f32 (q part pre-scaled)
    wo_ref:     (H, H)                        VMEM (compute_dtype)
    bo_ref:     (1, H)                        VMEM f32
    out_ref:    (1, S_pad, H)                 VMEM (input dtype)
    weights_ref (1, nh, S_pad, S_pad) f32     (only when vis=True)
    ctx_scratch (S_pad, H) f32                VMEM scratch
    """
    if vis:
        weights_ref, ctx_scratch = rest
    else:
        (ctx_scratch,) = rest

    s_pad = x_ref.shape[1]
    hidden = x_ref.shape[2]

    x = x_ref[0]  # (S_pad, H)

    # --- fused QKV projection: one wide MXU matmul, f32 accumulation ---
    qkv = jnp.dot(x, wqkv_ref[...], preferred_element_type=jnp.float32)
    qkv = qkv + bqkv_ref[...]  # (S_pad, 3H) f32; q columns already pre-scaled

    # key-padding mask (only needed when the sequence was padded)
    if seq_len < s_pad:
        key_pos = jax.lax.broadcasted_iota(jnp.int32, (1, s_pad), 1)
        key_valid = key_pos < seq_len  # (1, S_pad)
    else:
        key_valid = None

    # --- per-head attention via lane slicing (no reshape/transpose relayouts) ---
    for h in range(num_heads):
        qs = h * head_dim
        q_h = qkv[:, qs:qs + head_dim].astype(compute_dtype)                    # (S_pad, hd)
        k_h = qkv[:, hidden + qs:hidden + qs + head_dim].astype(compute_dtype)  # (S_pad, hd)
        v_h = qkv[:, 2 * hidden + qs:2 * hidden + qs + head_dim].astype(compute_dtype)

        # scores_h = q_h @ k_h^T (contraction folded into the matmul, no explicit T)
        scores = jax.lax.dot_general(
            q_h, k_h, (((1,), (1,)), ((), ())),
            preferred_element_type=jnp.float32)  # (S_pad, S_pad) f32

        if key_valid is not None:
            scores = jnp.where(key_valid, scores, jnp.float32(-1e30))

        # --- softmax over keys (f32; exp on EUP) ---
        m = jnp.max(scores, axis=-1, keepdims=True)
        e = jnp.exp(scores - m)
        denom = jnp.sum(e, axis=-1, keepdims=True)
        # EUP approx reciprocal + one Newton step -> ~f32 accuracy, no VALU divide
        inv = pl.reciprocal(denom, approx=True)
        inv = inv * (2.0 - denom * inv)
        probs = e * inv  # (S_pad, S_pad) f32

        if vis:
            weights_ref[0, h] = probs.astype(weights_ref.dtype)

        # attn_dropout is identity in eval mode.
        ctx_h = jnp.dot(probs.astype(compute_dtype), v_h,
                        preferred_element_type=jnp.float32)  # (S_pad, hd) f32

        # merge heads by writing into the natural (S, H) layout at lane offset
        ctx_scratch[:, qs:qs + head_dim] = ctx_h

    # --- output projection ---
    ctx = ctx_scratch[...].astype(compute_dtype)  # (S_pad, H)
    out = jnp.dot(ctx, wo_ref[...], preferred_element_type=jnp.float32) + bo_ref[...]
    out_ref[0] = out.astype(out_ref.dtype)


def _vmem_limit_bytes(s_pad, hidden, num_heads, vis, compute_itemsize):
    blk = 0
    blk += s_pad * hidden * compute_itemsize           # x block
    blk += hidden * 3 * hidden * compute_itemsize      # fused qkv weight
    blk += 3 * hidden * 4                              # fused qkv bias
    blk += hidden * hidden * compute_itemsize          # out weight
    blk += hidden * 4                                  # out bias
    blk += s_pad * hidden * 4                          # out block
    if vis:
        blk += num_heads * s_pad * s_pad * 4           # probs block
    # double-buffered pipeline blocks + live intermediates + scratch
    interm = s_pad * 3 * hidden * 4 + 2 * s_pad * s_pad * 4 + 2 * s_pad * hidden * 4
    total = 2 * blk + interm
    return int(min(64 * 1024 * 1024, max(2 * total, 4 * 1024 * 1024)))


def attention_forward(x, params, num_heads, vis=True, compute_dtype=jnp.float32):
    """x: [B, S, H] float32. params: PyTorch-convention Linear weights.

    Returns (attention_output [B,S,H], weights [B,nh,S,S] or None)."""
    B, S, H = x.shape
    head_dim = H // num_heads
    scale = 1.0 / math.sqrt(head_dim)

    # lane-dense padding of the sequence dimension
    s_pad = ((S + 127) // 128) * 128

    f32 = jnp.float32
    # Fuse QKV weights into one (H, 3H) [in, out] matrix; fold softmax scale
    # into the query weight/bias so it never touches the (nh, S, S) scores.
    w_qkv = jnp.concatenate(
        [params['wq'].astype(f32).T * scale,
         params['wk'].astype(f32).T,
         params['wv'].astype(f32).T], axis=1).astype(compute_dtype)       # (H, 3H)
    b_qkv = jnp.concatenate(
        [params['bq'].astype(f32) * scale,
         params['bk'].astype(f32),
         params['bv'].astype(f32)]).reshape(1, 3 * H)                      # (1, 3H) f32
    wo_t = params['wo'].astype(f32).T.astype(compute_dtype)                # (H, H)
    bo = params['bo'].astype(f32).reshape(1, H)                            # (1, H) f32

    x_pad = x
    if s_pad != S:
        x_pad = jnp.pad(x, ((0, 0), (0, s_pad - S), (0, 0)))
    x_pad = x_pad.astype(compute_dtype)

    kernel = functools.partial(
        attention_kernel, num_heads=num_heads, head_dim=head_dim,
        seq_len=S, vis=vis, compute_dtype=compute_dtype)

    in_specs = [
        pl.BlockSpec((1, s_pad, H), lambda b: (b, 0, 0)),   # x
        pl.BlockSpec((H, 3 * H), lambda b: (0, 0)),         # fused qkv weight (resident)
        pl.BlockSpec((1, 3 * H), lambda b: (0, 0)),         # fused qkv bias
        pl.BlockSpec((H, H), lambda b: (0, 0)),             # out weight
        pl.BlockSpec((1, H), lambda b: (0, 0)),             # out bias
    ]

    out_shapes = [jax.ShapeDtypeStruct((B, s_pad, H), x.dtype)]
    out_specs = [pl.BlockSpec((1, s_pad, H), lambda b: (b, 0, 0))]
    if vis:
        out_shapes.append(jax.ShapeDtypeStruct((B, num_heads, s_pad, s_pad), jnp.float32))
        out_specs.append(pl.BlockSpec((1, num_heads, s_pad, s_pad),
                                      lambda b: (b, 0, 0, 0)))

    compute_itemsize = jnp.dtype(compute_dtype).itemsize
    vmem_limit = _vmem_limit_bytes(s_pad, H, num_heads, vis, compute_itemsize)

    results = pl.pallas_call(
        kernel,
        out_shape=tuple(out_shapes),
        grid_spec=pltpu.PrefetchScalarGridSpec(
            num_scalar_prefetch=0,
            grid=(B,),
            in_specs=in_specs,
            out_specs=out_specs,
            scratch_shapes=[pltpu.VMEM((s_pad, H), jnp.float32)],
        ),
        compiler_params=pltpu.CompilerParams(
            dimension_semantics=("parallel",),
            vmem_limit_bytes=vmem_limit),
    )(x_pad, w_qkv, b_qkv, wo_t, bo)

    out = results[0][:, :S, :]
    weights = results[1][:, :, :S, :S] if vis else None
    return out, weights


def reference_forward(x, params, num_heads):
    """Pure-JAX reference (mirrors the PyTorch module, eval-mode dropout)."""
    B, S, H = x.shape
    hd = H // num_heads
    q = x @ params['wq'].T + params['bq']
    k = x @ params['wk'].T + params['bk']
    v = x @ params['wv'].T + params['bv']

    def split(t):
        return t.reshape(B, S, num_heads, hd).transpose(0, 2, 1, 3)

    q, k, v = split(q), split(k), split(v)
    scores = jnp.einsum('bhqd,bhkd->bhqk', q, k) / math.sqrt(hd)
    probs = jax.nn.softmax(scores, axis=-1)
    ctx = jnp.einsum('bhqk,bhkd->bhqd', probs, v)
    ctx = ctx.transpose(0, 2, 1, 3).reshape(B, S, H)
    out = ctx @ params['wo'].T + params['bo']
    return out, probs


if __name__ == "__main__":
    # Small config consistent with the module: hidden_size=32, num_heads=4 -> head_dim=8
    B, S, H = 2, 8, 32
    NUM_HEADS = 4

    key = jax.random.PRNGKey(0)
    keys = jax.random.split(key, 9)
    w_scale = 1.0 / math.sqrt(H)
    params = {
        'wq': jax.random.normal(keys[0], (H, H), jnp.float32) * w_scale,
        'bq': jax.random.normal(keys[1], (H,), jnp.float32) * 0.01,
        'wk': jax.random.normal(keys[2], (H, H), jnp.float32) * w_scale,
        'bk': jax.random.normal(keys[3], (H,), jnp.float32) * 0.01,
        'wv': jax.random.normal(keys[4], (H, H), jnp.float32) * w_scale,
        'bv': jax.random.normal(keys[5], (H,), jnp.float32) * 0.01,
        'wo': jax.random.normal(keys[6], (H, H), jnp.float32) * w_scale,
        'bo': jax.random.normal(keys[7], (H,), jnp.float32) * 0.01,
    }
    x = jax.random.normal(keys[8], (B, S, H), jnp.float32)

    ref_out, ref_w = reference_forward(x, params, NUM_HEADS)

    # --- f32 path (default; matches PyTorch numerics) ---
    out, weights = attention_forward(x, params, NUM_HEADS, vis=True)
    out = jax.block_until_ready(out)
    weights = jax.block_until_ready(weights)
    assert out.shape == (B, S, H)
    assert weights.shape == (B, NUM_HEADS, S, S)
    assert jnp.allclose(out, ref_out, atol=1e-4, rtol=1e-4)
    assert jnp.allclose(weights, ref_w, atol=1e-4, rtol=1e-4)

    # --- vis=False path (no attention-probs writeback) ---
    out_novis, w_novis = attention_forward(x, params, NUM_HEADS, vis=False)
    out_novis = jax.block_until_ready(out_novis)
    assert w_novis is None
    assert jnp.allclose(out_novis, ref_out, atol=1e-4, rtol=1e-4)

    # --- bf16 fast path (v6e/v7x MXU; f32 accumulation + f32 softmax) ---
    out_bf, w_bf = attention_forward(x, params, NUM_HEADS, vis=True,
                                     compute_dtype=jnp.bfloat16)
    out_bf = jax.block_until_ready(out_bf)
    assert jnp.allclose(out_bf, ref_out, atol=1e-1, rtol=1e-1)
    assert jnp.allclose(w_bf, ref_w, atol=5e-2, rtol=5e-2)

    print("KERNEL_OK")
</pallas_src>

<mosaic_0001>
module attributes {stable_mosaic.version = 11 : i64} {
  func.func @attention_kernel(%arg0: i32, %arg1: memref<1x128x32xf32, #tpu.memory_space<vmem>>, %arg2: memref<32x96xf32, #tpu.memory_space<vmem>>, %arg3: memref<1x96xf32, #tpu.memory_space<vmem>>, %arg4: memref<32x32xf32, #tpu.memory_space<vmem>>, %arg5: memref<1x32xf32, #tpu.memory_space<vmem>>, %arg6: memref<1x128x32xf32, #tpu.memory_space<vmem>>, %arg7: memref<1x4x128x128xf32, #tpu.memory_space<vmem>>, %arg8: memref<128x32xf32, #tpu.memory_space<vmem>>) attributes {dimension_semantics = [#tpu.dimension_semantics<parallel>], iteration_bounds = array<i64: 2>, scalar_prefetch = 0 : i64, scratch_operands = 1 : i64, tpu.core_type = #tpu.core_type<tc>, window_params = [{transform_indices = @transform_0, window_bounds = array<i64: 1, 128, 32>}, {pipeline_mode = #tpu.pipeline_mode<synchronous>, transform_indices = @transform_1, window_bounds = array<i64: 32, 96>}, {pipeline_mode = #tpu.pipeline_mode<synchronous>, transform_indices = @transform_2, window_bounds = array<i64: 1, 96>}, {pipeline_mode = #tpu.pipeline_mode<synchronous>, transform_indices = @transform_3, window_bounds = array<i64: 32, 32>}, {pipeline_mode = #tpu.pipeline_mode<synchronous>, transform_indices = @transform_4, window_bounds = array<i64: 1, 32>}, {transform_indices = @transform_5, window_bounds = array<i64: 1, 128, 32>}, {transform_indices = @transform_6, window_bounds = array<i64: 1, 4, 128, 128>}]} {
    %c0 = arith.constant 0 : index
    %c0_0 = arith.constant 0 : index
    %c0_1 = arith.constant 0 : index
    %0 = vector.load %arg1[%c0, %c0_0, %c0_1] : memref<1x128x32xf32, #tpu.memory_space<vmem>>, vector<1x128x32xf32>
    %1 = vector.shape_cast %0 : vector<1x128x32xf32> to vector<128x32xf32>
    %c0_2 = arith.constant 0 : index
    %c0_3 = arith.constant 0 : index
    %2 = vector.load %arg2[%c0_2, %c0_3] : memref<32x96xf32, #tpu.memory_space<vmem>>, vector<32x96xf32>
    %cst = arith.constant dense<0.000000e+00> : vector<128x96xf32>
    %3 = tpu.matmul %1, %2, %cst {dimension_numbers = #tpu.dot_dimension_numbers<[1], [0], [0], [1], [0, 0, 1, 1], [], []>} : vector<128x32xf32>, vector<32x96xf32>, vector<128x96xf32> -> vector<128x96xf32>
    %c0_4 = arith.constant 0 : index
    %c0_5 = arith.constant 0 : index
    %4 = vector.load %arg3[%c0_4, %c0_5] : memref<1x96xf32, #tpu.memory_space<vmem>>, vector<1x96xf32>
    %5 = vector.broadcast %4 : vector<1x96xf32> to vector<128x96xf32>
    %6 = arith.addf %3, %5 : vector<128x96xf32>
    %7 = tpu.iota {dimensions = array<i32: 1>} : vector<1x128xi32>
    %c8_i32 = arith.constant 8 : i32
    %8 = vector.broadcast %c8_i32 : i32 to vector<1x128xi32>
    %9 = arith.cmpi slt, %7, %8 : vector<1x128xi32>
    %10 = vector.extract_strided_slice %6 {offsets = [0, 0], sizes = [128, 8], strides = [1, 1]} : vector<128x96xf32> to vector<128x8xf32>
    %11 = vector.extract_strided_slice %6 {offsets = [0, 32], sizes = [128, 8], strides = [1, 1]} : vector<128x96xf32> to vector<128x8xf32>
    %12 = vector.extract_strided_slice %6 {offsets = [0, 64], sizes = [128, 8], strides = [1, 1]} : vector<128x96xf32> to vector<128x8xf32>
    %cst_6 = arith.constant dense<0.000000e+00> : vector<128x128xf32>
    %13 = tpu.matmul %10, %11, %cst_6 {dimension_numbers = #tpu.dot_dimension_numbers<[1], [1], [0], [0], [0, 0, 1, 0], [], []>} : vector<128x8xf32>, vector<128x8xf32>, vector<128x128xf32> -> vector<128x128xf32>
    %cst_7 = arith.constant -1.000000e+30 : f32
    %14 = vector.shape_cast %9 : vector<1x128xi1> to vector<1x128xi1>
    %15 = vector.broadcast %14 : vector<1x128xi1> to vector<128x128xi1>
    %16 = vector.broadcast %cst_7 : f32 to vector<128x128xf32>
    %17 = arith.select %15, %13, %16 : vector<128x128xi1>, vector<128x128xf32>
    %cst_8 = arith.constant dense<0xFF800000> : vector<128xf32>
    %18 = vector.multi_reduction <maximumf>, %17, %cst_8 [1] : vector<128x128xf32> to vector<128xf32>
    %19 = vector.shape_cast %18 : vector<128xf32> to vector<128x1xf32>
    %20 = vector.broadcast %19 : vector<128x1xf32> to vector<128x128xf32>
    %21 = arith.subf %17, %20 : vector<128x128xf32>
    %22 = math.exp %21 : vector<128x128xf32>
    %cst_9 = arith.constant dense<0.000000e+00> : vector<128xf32>
    %23 = vector.multi_reduction <add>, %22, %cst_9 [1] : vector<128x128xf32> to vector<128xf32>
    %24 = vector.shape_cast %23 : vector<128xf32> to vector<128x1xf32>
    %25 = tpu.reciprocal %24 {approx = true} : vector<128x1xf32> -> vector<128x1xf32>
    %26 = arith.mulf %24, %25 : vector<128x1xf32>
    %cst_10 = arith.constant 2.000000e+00 : f32
    %27 = vector.broadcast %cst_10 : f32 to vector<128x1xf32>
    %28 = arith.subf %27, %26 : vector<128x1xf32>
    %29 = arith.mulf %25, %28 : vector<128x1xf32>
    %30 = vector.broadcast %29 : vector<128x1xf32> to vector<128x128xf32>
    %31 = arith.mulf %22, %30 : vector<128x128xf32>
    %c0_11 = arith.constant 0 : index
    %c0_12 = arith.constant 0 : index
    %c0_13 = arith.constant 0 : index
    %c0_14 = arith.constant 0 : index
    %32 = vector.load %arg7[%c0_11, %c0_12, %c0_13, %c0_14] : memref<1x4x128x128xf32, #tpu.memory_space<vmem>>, vector<1x1x128x128xf32>
    %33 = vector.shape_cast %32 : vector<1x1x128x128xf32> to vector<128x128xf32>
    %34 = vector.shape_cast %31 : vector<128x128xf32> to vector<1x1x128x128xf32>
    tpu.vector_store %arg7[%c0_11, %c0_12, %c0_13, %c0_14], %34 {strides = array<i32>} : memref<1x4x128x128xf32, #tpu.memory_space<vmem>>, vector<1x1x128x128xf32>,
    %cst_15 = arith.constant dense<0.000000e+00> : vector<128x8xf32>
    %35 = tpu.matmul %31, %12, %cst_15 {dimension_numbers = #tpu.dot_dimension_numbers<[1], [0], [0], [1], [0, 0, 1, 1], [], []>} : vector<128x128xf32>, vector<128x8xf32>, vector<128x8xf32> -> vector<128x8xf32>
    %c0_16 = arith.constant 0 : index
    %c0_17 = arith.constant 0 : index
    %36 = vector.load %arg8[%c0_16, %c0_17] : memref<128x32xf32, #tpu.memory_space<vmem>>, vector<128x8xf32>
    tpu.vector_store %arg8[%c0_16, %c0_17], %35 {strides = array<i32>} : memref<128x32xf32, #tpu.memory_space<vmem>>, vector<128x8xf32>,
    %37 = vector.extract_strided_slice %6 {offsets = [0, 8], sizes = [128, 8], strides = [1, 1]} : vector<128x96xf32> to vector<128x8xf32>
    %38 = vector.extract_strided_slice %6 {offsets = [0, 40], sizes = [128, 8], strides = [1, 1]} : vector<128x96xf32> to vector<128x8xf32>
    %39 = vector.extract_strided_slice %6 {offsets = [0, 72], sizes = [128, 8], strides = [1, 1]} : vector<128x96xf32> to vector<128x8xf32>
    %cst_18 = arith.constant dense<0.000000e+00> : vector<128x128xf32>
    %40 = tpu.matmul %37, %38, %cst_18 {dimension_numbers = #tpu.dot_dimension_numbers<[1], [1], [0], [0], [0, 0, 1, 0], [], []>} : vector<128x8xf32>, vector<128x8xf32>, vector<128x128xf32> -> vector<128x128xf32>
    %cst_19 = arith.constant -1.000000e+30 : f32
    %41 = vector.shape_cast %9 : vector<1x128xi1> to vector<1x128xi1>
    %42 = vector.broadcast %41 : vector<1x128xi1> to vector<128x128xi1>
    %43 = vector.broadcast %cst_19 : f32 to vector<128x128xf32>
    %44 = arith.select %42, %40, %43 : vector<128x128xi1>, vector<128x128xf32>
    %cst_20 = arith.constant dense<0xFF800000> : vector<128xf32>
    %45 = vector.multi_reduction <maximumf>, %44, %cst_20 [1] : vector<128x128xf32> to vector<128xf32>
    %46 = vector.shape_cast %45 : vector<128xf32> to vector<128x1xf32>
    %47 = vector.broadcast %46 : vector<128x1xf32> to vector<128x128xf32>
    %48 = arith.subf %44, %47 : vector<128x128xf32>
    %49 = math.exp %48 : vector<128x128xf32>
    %cst_21 = arith.constant dense<0.000000e+00> : vector<128xf32>
    %50 = vector.multi_reduction <add>, %49, %cst_21 [1] : vector<128x128xf32> to vector<128xf32>
    %51 = vector.shape_cast %50 : vector<128xf32> to vector<128x1xf32>
    %52 = tpu.reciprocal %51 {approx = true} : vector<128x1xf32> -> vector<128x1xf32>
    %53 = arith.mulf %51, %52 : vector<128x1xf32>
    %cst_22 = arith.constant 2.000000e+00 : f32
    %54 = vector.broadcast %cst_22 : f32 to vector<128x1xf32>
    %55 = arith.subf %54, %53 : vector<128x1xf32>
    %56 = arith.mulf %52, %55 : vector<128x1xf32>
    %57 = vector.broadcast %56 : vector<128x1xf32> to vector<128x128xf32>
    %58 = arith.mulf %49, %57 : vector<128x128xf32>
    %c0_23 = arith.constant 0 : index
    %c1 = arith.constant 1 : index
    %c0_24 = arith.constant 0 : index
    %c0_25 = arith.constant 0 : index
    %59 = vector.load %arg7[%c0_23, %c1, %c0_24, %c0_25] : memref<1x4x128x128xf32, #tpu.memory_space<vmem>>, vector<1x1x128x128xf32>
    %60 = vector.shape_cast %59 : vector<1x1x128x128xf32> to vector<128x128xf32>
    %61 = vector.shape_cast %58 : vector<128x128xf32> to vector<1x1x128x128xf32>
    tpu.vector_store %arg7[%c0_23, %c1, %c0_24, %c0_25], %61 {strides = array<i32>} : memref<1x4x128x128xf32, #tpu.memory_space<vmem>>, vector<1x1x128x128xf32>,
    %cst_26 = arith.constant dense<0.000000e+00> : vector<128x8xf32>
    %62 = tpu.matmul %58, %39, %cst_26 {dimension_numbers = #tpu.dot_dimension_numbers<[1], [0], [0], [1], [0, 0, 1, 1], [], []>} : vector<128x128xf32>, vector<128x8xf32>, vector<128x8xf32> -> vector<128x8xf32>
    %c0_27 = arith.constant 0 : index
    %c8 = arith.constant 8 : index
    %63 = vector.load %arg8[%c0_27, %c8] : memref<128x32xf32, #tpu.memory_space<vmem>>, vector<128x8xf32>
    tpu.vector_store %arg8[%c0_27, %c8], %62 {strides = array<i32>} : memref<128x32xf32, #tpu.memory_space<vmem>>, vector<128x8xf32>,
    %64 = vector.extract_strided_slice %6 {offsets = [0, 16], sizes = [128, 8], strides = [1, 1]} : vector<128x96xf32> to vector<128x8xf32>
    %65 = vector.extract_strided_slice %6 {offsets = [0, 48], sizes = [128, 8], strides = [1, 1]} : vector<128x96xf32> to vector<128x8xf32>
    %66 = vector.extract_strided_slice %6 {offsets = [0, 80], sizes = [128, 8], strides = [1, 1]} : vector<128x96xf32> to vector<128x8xf32>
    %cst_28 = arith.constant dense<0.000000e+00> : vector<128x128xf32>
    %67 = tpu.matmul %64, %65, %cst_28 {dimension_numbers = #tpu.dot_dimension_numbers<[1], [1], [0], [0], [0, 0, 1, 0], [], []>} : vector<128x8xf32>, vector<128x8xf32>, vector<128x128xf32> -> vector<128x128xf32>
    %cst_29 = arith.constant -1.000000e+30 : f32
    %68 = vector.shape_cast %9 : vector<1x128xi1> to vector<1x128xi1>
    %69 = vector.broadcast %68 : vector<1x128xi1> to vector<128x128xi1>
    %70 = vector.broadcast %cst_29 : f32 to vector<128x128xf32>
    %71 = arith.select %69, %67, %70 : vector<128x128xi1>, vector<128x128xf32>
    %cst_30 = arith.constant dense<0xFF800000> : vector<128xf32>
    %72 = vector.multi_reduction <maximumf>, %71, %cst_30 [1] : vector<128x128xf32> to vector<128xf32>
    %73 = vector.shape_cast %72 : vector<128xf32> to vector<128x1xf32>
    %74 = vector.broadcast %73 : vector<128x1xf32> to vector<128x128xf32>
    %75 = arith.subf %71, %74 : vector<128x128xf32>
    %76 = math.exp %75 : vector<128x128xf32>
    %cst_31 = arith.constant dense<0.000000e+00> : vector<128xf32>
    %77 = vector.multi_reduction <add>, %76, %cst_31 [1] : vector<128x128xf32> to vector<128xf32>
    %78 = vector.shape_cast %77 : vector<128xf32> to vector<128x1xf32>
    %79 = tpu.reciprocal %78 {approx = true} : vector<128x1xf32> -> vector<128x1xf32>
    %80 = arith.mulf %78, %79 : vector<128x1xf32>
    %cst_32 = arith.constant 2.000000e+00 : f32
    %81 = vector.broadcast %cst_32 : f32 to vector<128x1xf32>
    %82 = arith.subf %81, %80 : vector<128x1xf32>
    %83 = arith.mulf %79, %82 : vector<128x1xf32>
    %84 = vector.broadcast %83 : vector<128x1xf32> to vector<128x128xf32>
    %85 = arith.mulf %76, %84 : vector<128x128xf32>
    %c0_33 = arith.constant 0 : index
    %c2 = arith.constant 2 : index
    %c0_34 = arith.constant 0 : index
    %c0_35 = arith.constant 0 : index
    %86 = vector.load %arg7[%c0_33, %c2, %c0_34, %c0_35] : memref<1x4x128x128xf32, #tpu.memory_space<vmem>>, vector<1x1x128x128xf32>
    %87 = vector.shape_cast %86 : vector<1x1x128x128xf32> to vector<128x128xf32>
    %88 = vector.shape_cast %85 : vector<128x128xf32> to vector<1x1x128x128xf32>
    tpu.vector_store %arg7[%c0_33, %c2, %c0_34, %c0_35], %88 {strides = array<i32>} : memref<1x4x128x128xf32, #tpu.memory_space<vmem>>, vector<1x1x128x128xf32>,
    %cst_36 = arith.constant dense<0.000000e+00> : vector<128x8xf32>
    %89 = tpu.matmul %85, %66, %cst_36 {dimension_numbers = #tpu.dot_dimension_numbers<[1], [0], [0], [1], [0, 0, 1, 1], [], []>} : vector<128x128xf32>, vector<128x8xf32>, vector<128x8xf32> -> vector<128x8xf32>
    %c0_37 = arith.constant 0 : index
    %c16 = arith.constant 16 : index
    %90 = vector.load %arg8[%c0_37, %c16] : memref<128x32xf32, #tpu.memory_space<vmem>>, vector<128x8xf32>
    tpu.vector_store %arg8[%c0_37, %c16], %89 {strides = array<i32>} : memref<128x32xf32, #tpu.memory_space<vmem>>, vector<128x8xf32>,
    %91 = vector.extract_strided_slice %6 {offsets = [0, 24], sizes = [128, 8], strides = [1, 1]} : vector<128x96xf32> to vector<128x8xf32>
    %92 = vector.extract_strided_slice %6 {offsets = [0, 56], sizes = [128, 8], strides = [1, 1]} : vector<128x96xf32> to vector<128x8xf32>
    %93 = vector.extract_strided_slice %6 {offsets = [0, 88], sizes = [128, 8], strides = [1, 1]} : vector<128x96xf32> to vector<128x8xf32>
    %cst_38 = arith.constant dense<0.000000e+00> : vector<128x128xf32>
    %94 = tpu.matmul %91, %92, %cst_38 {dimension_numbers = #tpu.dot_dimension_numbers<[1], [1], [0], [0], [0, 0, 1, 0], [], []>} : vector<128x8xf32>, vector<128x8xf32>, vector<128x128xf32> -> vector<128x128xf32>
    %cst_39 = arith.constant -1.000000e+30 : f32
    %95 = vector.shape_cast %9 : vector<1x128xi1> to vector<1x128xi1>
    %96 = vector.broadcast %95 : vector<1x128xi1> to vector<128x128xi1>
    %97 = vector.broadcast %cst_39 : f32 to vector<128x128xf32>
    %98 = arith.select %96, %94, %97 : vector<128x128xi1>, vector<128x128xf32>
    %cst_40 = arith.constant dense<0xFF800000> : vector<128xf32>
    %99 = vector.multi_reduction <maximumf>, %98, %cst_40 [1] : vector<128x128xf32> to vector<128xf32>
    %100 = vector.shape_cast %99 : vector<128xf32> to vector<128x1xf32>
    %101 = vector.broadcast %100 : vector<128x1xf32> to vector<128x128xf32>
    %102 = arith.subf %98, %101 : vector<128x128xf32>
    %103 = math.exp %102 : vector<128x128xf32>
    %cst_41 = arith.constant dense<0.000000e+00> : vector<128xf32>
    %104 = vector.multi_reduction <add>, %103, %cst_41 [1] : vector<128x128xf32> to vector<128xf32>
    %105 = vector.shape_cast %104 : vector<128xf32> to vector<128x1xf32>
    %106 = tpu.reciprocal %105 {approx = true} : vector<128x1xf32> -> vector<128x1xf32>
    %107 = arith.mulf %105, %106 : vector<128x1xf32>
    %cst_42 = arith.constant 2.000000e+00 : f32
    %108 = vector.broadcast %cst_42 : f32 to vector<128x1xf32>
    %109 = arith.subf %108, %107 : vector<128x1xf32>
    %110 = arith.mulf %106, %109 : vector<128x1xf32>
    %111 = vector.broadcast %110 : vector<128x1xf32> to vector<128x128xf32>
    %112 = arith.mulf %103, %111 : vector<128x128xf32>
    %c0_43 = arith.constant 0 : index
    %c3 = arith.constant 3 : index
    %c0_44 = arith.constant 0 : index
    %c0_45 = arith.constant 0 : index
    %113 = vector.load %arg7[%c0_43, %c3, %c0_44, %c0_45] : memref<1x4x128x128xf32, #tpu.memory_space<vmem>>, vector<1x1x128x128xf32>
    %114 = vector.shape_cast %113 : vector<1x1x128x128xf32> to vector<128x128xf32>
    %115 = vector.shape_cast %112 : vector<128x128xf32> to vector<1x1x128x128xf32>
    tpu.vector_store %arg7[%c0_43, %c3, %c0_44, %c0_45], %115 {strides = array<i32>} : memref<1x4x128x128xf32, #tpu.memory_space<vmem>>, vector<1x1x128x128xf32>,
    %cst_46 = arith.constant dense<0.000000e+00> : vector<128x8xf32>
    %116 = tpu.matmul %112, %93, %cst_46 {dimension_numbers = #tpu.dot_dimension_numbers<[1], [0], [0], [1], [0, 0, 1, 1], [], []>} : vector<128x128xf32>, vector<128x8xf32>, vector<128x8xf32> -> vector<128x8xf32>
    %c0_47 = arith.constant 0 : index
    %c24 = arith.constant 24 : index
    %117 = vector.load %arg8[%c0_47, %c24] : memref<128x32xf32, #tpu.memory_space<vmem>>, vector<128x8xf32>
    tpu.vector_store %arg8[%c0_47, %c24], %116 {strides = array<i32>} : memref<128x32xf32, #tpu.memory_space<vmem>>, vector<128x8xf32>,
    %c0_48 = arith.constant 0 : index
    %c0_49 = arith.constant 0 : index
    %118 = vector.load %arg8[%c0_48, %c0_49] : memref<128x32xf32, #tpu.memory_space<vmem>>, vector<128x32xf32>
    %c0_50 = arith.constant 0 : index
    %c0_51 = arith.constant 0 : index
    %119 = vector.load %arg4[%c0_50, %c0_51] : memref<32x32xf32, #tpu.memory_space<vmem>>, vector<32x32xf32>
    %cst_52 = arith.constant dense<0.000000e+00> : vector<128x32xf32>
    %120 = tpu.matmul %118, %119, %cst_52 {dimension_numbers = #tpu.dot_dimension_numbers<[1], [0], [0], [1], [0, 0, 1, 1], [], []>} : vector<128x32xf32>, vector<32x32xf32>, vector<128x32xf32> -> vector<128x32xf32>
    %c0_53 = arith.constant 0 : index
    %c0_54 = arith.constant 0 : index
    %121 = vector.load %arg5[%c0_53, %c0_54] : memref<1x32xf32, #tpu.memory_space<vmem>>, vector<1x32xf32>
    %122 = vector.broadcast %121 : vector<1x32xf32> to vector<128x32xf32>
    %123 = arith.addf %120, %122 : vector<128x32xf32>
    %c0_55 = arith.constant 0 : index
    %c0_56 = arith.constant 0 : index
    %c0_57 = arith.constant 0 : index
    %124 = vector.load %arg6[%c0_55, %c0_56, %c0_57] : memref<1x128x32xf32, #tpu.memory_space<vmem>>, vector<1x128x32xf32>
    %125 = vector.shape_cast %124 : vector<1x128x32xf32> to vector<128x32xf32>
    %126 = vector.shape_cast %123 : vector<128x32xf32> to vector<1x128x32xf32>
    tpu.vector_store %arg6[%c0_55, %c0_56, %c0_57], %126 {strides = array<i32>} : memref<1x128x32xf32, #tpu.memory_space<vmem>>, vector<1x128x32xf32>,
    return
  }
  func.func @transform_0(%arg0: i32) -> (i32, i32, i32) {
    %c0_i32 = arith.constant 0 : i32
    %c0_i32_0 = arith.constant 0 : i32
    %c0_i32_1 = arith.constant 0 : i32
    return %arg0, %c0_i32, %c0_i32_0 : i32, i32, i32
  }
  func.func @transform_1(%arg0: i32) -> (i32, i32) {
    %c0_i32 = arith.constant 0 : i32
    %c0_i32_0 = arith.constant 0 : i32
    %c0_i32_1 = arith.constant 0 : i32
    return %c0_i32, %c0_i32_0 : i32, i32
  }
  func.func @transform_2(%arg0: i32) -> (i32, i32) {
    %c0_i32 = arith.constant 0 : i32
    %c0_i32_0 = arith.constant 0 : i32
    %c0_i32_1 = arith.constant 0 : i32
    return %c0_i32, %c0_i32_0 : i32, i32
  }
  func.func @transform_3(%arg0: i32) -> (i32, i32) {
    %c0_i32 = arith.constant 0 : i32
    %c0_i32_0 = arith.constant 0 : i32
    %c0_i32_1 = arith.constant 0 : i32
    return %c0_i32, %c0_i32_0 : i32, i32
  }
  func.func @transform_4(%arg0: i32) -> (i32, i32) {
    %c0_i32 = arith.constant 0 : i32
    %c0_i32_0 = arith.constant 0 : i32
    %c0_i32_1 = arith.constant 0 : i32
    return %c0_i32, %c0_i32_0 : i32, i32
  }
  func.func @transform_5(%arg0: i32) -> (i32, i32, i32) {
    %c0_i32 = arith.constant 0 : i32
    %c0_i32_0 = arith.constant 0 : i32
    %c0_i32_1 = arith.constant 0 : i32
    return %arg0, %c0_i32, %c0_i32_0 : i32, i32, i32
  }
  func.func @transform_6(%arg0: i32) -> (i32, i32, i32, i32) {
    %c0_i32 = arith.constant 0 : i32
    %c0_i32_0 = arith.constant 0 : i32
    %c0_i32_1 = arith.constant 0 : i32
    %c0_i32_2 = arith.constant 0 : i32
    return %arg0, %c0_i32, %c0_i32_0, %c0_i32_1 : i32, i32, i32, i32
  }
}

</mosaic_0001>

<bundles_post_ra>
// kernel: tpu_custom_call.1
= control target key start
LH: loop header
LB: loop body
LE: loop exit
PB: predicated region body
PF: predicated region fallthrough
CT: control target
= control target key end

     0   :  { %12 = vsyncpa [#allocation4], 0  ;;  %s7577_s0 = inlined_call_operand.vmem [shape: f32[2,128,32], index: 0, kind: input, shape index: {}]   ;;  %s7578_s1 = inlined_call_operand.vmem [shape: f32[32,96], index: 1, kind: input, shape index: {}]   ;;  %s7579_s2 = inlined_call_operand.vmem [shape: f32[1,96], index: 2, kind: input, shape index: {}]   ;;  %s7580_s3 = inlined_call_operand.vmem [shape: f32[32,32], index: 3, kind: input, shape index: {}]   ;;  %s7581_s4 = inlined_call_operand.vmem [shape: f32[1,32], index: 4, kind: input, shape index: {}]   ;;  %s7582_s5 = inlined_call_operand.vmem [shape: f32[2,128,32], index: 5, kind: output, shape index: {0}]   ;;  %s7583_s6 = inlined_call_operand.hbm [shape: f32[2,4,128,128], index: 6, kind: output, shape index: {1}]  }
   0x1   :  { %14 = vsyncpa [#allocation4 + $0x1], 0  ;;  %s5973_s21 = smov 0   ;;  %s5975_s22 = smov 0  }
   0x2   :  { %s5977_s23 = smov 0   ;;  %s5979_s24 = smov 0  }
   0x3 LB: > { %s5994_s25 = sadd.s32 4294967295, %s5920_s24   ;;  %s3841_s26 = sadd.s32 4294967294, %s5920_s24   ;;  %s5920_s24 = sphi %s5979_s24, %s7617_s24   ;;  %s5916_s23 = sphi %s5977_s23, %s7616_s23   ;;  %s5912_s22 = sphi %s5975_s22, %s7615_s22   ;;  %s5908_s21 = sphi %s5973_s21, %s7614_s21  }
   0x4   : > { %s5998_s27 = sadd.s32 1, %s5920_s24   ;;  %s163_s28 = sadd.s32 1, %s5916_s23 }
   0x5   : > { %s160_s29 = ssub.s32 %s5920_s24, %s5998_s27  ;;  %p173_p0 = scmp.ne.s32.totalorder %s5916_s23, %s5912_s22 }
   0x6   : > { %p161_p1 = scmp.eq.s32.totalorder %s160_s29, 0  ;;  %p174_p2 = scmp.eq.s32.totalorder %s5994_s25, 1 }
   0x7   : > { %p179_p3 = scmp.ne.s32.totalorder %s5912_s22, %s5908_s21  ;;  %p180_p4 = scmp.eq.s32.totalorder %s3841_s26, 1 }
   0x8   : > { %s6009_s30 = scalar_select %p161_p1, %s5916_s23, %s163_s28  }
   0x9   : > { %p6011_p5 = por %p174_p2, %p173_p0  ;;  %p6015_p6 = por %p180_p4, %p179_p3 }
   0xa   : > { %p3844_p7 = scmp.ge.s32.totalorder %s5920_s24, 1  ;;  %p218_p8 = scmp.lt.s32.totalorder %s5920_s24, 3 }
   0xc   : > { %p219_p9 = pnand %p3844_p7, %p218_p8 }
   0xe   : > { %222 = sbr.rel (%p219_p9) target bundleno = 3600 (0xe10), region = 40 }
  0x15   : > { %v279_v0 = vld [vmem:[%s7578_s1] sm:$0xff]  ;;  %v280_v1 = vld [vmem:[%s7578_s1 + $0x8] sm:$0xff]  ;;  %v281_v2 = vld [vmem:[%s7578_s1 + $0x10] sm:$0xff]  ;;  %p253_p10 = scmp.lt.s32.totalorder %s5994_s25, 1  ;;  %vm290_vm0 = vcmask 261120   ;;  %vm535_vm1 = vcmask 64512  }
  0x16   : > { %v4876_v3 = vpack.c.bf16 %v280_v1, %v279_v0  ;;  %v282_v4 = vld [vmem:[%s7578_s1 + $0x18] sm:$0xff]  ;;  %v3850_v22 = vld [vmem:[%s7579_s2] ss:$0 sm:$0xff]  ;;  %s5922_s9 = smov 96   ;;  %s5923_s10 = smov 64   ;;  %vm6172_vm2 = vmpackc.low %vm535_vm1, %vm535_vm1  ;;  %vm1935_vm4 = vcmask 130112  }
  0x17   : > { %v4880_v5 = vpack.c.bf16 %v282_v4, %v281_v2  ;;  %s6035_s17 = scalar_select %p253_p10, %s5994_s25, 1  ;;  %vm2707_vm5 = vcmask 195712   ;;  %vm3479_vm6 = vcmask 261312  }
  0x18   : > { %4877 = vmatprep.subr.bf16.mxu0 %v4876_v3  ;;  %s5924_s11 = smov 88   ;;  %s5925_s12 = smov 120  }
  0x19   : > { %4879 = vmatpush3.bf16.msra.mxu0 %v4876_v3  ;;  %s4065_s18 = sshll.u32 %s6035_s17, 7  ;;  %s5926_s13 = smov 56  }
  0x1a   : > { %4881 = vmatprep.subr.bf16.mxu0 %v4880_v5  ;;  %s6043_s26 = scalar_lea.vmem %s7577_s0, %s4065_s18  ;;  %s250_s14 = sand.u32 1, %s5912_s22  }
  0x1b   : > { %v263_v6 = vld [vmem:[%s6043_s26] sm:$0xff]  ;;  %v264_v7 = vld [vmem:[%s6043_s26 + $0x8] sm:$0xff]  ;;  %v265_v8 = vld [vmem:[%s6043_s26 + $0x10] sm:$0xff]  ;;  %s3845_s15 = sshll.u32 %s250_s14, 9  ;;  %s5927_s19 = smov 80  }
  0x1c   : > { %4372 = vmatprep.mubr.msk.f32.mxu0 %vm290_vm0, %v263_v6  ;;  %v266_v9 = vld [vmem:[%s6043_s26 + $0x18] sm:$0xff]  ;;  %v267_v10 = vld [vmem:[%s6043_s26 + $0x20] sm:$0xff]  ;;  %v268_v11 = vld [vmem:[%s6043_s26 + $0x28] sm:$0xff]  ;;  %s6423_s16 = scalar_lea.vmem [#allocation3], %s3845_s15  ;;  %s5928_s20 = smov 112  }
  0x1d   : > { %4883 = vmatpush3.bf16.msra.mxu0 %v4880_v5  ;;  %v269_v12 = vld [vmem:[%s6043_s26 + $0x30] sm:$0xff]  ;;  %v270_v13 = vld [vmem:[%s6043_s26 + $0x38] sm:$0xff]  ;;  %v271_v14 = vld [vmem:[%s6043_s26 + $0x40] sm:$0xff]  ;;  %s5930_s28 = smov 72   ;;  %s5931_s29 = smov 104  }
  0x1e   : > { %v272_v15 = vld [vmem:[%s6043_s26 + $0x48] sm:$0xff]  ;;  %v273_v16 = vld [vmem:[%s6043_s26 + $0x50] sm:$0xff]  ;;  %v274_v17 = vld [vmem:[%s6043_s26 + $0x58] sm:$0xff] }
  0x1f   : > { %v275_v18 = vld [vmem:[%s6043_s26 + $0x60] sm:$0xff]  ;;  %v276_v19 = vld [vmem:[%s6043_s26 + $0x68] sm:$0xff]  ;;  %v277_v20 = vld [vmem:[%s6043_s26 + $0x70] sm:$0xff] }
  0x20   : > { %4373 = vmatmul.mubr.msk.f32.vlgmr.msra.gmra.mrb[0].mxu0 %vm290_vm0, %v264_v7  ;;  %v278_v21 = vld [vmem:[%s6043_s26 + $0x78] sm:$0xff]  ;;  %s5929_s26 = smov 48  }
  0x21   : > { %4375 = vmatprep.mubr.msk.f32.mxu0 %vm290_vm0, %v265_v8 }
  0x24   : > { %4376 = vmatmul.mubr.msk.f32.gmra.mrb[2].mxu0 %vm290_vm0, %v266_v9 }
  0x25   : > { %4378 = vmatprep.mubr.msk.f32.mxu0 %vm290_vm0, %v267_v10 }
  0x28   : > { %4379 = vmatmul.mubr.msk.f32.gmra.mrb[4].mxu0 %vm290_vm0, %v268_v11 }
  0x29   : > { %4381 = vmatprep.mubr.msk.f32.mxu0 %vm290_vm0, %v269_v12 }
  0x2c   : > { %4382 = vmatmul.mubr.msk.f32.gmra.mrb[6].mxu0 %vm290_vm0, %v270_v13 }
  0x2d   : > { %4384 = vmatprep.mubr.msk.f32.mxu0 %vm290_vm0, %v271_v14 }
  0x30   : > { %4385 = vmatmul.mubr.msk.f32.gmra.mrb[8].mxu0 %vm290_vm0, %v272_v15 }
  0x31   : > { %4387 = vmatprep.mubr.msk.f32.mxu0 %vm290_vm0, %v273_v16 }
  0x34   : > { %4388 = vmatmul.mubr.msk.f32.gmra.mrb[10].mxu0 %vm290_vm0, %v274_v17 }
  0x35   : > { %4390 = vmatprep.mubr.msk.f32.mxu0 %vm290_vm0, %v275_v18 }
  0x38   : > { %4391 = vmatmul.mubr.msk.f32.gmra.mrb[12].mxu0 %vm290_vm0, %v276_v19 }
  0x39   : > { %4393 = vmatprep.mubr.msk.f32.mxu0 %vm290_vm0, %v277_v20 }
  0x3c   : > { %4394 = vmatmul.mubr.msk.f32.gmra.mrb[14].mxu0 %vm290_vm0, %v278_v21 }
  0xf3   : > { %v4374_v23 = vpop.f32.mrb[0].mxu0 }
  0xf4   : > { %v6080_v24 = vadd.f32 %v4374_v23, %v3850_v22  ;;  %v405_v25 = vpop.f32.mrb[1].mxu0 }
  0xf5   : > { %v6082_v26 = vadd.f32 %v3850_v22, %v405_v25 }
  0xf7   : > { %4428 = vmatprep.mubr.msk.f32.mxu1 %vm535_vm1, %v6082_v26  ;;  %v6088_v27 = vpack.i.bf16 %v6080_v24, %v6082_v26  ;;  %v4377_v28 = vpop.f32.mrb[2].mxu0 }
  0xf8   : > { %v6090_v29 = vadd.f32 %v4377_v28, %v3850_v22  ;;  %v415_v30 = vpop.f32.mrb[3].mxu0 }
  0xf9   : > { %5283 = vrot.lane.b32.xlu0 %v6088_v27, %s5922_s9  ;;  %v6094_v31 = vadd.f32 %v3850_v22, %v415_v30 }
  0xfb   : > { %v6098_v32 = vpack.i.bf16 %v6090_v29, %v6094_v31  ;;  %v4380_v33 = vpop.f32.mrb[4].mxu0 }
  0xfc   : > { %v6100_v34 = vadd.f32 %v4380_v33, %v3850_v22  ;;  %v425_v35 = vpop.f32.mrb[5].mxu0 }
  0xfd   : > { %5288 = vrot.lane.b32.xlu0 %v6098_v32, %s5922_s9  ;;  %v6104_v36 = vadd.f32 %v3850_v22, %v425_v35 }
  0xff   : > { %v4383_v37 = vpop.f32.mrb[6].mxu0  ;;  %v6108_v38 = vpack.i.bf16 %v6100_v34, %v6104_v36 }
 0x100   : > { %v6110_v39 = vadd.f32 %v4383_v37, %v3850_v22  ;;  %v435_v40 = vpop.f32.mrb[7].mxu0 }
 0x101   : > { %v6112_v41 = vadd.f32 %v3850_v22, %v435_v40  ;;  %5293 = vrot.lane.b32.xlu1 %v6108_v38, %s5922_s9 }
 0x103   : > { %v4386_v42 = vpop.f32.mrb[8].mxu0  ;;  %v6118_v43 = vpack.i.bf16 %v6110_v39, %v6112_v41 }
 0x104   : > { %v6120_v44 = vadd.f32 %v4386_v42, %v3850_v22  ;;  %v445_v45 = vpop.f32.mrb[9].mxu0 }
 0x105   : > { %v6122_v46 = vadd.f32 %v3850_v22, %v445_v45  ;;  %5298 = vrot.lane.b32.xlu1 %v6118_v43, %s5922_s9 }
 0x107   : > { %v4389_v47 = vpop.f32.mrb[10].mxu0  ;;  %v6128_v48 = vpack.i.bf16 %v6120_v44, %v6122_v46 }
 0x108   : > { %v6130_v49 = vadd.f32 %v4389_v47, %v3850_v22  ;;  %v455_v50 = vpop.f32.mrb[11].mxu0 }
 0x109   : > { %v6132_v51 = vadd.f32 %v3850_v22, %v455_v50  ;;  %5303 = vrot.lane.b32.xlu0 %v6128_v48, %s5922_s9 }
 0x10b   : > { %v4392_v52 = vpop.f32.mrb[12].mxu0  ;;  %v6138_v53 = vpack.i.bf16 %v6130_v49, %v6132_v51 }
 0x10c   : > { %v6140_v54 = vadd.f32 %v4392_v52, %v3850_v22  ;;  %v465_v55 = vpop.f32.mrb[13].mxu0 }
 0x10d   : > { %v6142_v56 = vadd.f32 %v3850_v22, %v465_v55  ;;  %5308 = vrot.lane.b32.xlu1 %v6138_v53, %s5922_s9 }
 0x10f   : > { %v4395_v57 = vpop.f32.mrb[14].mxu0  ;;  %v6148_v58 = vpack.i.bf16 %v6140_v54, %v6142_v56 }
 0x110   : > { %v6150_v59 = vadd.f32 %v4395_v57, %v3850_v22  ;;  %v475_v60 = vpop.f32.mrb[15].mxu0 }
 0x111   : > { %v6152_v61 = vadd.f32 %v3850_v22, %v475_v60  ;;  %5313 = vrot.lane.b32.xlu0 %v6148_v58, %s5922_s9 }
 0x113   : > { %v6158_v62 = vpack.i.bf16 %v6150_v59, %v6152_v61 }
 0x115   : > { %5318 = vrot.lane.b32.xlu1 %v6158_v62, %s5922_s9  ;;  %5328 = vrot.lane.b32.xlu0 %v6098_v32, %s5923_s10  ;;  %s5932_s9 = smov 40  }
 0x119   : > { %5323 = vrot.lane.b32.xlu1 %v6088_v27, %s5923_s10  ;;  %5338 = vrot.lane.b32.xlu0 %v6118_v43, %s5923_s10 }
 0x11d   : > { %5333 = vrot.lane.b32.xlu1 %v6108_v38, %s5923_s10  ;;  %5353 = vrot.lane.b32.xlu0 %v6148_v58, %s5923_s10 }
 0x121   : > { %5343 = vrot.lane.b32.xlu1 %v6128_v48, %s5923_s10 }
 0x125   : > { %5348 = vrot.lane.b32.xlu1 %v6138_v53, %s5923_s10 }
 0x129   : > { %5358 = vrot.lane.b32.xlu1 %v6158_v62, %s5923_s10  ;;  %s5933_s10 = smov 8  }
 0x16b   : > { %v5284_v63 = vpop.permute.xlu0 %5283 }
 0x16c   : > { %v5286_v0 = vunpack.i.h.bf16 %v5284_v63  ;;  %v5285_v1 = vunpack.i.l.bf16 %v5284_v63 }
 0x16e   : > { %v4884_v3 = vpack.c.bf16 %v5286_v0, %v5285_v1 }
 0x16f   : > { %v5289_v4 = vpop.permute.xlu0 %5288 }
 0x170   : > { %4886 = vmatprep.subr.msk.bf16.mxu1 %vm6172_vm2, %v4884_v3  ;;  %v5291_v5 = vunpack.i.h.bf16 %v5289_v4  ;;  %v5290_v6 = vunpack.i.l.bf16 %v5289_v4 }
 0x171   : > { %4889 = vmatpush3.bf16.xpose.msk.msra.mxu1 %vm6172_vm2, %v4884_v3 }
 0x172   : > { %v4890_v7 = vpack.c.bf16 %v5291_v5, %v5290_v6 }
 0x173   : > { %v5294_v8 = vpop.permute.xlu1 %5293 }
 0x174   : > { %4892 = vmatprep.subr.msk.bf16.mxu1 %vm6172_vm2, %v4890_v7  ;;  %v5296_v9 = vunpack.i.h.bf16 %v5294_v8  ;;  %v5295_v10 = vunpack.i.l.bf16 %v5294_v8 }
 0x176   : > { %v4896_v11 = vpack.c.bf16 %v5296_v9, %v5295_v10 }
 0x177   : > { %v5299_v12 = vpop.permute.xlu1 %5298 }
 0x178   : > { %v5301_v13 = vunpack.i.h.bf16 %v5299_v12  ;;  %v5300_v14 = vunpack.i.l.bf16 %v5299_v12 }
 0x179   : > { %4895 = vmatpush3.bf16.xpose.msk.msra.mxu1 %vm6172_vm2, %v4890_v7 }
 0x17a   : > { %4898 = vmatprep.subr.msk.bf16.mxu1 %vm6172_vm2, %v4896_v11  ;;  %v4902_v16 = vpack.c.bf16 %v5301_v13, %v5300_v14 }
 0x17b   : > { %v5304_v15 = vpop.permute.xlu0 %5303 }
 0x17c   : > { %v5306_v18 = vunpack.i.h.bf16 %v5304_v15  ;;  %v5305_v19 = vunpack.i.l.bf16 %v5304_v15 }
 0x17e   : > { %v4908_v21 = vpack.c.bf16 %v5306_v18, %v5305_v19 }
 0x17f   : > { %v5309_v17 = vpop.permute.xlu1 %5308 }
 0x180   : > { %v5311_v25 = vunpack.i.h.bf16 %v5309_v17  ;;  %v5310_v28 = vunpack.i.l.bf16 %v5309_v17 }
 0x181   : > { %4901 = vmatpush3.bf16.xpose.msk.msra.mxu1 %vm6172_vm2, %v4896_v11 }
 0x182   : > { %4904 = vmatprep.subr.msk.bf16.mxu1 %vm6172_vm2, %v4902_v16  ;;  %v4914_v42 = vpack.c.bf16 %v5311_v25, %v5310_v28  ;;  %v484_v28 = vlaneseq }
 0x183   : > { %v5314_v20 = vpop.permute.xlu0 %5313 }
 0x184   : > { %v5316_v60 = vunpack.i.h.bf16 %v5314_v20  ;;  %v5315_v63 = vunpack.i.l.bf16 %v5314_v20 }
 0x186   : > { %v4920_v5 = vpack.c.bf16 %v5316_v60, %v5315_v63 }
 0x187   : > { %v5319_v22 = vpop.permute.xlu1 %5318  ;;  %v5329_v23 = vpop.permute.xlu0 %5328 }
 0x188   : > { %v5331_v33 = vunpack.i.h.bf16 %v5329_v23  ;;  %v5330_v35 = vunpack.i.l.bf16 %v5329_v23  ;;  %v5321_v10 = vunpack.i.h.bf16 %v5319_v22  ;;  %v5320_v11 = vunpack.i.l.bf16 %v5319_v22 }
 0x189   : > { %4907 = vmatpush3.bf16.xpose.msk.msra.mxu1 %vm6172_vm2, %v4902_v16 }
 0x18a   : > { %4910 = vmatprep.subr.msk.bf16.mxu1 %vm6172_vm2, %v4908_v21  ;;  %v4936_v55 = vpack.c.bf16 %v5331_v33, %v5330_v35  ;;  %v4926_v16 = vpack.c.bf16 %v5321_v10, %v5320_v11 }
 0x18b   : > { %v5324_v30 = vpop.permute.xlu1 %5323  ;;  %v5339_v57 = vpop.permute.xlu0 %5338 }
 0x18c   : > { %v5326_v37 = vunpack.i.h.bf16 %v5324_v30  ;;  %v5325_v40 = vunpack.i.l.bf16 %v5324_v30  ;;  %v5341_v1 = vunpack.i.h.bf16 %v5339_v57  ;;  %v5340_v3 = vunpack.i.l.bf16 %v5339_v57 }
 0x18d   : > { %v6238_v30 = vand.u32 127, %v484_v28 }
 0x18e   : > { %v4932_v45 = vpack.c.bf16 %v5326_v37, %v5325_v40  ;;  %v4944_v8 = vpack.c.bf16 %v5341_v1, %v5340_v3 }
 0x18f   : > { %v5334_v47 = vpop.permute.xlu1 %5333  ;;  %v5354_v15 = vpop.permute.xlu0 %5353  ;;  %vm486_vm3 = vcmp.lt.s32.totalorder %v6238_v30, 8 }
 0x190   : > { %v5336_v50 = vunpack.i.h.bf16 %v5334_v47  ;;  %v5335_v52 = vunpack.i.l.bf16 %v5334_v47  ;;  %4933 = vmatprep.subr.bf16.mxu0 %v4932_v45  ;;  %v5356_v17 = vunpack.i.h.bf16 %v5354_v15  ;;  %v5355_v18 = vunpack.i.l.bf16 %v5354_v15 }
 0x191   : > { %4913 = vmatpush3.bf16.xpose.msk.msra.mxu1 %vm6172_vm2, %v4908_v21  ;;  %4935 = vmatpush3.bf16.msra.mxu0 %v4932_v45 }
 0x192   : > { %4937 = vmatprep.subr.bf16.mxu0 %v4936_v55  ;;  %4916 = vmatprep.subr.msk.bf16.mxu1 %vm6172_vm2, %v4914_v42  ;;  %v4940_v4 = vpack.c.bf16 %v5336_v50, %v5335_v52  ;;  %v4956_v23 = vpack.c.bf16 %v5356_v17, %v5355_v18 }
 0x193   : > { %v5344_v0 = vpop.permute.xlu1 %5343 }
 0x194   : > { %v5346_v6 = vunpack.i.h.bf16 %v5344_v0  ;;  %v5345_v7 = vunpack.i.l.bf16 %v5344_v0 }
 0x195   : > { %4939 = vmatpush3.bf16.msra.mxu0 %v4936_v55 }
 0x196   : > { %4941 = vmatprep.subr.bf16.mxu0 %v4940_v4  ;;  %v4948_v14 = vpack.c.bf16 %v5346_v6, %v5345_v7 }
 0x197   : > { %v5349_v9 = vpop.permute.xlu1 %5348 }
 0x198   : > { %v5351_v12 = vunpack.i.h.bf16 %v5349_v9  ;;  %v5350_v13 = vunpack.i.l.bf16 %v5349_v9 }
 0x199   : > { %4919 = vmatpush3.bf16.xpose.msk.msra.mxu1 %vm6172_vm2, %v4914_v42  ;;  %4943 = vmatpush3.bf16.msra.mxu0 %v4940_v4 }
 0x19a   : > { %4945 = vmatprep.subr.bf16.mxu0 %v4944_v8  ;;  %4922 = vmatprep.subr.msk.bf16.mxu1 %vm6172_vm2, %v4920_v5  ;;  %v4952_v19 = vpack.c.bf16 %v5351_v12, %v5350_v13 }
 0x19b   : > { %v5359_v20 = vpop.permute.xlu1 %5358 }
 0x19c   : > { %v5361_v21 = vunpack.i.h.bf16 %v5359_v20  ;;  %v5360_v22 = vunpack.i.l.bf16 %v5359_v20 }
 0x19d   : > { %4947 = vmatpush3.bf16.msra.mxu0 %v4944_v8 }
 0x19e   : > { %4949 = vmatprep.subr.bf16.mxu0 %v4948_v14  ;;  %v4960_v25 = vpack.c.bf16 %v5361_v21, %v5360_v22 }
 0x1a1   : > { %4925 = vmatpush3.bf16.xpose.msk.msra.mxu1 %vm6172_vm2, %v4920_v5  ;;  %4951 = vmatpush3.bf16.msra.mxu0 %v4948_v14 }
 0x1a2   : > { %4953 = vmatprep.subr.bf16.mxu0 %v4952_v19  ;;  %4928 = vmatprep.subr.msk.bf16.mxu1 %vm6172_vm2, %v4926_v16 }
 0x1a5   : > { %4955 = vmatpush3.bf16.msra.mxu0 %v4952_v19 }
 0x1a6   : > { %4957 = vmatprep.subr.bf16.mxu0 %v4956_v23 }
 0x1a9   : > { %4931 = vmatpush3.bf16.xpose.msk.msra.mxu1 %vm6172_vm2, %v4926_v16  ;;  %4959 = vmatpush3.bf16.msra.mxu0 %v4956_v23 }
 0x1aa   : > { %4961 = vmatprep.subr.bf16.mxu0 %v4960_v25 }
 0x1ad   : > { %4963 = vmatpush3.bf16.msra.mxu0 %v4960_v25 }
 0x1b0   : > { %4429 = vmatmul.mubr.msk.f32.vlgmr.msra.gmra.mrb[0].mxu1 %vm535_vm1, %v6080_v24 }
 0x1b1   : > { %4431 = vmatprep.mubr.msk.f32.mxu1 %vm535_vm1, %v6094_v31 }
 0x1b4   : > { %4432 = vmatmul.mubr.msk.f32.gmra.mrb[2].mxu1 %vm535_vm1, %v6090_v29 }
 0x1b5   : > { %4434 = vmatprep.mubr.msk.f32.mxu1 %vm535_vm1, %v6104_v36 }
 0x1b8   : > { %4435 = vmatmul.mubr.msk.f32.gmra.mrb[4].mxu1 %vm535_vm1, %v6100_v34 }
 0x1b9   : > { %4437 = vmatprep.mubr.msk.f32.mxu1 %vm535_vm1, %v6112_v41 }
 0x1bc   : > { %4438 = vmatmul.mubr.msk.f32.gmra.mrb[6].mxu1 %vm535_vm1, %v6110_v39 }
 0x1bd   : > { %4440 = vmatprep.mubr.msk.f32.mxu1 %vm535_vm1, %v6122_v46 }
 0x1c0   : > { %4441 = vmatmul.mubr.msk.f32.gmra.mrb[8].mxu1 %vm535_vm1, %v6120_v44 }
 0x1c1   : > { %4443 = vmatprep.mubr.msk.f32.mxu1 %vm535_vm1, %v6132_v51 }
 0x1c4   : > { %4444 = vmatmul.mubr.msk.f32.gmra.mrb[10].mxu1 %vm535_vm1, %v6130_v49 }
 0x1c5   : > { %4446 = vmatprep.mubr.msk.f32.mxu1 %vm535_vm1, %v6142_v56 }
 0x1c8   : > { %4447 = vmatmul.mubr.msk.f32.gmra.mrb[12].mxu1 %vm535_vm1, %v6140_v54 }
 0x1c9   : > { %4449 = vmatprep.mubr.msk.f32.mxu1 %vm535_vm1, %v6152_v61 }
 0x1cc   : > { %4450 = vmatmul.mubr.msk.f32.gmra.mrb[14].mxu1 %vm535_vm1, %v6150_v59 }
 0x283   : > { %v4430_v33 = vpop.f32.mrb[0].mxu1 }
 0x284   : > { %v666_v35 = vpop.f32.mrb[1].mxu1  ;;  %v748_v37 = vsel %vm486_vm3, %v4430_v33, -1e+30 }
 0x285   : > { %765 = vmax.xlane.f32.xlu1 %v748_v37  ;;  %v747_v40 = vsel %vm486_vm3, %v666_v35, -1e+30 }
 0x286   : > { %763 = vmax.xlane.f32.xlu0 %v747_v40 }
 0x287   : > { %v4433_v42 = vpop.f32.mrb[2].mxu1 }
 0x288   : > { %v676_v45 = vpop.f32.mrb[3].mxu1  ;;  %v750_v6 = vsel %vm486_vm3, %v4433_v42, -1e+30 }
 0x289   : > { %v749_v8 = vsel %vm486_vm3, %v676_v45, -1e+30 }
 0x28b   : > { %v4436_v47 = vpop.f32.mrb[4].mxu1 }
 0x28c   : > { %v686_v50 = vpop.f32.mrb[5].mxu1  ;;  %v752_v10 = vsel %vm486_vm3, %v4436_v47, -1e+30 }
 0x28d   : > { %v6255_v7 = vsel %vm486_vm3, %v686_v50, -1e+30 }
 0x28f   : > { %v4439_v52 = vpop.f32.mrb[6].mxu1 }
 0x290   : > { %v696_v55 = vpop.f32.mrb[7].mxu1  ;;  %v6274_v12 = vsel %vm486_vm3, %v4439_v52, -1e+30 }
 0x291   : > { %v6262_v9 = vsel %vm486_vm3, %v696_v55, -1e+30 }
 0x293   : > { %v4442_v57 = vpop.f32.mrb[8].mxu1 }
 0x294   : > { %v706_v60 = vpop.f32.mrb[9].mxu1  ;;  %v6281_v14 = vsel %vm486_vm3, %v4442_v57, -1e+30 }
 0x295   : > { %v6269_v11 = vsel %vm486_vm3, %v706_v60, -1e+30 }
 0x296   : > { %5368 = vrot.lane.b32.xlu1 %v6098_v32, %s5924_s11 }
 0x297   : > { %v4445_v63 = vpop.f32.mrb[10].mxu1 }
 0x298   : > { %v716_v0 = vpop.f32.mrb[11].mxu1  ;;  %v6291_v16 = vsel %vm486_vm3, %v4445_v63, -1e+30 }
 0x299   : > { %v757_v13 = vsel %vm486_vm3, %v716_v0, -1e+30 }
 0x29a   : > { %5373 = vrot.lane.b32.xlu1 %v6108_v38, %s5924_s11 }
 0x29b   : > { %v4448_v1 = vpop.f32.mrb[12].mxu1 }
 0x29c   : > { %5363 = vrot.lane.b32.xlu0 %v6088_v27, %s5924_s11  ;;  %v726_v3 = vpop.f32.mrb[13].mxu1  ;;  %v6301_v18 = vsel %vm486_vm3, %v4448_v1, -1e+30 }
 0x29d   : > { %v6286_v15 = vsel %vm486_vm3, %v726_v3, -1e+30 }
 0x29f   : > { %v4451_v4 = vpop.f32.mrb[14].mxu1 }
 0x2a0   : > { %v736_v5 = vpop.f32.mrb[15].mxu1  ;;  %v6306_v19 = vsel %vm486_vm3, %v4451_v4, -1e+30 }
 0x2a1   : > { %v6296_v17 = vsel %vm486_vm3, %v736_v5, -1e+30 }
 0x2bb   : > { %769 = vmax.xlane.f32.xlu0 %v750_v6 }
 0x2be   : > { %771 = vmax.xlane.f32.xlu1 %v6255_v7 }
 0x2bf   : > { %767 = vmax.xlane.f32.xlu0 %v749_v8 }
 0x2c2   : > { %775 = vmax.xlane.f32.xlu1 %v6262_v9 }
 0x2c3   : > { %773 = vmax.xlane.f32.xlu0 %v752_v10 }
 0x2c6   : > { %779 = vmax.xlane.f32.xlu1 %v6269_v11 }
 0x2c7   : > { %777 = vmax.xlane.f32.xlu0 %v6274_v12 }
 0x2ca   : > { %783 = vmax.xlane.f32.xlu1 %v757_v13 }
 0x2cb   : > { %781 = vmax.xlane.f32.xlu0 %v6281_v14 }
 0x2ce   : > { %787 = vmax.xlane.f32.xlu1 %v6286_v15 }
 0x2cf   : > { %785 = vmax.xlane.f32.xlu0 %v6291_v16 }
 0x2d2   : > { %791 = vmax.xlane.f32.xlu1 %v6296_v17 }
 0x2d3   : > { %789 = vmax.xlane.f32.xlu0 %v6301_v18 }
 0x2d7   : > { %793 = vmax.xlane.f32.xlu0 %v6306_v19 }
 0x2e3   : > { %5383 = vrot.lane.b32.xlu1 %v6128_v48, %s5924_s11 }
 0x2e7   : > { %5388 = vrot.lane.b32.xlu1 %v6138_v53, %s5924_s11 }
 0x312   : > { %v766_v20 = vpop.xlane.xlu1 %765 }
 0x313   : > { %v796_v21 = vsub.f32 %v748_v37, %v766_v20  ;;  %v764_v22 = vpop.xlane.xlu0 %763 }
 0x314   : > { %v795_v23 = vsub.f32 %v747_v40, %v764_v22 }
 0x315   : > { %v813_v25 = vmul.f32 1.442695, %v796_v21 }
 0x316   : > { %v811_v28 = vmul.f32 1.442695, %v795_v23  ;;  %v6326_v37 = vpop.permute.xlu1 %5368 }
 0x317   : > { %5602 = vpow2.f32 %v813_v25  ;;  %v5364_v33 = vpop.permute.xlu0 %5363 }
 0x318   : > { %5604 = vpow2.f32 %v811_v28  ;;  %v5366_v35 = vunpack.i.h.bf16 %v5364_v33  ;;  %v5365_v42 = vunpack.i.l.bf16 %v5364_v33 }
 0x31a   : > { %v6313_v45 = vpack.c.bf16 %v5366_v35, %v5365_v42  ;;  %v6328_v40 = vpop.permute.xlu1 %5373 }
 0x31c   : > { %4966 = vmatprep.subr.msk.bf16.mxu0 %vm6172_vm2, %v6313_v45 }
 0x321   : > { %v6318_v47 = vpop.eup %5602 }
 0x322   : > { %v6320_v50 = vpop.eup %5604  ;;  %845 = vadd.xlane.f32.xlu0 %v6318_v47 }
 0x323   : > { %843 = vadd.xlane.f32.xlu1 %v6320_v50 }
 0x338   : > { %5378 = vrot.lane.b32.xlu0 %v6118_v43, %s5924_s11 }
 0x348   : > { %v770_v52 = vpop.xlane.xlu0 %769 }
 0x349   : > { %v798_v55 = vsub.f32 %v750_v6, %v770_v52 }
 0x34b   : > { %v817_v57 = vmul.f32 1.442695, %v798_v55  ;;  %v772_v60 = vpop.xlane.xlu1 %771 }
 0x34c   : > { %v768_v63 = vpop.xlane.xlu0 %767  ;;  %v799_v5 = vsub.f32 %v6255_v7, %v772_v60 }
 0x34d   : > { %5606 = vpow2.f32 %v817_v57  ;;  %v797_v0 = vsub.f32 %v749_v8, %v768_v63 }
 0x34e   : > { %v819_v25 = vmul.f32 1.442695, %v799_v5 }
 0x34f   : > { %v815_v1 = vmul.f32 1.442695, %v797_v0  ;;  %v776_v3 = vpop.xlane.xlu1 %775 }
 0x350   : > { %v774_v4 = vpop.xlane.xlu0 %773  ;;  %v801_v8 = vsub.f32 %v6262_v9, %v776_v3 }
 0x351   : > { %5608 = vpow2.f32 %v815_v1  ;;  %v800_v20 = vsub.f32 %v752_v10, %v774_v4 }
 0x352   : > { %v823_v55 = vmul.f32 1.442695, %v801_v8 }
 0x353   : > { %v821_v21 = vmul.f32 1.442695, %v800_v20  ;;  %v780_v22 = vpop.xlane.xlu1 %779 }
 0x354   : > { %v778_v23 = vpop.xlane.xlu0 %777  ;;  %v803_v9 = vsub.f32 %v6269_v11, %v780_v22 }
 0x355   : > { %5610 = vpow2.f32 %v821_v21  ;;  %v802_v28 = vsub.f32 %v6274_v12, %v778_v23 }
 0x356   : > { %5612 = vpow2.f32 %v819_v25  ;;  %v827_v0 = vmul.f32 1.442695, %v803_v9 }
 0x357   : > { %v6332_v6 = vpop.eup %5606  ;;  %v784_v33 = vpop.xlane.xlu1 %783  ;;  %v825_v42 = vmul.f32 1.442695, %v802_v28 }
 0x358   : > { %v805_v35 = vsub.f32 %v757_v13, %v784_v33  ;;  %849 = vadd.xlane.f32.xlu0 %v6332_v6  ;;  %v782_v52 = vpop.xlane.xlu0 %781 }
 0x359   : > { %v804_v12 = vsub.f32 %v6281_v14, %v782_v52 }
 0x35a   : > { %v831_v7 = vmul.f32 1.442695, %v805_v35 }
 0x35b   : > { %v6336_v10 = vpop.eup %5608  ;;  %v829_v60 = vmul.f32 1.442695, %v804_v12  ;;  %v788_v20 = vpop.xlane.xlu1 %787 }
 0x35c   : > { %5614 = vpow2.f32 %v831_v7  ;;  %847 = vadd.xlane.f32.xlu1 %v6336_v10  ;;  %v786_v13 = vpop.xlane.xlu0 %785 }
 0x35d   : > { %5616 = vpow2.f32 %v825_v42  ;;  %v806_v1 = vsub.f32 %v6291_v16, %v786_v13  ;;  %v807_v16 = vsub.f32 %v6286_v15, %v788_v20 }
 0x35e   : > { %5618 = vpow2.f32 %v823_v55 }
 0x35f   : > { %v6340_v57 = vpop.eup %5610  ;;  %5620 = vpow2.f32 %v829_v60  ;;  %v833_v11 = vmul.f32 1.442695, %v806_v1  ;;  %v835_v25 = vmul.f32 1.442695, %v807_v16  ;;  %v792_v42 = vpop.xlane.xlu1 %791 }
 0x360   : > { %853 = vadd.xlane.f32.xlu0 %v6340_v57  ;;  %v6344_v63 = vpop.eup %5612  ;;  %v790_v14 = vpop.xlane.xlu0 %789  ;;  %5622 = vpow2.f32 %v827_v0  ;;  %v809_v7 = vsub.f32 %v6296_v17, %v792_v42 }
 0x361   : > { %v808_v5 = vsub.f32 %v6301_v18, %v790_v14  ;;  %5624 = vpow2.f32 %v833_v11 }
 0x362   : > { %v839_v55 = vmul.f32 1.442695, %v809_v7 }
 0x363   : > { %v837_v22 = vmul.f32 1.442695, %v808_v5  ;;  %v5384_v17 = vpop.permute.xlu1 %5383 }
 0x364   : > { %851 = vadd.xlane.f32.xlu0 %v6344_v63  ;;  %v794_v35 = vpop.xlane.xlu0 %793 }
 0x365   : > { %5626 = vpow2.f32 %v837_v22  ;;  %v810_v8 = vsub.f32 %v6306_v19, %v794_v35  ;;  %v5370_v35 = vunpack.i.l.bf16 %v6326_v37 }
 0x366   : > { %v6348_v3 = vpop.eup %5614  ;;  %5628 = vpow2.f32 %v835_v25  ;;  %v5371_v25 = vunpack.i.h.bf16 %v6326_v37 }
 0x367   : > { %v6350_v4 = vpop.eup %5616  ;;  %863 = vadd.xlane.f32.xlu1 %v6348_v3  ;;  %v841_v52 = vmul.f32 1.442695, %v810_v8  ;;  %v6396_v13 = vpop.permute.xlu1 %5388 }
 0x368   : > { %857 = vadd.xlane.f32.xlu0 %v6350_v4  ;;  %v6355_v21 = vpop.eup %5618  ;;  %v4970_v7 = vpack.c.bf16 %v5371_v25, %v5370_v35 }
 0x369   : > { %v6359_v23 = vpop.eup %5620  ;;  %5630 = vpow2.f32 %v841_v52 }
 0x36a   : > { %v6362_v28 = vpop.eup %5622  ;;  %5632 = vpow2.f32 %v839_v55 }
 0x36b   : > { %v6365_v18 = vpop.eup %5624 }
 0x36c   : > { %855 = vadd.xlane.f32.xlu0 %v6355_v21 }
 0x36f   : > { %v6370_v15 = vpop.eup %5626 }
 0x370   : > { %861 = vadd.xlane.f32.xlu0 %v6359_v23  ;;  %v6373_v33 = vpop.eup %5628 }
 0x373   : > { %v6382_v12 = vpop.eup %5630 }
 0x374   : > { %859 = vadd.xlane.f32.xlu0 %v6362_v28  ;;  %v6387_v19 = vpop.eup %5632 }
 0x378   : > { %865 = vadd.xlane.f32.xlu0 %v6365_v18  ;;  %5398 = vrot.lane.b32.xlu1 %v6158_v62, %s5924_s11 }
 0x37c   : > { %869 = vadd.xlane.f32.xlu0 %v6370_v15 }
 0x380   : > { %867 = vadd.xlane.f32.xlu0 %v6373_v33 }
 0x396   : > { %5393 = vrot.lane.b32.xlu0 %v6148_v58, %s5924_s11  ;;  %s5934_s11 = smov 16  }
 0x39a   : > { %1188 = vrot.lane.b32.xlu0 %v6104_v36, %s5925_s12 }
 0x39c   : > { %873 = vadd.xlane.f32.xlu1 %v6382_v12 }
 0x39e   : > { %1192 = vrot.lane.b32.xlu0 %v6112_v41, %s5925_s12 }
 0x3a0   : > { %871 = vadd.xlane.f32.xlu1 %v6387_v19 }
 0x3a2   : > { %1196 = vrot.lane.b32.xlu0 %v6122_v46, %s5925_s12 }
 0x3a6   : > { %1200 = vrot.lane.b32.xlu0 %v6132_v51, %s5925_s12 }
 0x3aa   : > { %1204 = vrot.lane.b32.xlu0 %v6142_v56, %s5925_s12 }
 0x3ae   : > { %1208 = vrot.lane.b32.xlu0 %v6152_v61, %s5925_s12 }
 0x3af   : > { %v846_v9 = vpop.xlane.xlu0 %845 }
 0x3b0   : > { %5634 = vrcp.f32 %v846_v9  ;;  %v844_v60 = vpop.xlane.xlu1 %843 }
 0x3b1   : > { %5636 = vrcp.f32 %v844_v60  ;;  %1180 = vrot.lane.b32.xlu1 %v6082_v26, %s5925_s12 }
 0x3b2   : > { %5408 = vrot.lane.b32.xlu0 %v6098_v32, %s5926_s13 }
 0x3b3   : > { %v5379_v52 = vpop.permute.xlu0 %5378 }
 0x3b4   : > { %v5380_v55 = vunpack.i.l.bf16 %v5379_v52 }
 0x3b5   : > { %1182 = vrot.lane.b32.xlu1 %v6080_v24, %s5925_s12 }
 0x3b6   : > { %5418 = vrot.lane.b32.xlu0 %v6118_v43, %s5926_s13 }
 0x3b9   : > { %1184 = vrot.lane.b32.xlu1 %v6094_v31, %s5925_s12 }
 0x3ba   : > { %v5635_v0 = vpop.eup %5634  ;;  %5433 = vrot.lane.b32.xlu0 %v6148_v58, %s5926_s13 }
 0x3bb   : > { %v5637_v1 = vpop.eup %5636  ;;  %v892_v14 = vmul.f32 %v5635_v0, %v846_v9  ;;  %v5386_v9 = vunpack.i.h.bf16 %v5384_v17 }
 0x3bc   : > { %v891_v11 = vmul.f32 %v5637_v1, %v844_v60  ;;  %v5385_v60 = vunpack.i.l.bf16 %v5384_v17 }
 0x3bd   : > { %v908_v5 = vsub.f32 2.0, %v892_v14  ;;  %1186 = vrot.lane.b32.xlu1 %v6090_v29, %s5925_s12  ;;  %v5390_v14 = vunpack.i.l.bf16 %v6396_v13 }
 0x3be   : > { %v907_v20 = vsub.f32 2.0, %v891_v11 }
 0x3bf   : > { %v924_v16 = vmul.f32 %v5635_v0, %v908_v5  ;;  %v4988_v0 = vpack.c.bf16 %v5386_v9, %v5385_v60 }
 0x3c0   : > { %v923_v22 = vmul.f32 %v5637_v1, %v907_v20  ;;  %v5391_v1 = vunpack.i.h.bf16 %v6396_v13 }
 0x3c1   : > { %v940_v8 = vmul.f32 %v6318_v47, %v924_v16  ;;  %1190 = vrot.lane.b32.xlu1 %v6100_v34, %s5925_s12  ;;  %v5376_v47 = vunpack.i.h.bf16 %v6328_v40 }
 0x3c2   : > { %v939_v42 = vmul.f32 %v6320_v50, %v923_v22  ;;  %v5375_v50 = vunpack.i.l.bf16 %v6328_v40  ;;  %v4994_v17 = vpack.c.bf16 %v5391_v1, %v5390_v14 }
 0x3c3   : > { %956 = vst [vmem:[%s6423_s16 + $0x8] sm:$0xff] %v940_v8 }
 0x3c4   : > { %955 = vst [vmem:[%s6423_s16] sm:$0xff] %v939_v42  ;;  %4484 = vmatprep.mubr.f32.mxu0 %v939_v42  ;;  %v4976_v37 = vpack.c.bf16 %v5376_v47, %v5375_v50 }
 0x3c5   : > { %1194 = vrot.lane.b32.xlu1 %v6110_v39, %s5925_s12  ;;  %4485 = vmatmul.mubr.f32.vlgmr.msra.gmra.mrb[16].mxu0 %v940_v8 }
 0x3c6   : > { %4969 = vmatpush3.bf16.xpose.msk.msra.mxu0 %vm6172_vm2, %v6313_v45  ;;  %v5381_v45 = vunpack.i.h.bf16 %v5379_v52 }
 0x3c7   : > { %4972 = vmatprep.subr.msk.bf16.mxu0 %vm6172_vm2, %v4970_v7 }
 0x3c8   : > { %v4982_v40 = vpack.c.bf16 %v5381_v45, %v5380_v55 }
 0x3c9   : > { %1198 = vrot.lane.b32.xlu1 %v6120_v44, %s5925_s12 }
 0x3cd   : > { %1202 = vrot.lane.b32.xlu1 %v6130_v49, %s5925_s12 }
 0x3ce   : > { %4975 = vmatpush3.bf16.xpose.msk.msra.mxu0 %vm6172_vm2, %v4970_v7 }
 0x3cf   : > { %4978 = vmatprep.subr.msk.bf16.mxu0 %vm6172_vm2, %v4976_v37 }
 0x3d1   : > { %1206 = vrot.lane.b32.xlu1 %v6140_v54, %s5925_s12 }
 0x3d5   : > { %1210 = vrot.lane.b32.xlu1 %v6150_v59, %s5925_s12 }
 0x3d6   : > { %4981 = vmatpush3.bf16.xpose.msk.msra.mxu0 %vm6172_vm2, %v4976_v37 }
 0x3d7   : > { %4984 = vmatprep.subr.msk.bf16.mxu0 %vm6172_vm2, %v4982_v40 }
 0x3d9   : > { %5403 = vrot.lane.b32.xlu1 %v6088_v27, %s5926_s13 }
 0x3dd   : > { %5413 = vrot.lane.b32.xlu1 %v6108_v38, %s5926_s13 }
 0x3de   : > { %4987 = vmatpush3.bf16.xpose.msk.msra.mxu0 %vm6172_vm2, %v4982_v40 }
 0x3df   : > { %4990 = vmatprep.subr.msk.bf16.mxu0 %vm6172_vm2, %v4988_v0 }
 0x3e1   : > { %5423 = vrot.lane.b32.xlu1 %v6128_v48, %s5926_s13 }
 0x3e5   : > { %v850_v11 = vpop.xlane.xlu0 %849  ;;  %5428 = vrot.lane.b32.xlu1 %v6138_v53, %s5926_s13 }
 0x3e6   : > { %5638 = vrcp.f32 %v850_v11  ;;  %4993 = vmatpush3.bf16.xpose.msk.msra.mxu0 %vm6172_vm2, %v4988_v0 }
 0x3e7   : > { %4996 = vmatprep.subr.msk.bf16.mxu0 %vm6172_vm2, %v4994_v17 }
 0x3e9   : > { %5438 = vrot.lane.b32.xlu1 %v6158_v62, %s5926_s13  ;;  %v848_v5 = vpop.xlane.xlu1 %847 }
 0x3ea   : > { %5640 = vrcp.f32 %v848_v5 }
 0x3ed   : > { %v854_v13 = vpop.xlane.xlu0 %853 }
 0x3ee   : > { %5642 = vrcp.f32 %v854_v13  ;;  %4999 = vmatpush3.bf16.xpose.msk.msra.mxu0 %vm6172_vm2, %v4994_v17 }
 0x3f0   : > { %v5639_v20 = vpop.eup %5638 }
 0x3f1   : > { %v894_v16 = vmul.f32 %v5639_v20, %v850_v11  ;;  %v852_v22 = vpop.xlane.xlu0 %851 }
 0x3f2   : > { %5644 = vrcp.f32 %v852_v22 }
 0x3f3   : > { %v910_v25 = vsub.f32 2.0, %v894_v16 }
 0x3f4   : > { %v5641_v35 = vpop.eup %5640  ;;  %v864_v8 = vpop.xlane.xlu1 %863 }
 0x3f5   : > { %v893_v42 = vmul.f32 %v5641_v35, %v848_v5  ;;  %5646 = vrcp.f32 %v864_v8  ;;  %v858_v7 = vpop.xlane.xlu0 %857  ;;  %v926_v47 = vmul.f32 %v5639_v20, %v910_v25 }
 0x3f6   : > { %5648 = vrcp.f32 %v858_v7 }
 0x3f7   : > { %v909_v50 = vsub.f32 2.0, %v893_v42  ;;  %v942_v37 = vmul.f32 %v6332_v6, %v926_v47 }
 0x3f8   : > { %v5643_v52 = vpop.eup %5642 }
 0x3f9   : > { %v896_v45 = vmul.f32 %v5643_v52, %v854_v13  ;;  %v856_v55 = vpop.xlane.xlu0 %855  ;;  %v925_v40 = vmul.f32 %v5641_v35, %v909_v50  ;;  %958 = vst [vmem:[%s6423_s16 + $0x18] sm:$0xff] %v942_v37 }
 0x3fa   : > { %5650 = vrcp.f32 %v856_v55 }
 0x3fb   : > { %v912_v9 = vsub.f32 2.0, %v896_v45  ;;  %v941_v60 = vmul.f32 %v6336_v10, %v925_v40 }
 0x3fc   : > { %v5645_v0 = vpop.eup %5644 }
 0x3fd   : > { %v895_v1 = vmul.f32 %v5645_v0, %v852_v22  ;;  %v862_v14 = vpop.xlane.xlu0 %861  ;;  %957 = vst [vmem:[%s6423_s16 + $0x10] sm:$0xff] %v941_v60  ;;  %4487 = vmatprep.mubr.f32.mxu0 %v941_v60  ;;  %v928_v17 = vmul.f32 %v5643_v52, %v912_v9 }
 0x3fe   : > { %5652 = vrcp.f32 %v862_v14  ;;  %4488 = vmatmul.mubr.f32.gmra.mrb[18].mxu0 %v942_v37 }
 0x3ff   : > { %v5647_v11 = vpop.eup %5646  ;;  %v911_v6 = vsub.f32 2.0, %v895_v1  ;;  %v944_v5 = vmul.f32 %v6340_v57, %v928_v17 }
 0x400   : > { %v5649_v13 = vpop.eup %5648  ;;  %v901_v20 = vmul.f32 %v5647_v11, %v864_v8 }
 0x401   : > { %v898_v16 = vmul.f32 %v5649_v13, %v858_v7  ;;  %v860_v25 = vpop.xlane.xlu0 %859  ;;  %v927_v35 = vmul.f32 %v5645_v0, %v911_v6  ;;  %960 = vst [vmem:[%s6423_s16 + $0x28] sm:$0xff] %v944_v5 }
 0x402   : > { %v917_v10 = vsub.f32 2.0, %v901_v20  ;;  %5654 = vrcp.f32 %v860_v25 }
 0x403   : > { %v914_v22 = vsub.f32 2.0, %v898_v16  ;;  %v943_v42 = vmul.f32 %v6344_v63, %v927_v35 }
 0x404   : > { %v5651_v47 = vpop.eup %5650  ;;  %v933_v50 = vmul.f32 %v5647_v11, %v917_v10 }
 0x405   : > { %v897_v37 = vmul.f32 %v5651_v47, %v856_v55  ;;  %v866_v52 = vpop.xlane.xlu0 %865  ;;  %959 = vst [vmem:[%s6423_s16 + $0x20] sm:$0xff] %v943_v42  ;;  %4490 = vmatprep.mubr.f32.mxu0 %v943_v42  ;;  %v930_v57 = vmul.f32 %v5649_v13, %v914_v22 }
 0x406   : > { %5656 = vrcp.f32 %v866_v52  ;;  %4491 = vmatmul.mubr.f32.gmra.mrb[20].mxu0 %v944_v5  ;;  %v949_v8 = vmul.f32 %v6348_v3, %v933_v50 }
 0x407   : > { %v913_v7 = vsub.f32 2.0, %v897_v37  ;;  %v946_v45 = vmul.f32 %v6350_v4, %v930_v57  ;;  %v5399_v4 = vpop.permute.xlu1 %5398 }
 0x408   : > { %v5653_v40 = vpop.eup %5652  ;;  %965 = vst [vmem:[%s6423_s16 + $0x50] sm:$0xff] %v949_v8  ;;  %v5400_v35 = vunpack.i.l.bf16 %v5399_v4 }
 0x409   : > { %v900_v9 = vmul.f32 %v5653_v40, %v862_v14  ;;  %v870_v63 = vpop.xlane.xlu0 %869  ;;  %v929_v60 = vmul.f32 %v5651_v47, %v913_v7  ;;  %962 = vst [vmem:[%s6423_s16 + $0x38] sm:$0xff] %v946_v45 }
 0x40a   : > { %5658 = vrcp.f32 %v870_v63 }
 0x40b   : > { %v916_v55 = vsub.f32 2.0, %v900_v9  ;;  %v945_v0 = vmul.f32 %v6355_v21, %v929_v60  ;;  %v5401_v21 = vunpack.i.h.bf16 %v5399_v4 }
 0x40c   : > { %v5655_v1 = vpop.eup %5654 }
 0x40d   : > { %v899_v17 = vmul.f32 %v5655_v1, %v860_v25  ;;  %v868_v11 = vpop.xlane.xlu0 %867  ;;  %961 = vst [vmem:[%s6423_s16 + $0x30] sm:$0xff] %v945_v0  ;;  %4493 = vmatprep.mubr.f32.mxu0 %v945_v0  ;;  %v932_v3 = vmul.f32 %v5653_v40, %v916_v55 }
 0x40e   : > { %5660 = vrcp.f32 %v868_v11  ;;  %4494 = vmatmul.mubr.f32.gmra.mrb[22].mxu0 %v946_v45 }
 0x40f   : > { %v915_v6 = vsub.f32 2.0, %v899_v17  ;;  %v948_v14 = vmul.f32 %v6359_v23, %v932_v3  ;;  %v5006_v23 = vpack.c.bf16 %v5401_v21, %v5400_v35 }
 0x410   : > { %v5657_v5 = vpop.eup %5656 }
 0x411   : > { %v902_v13 = vmul.f32 %v5657_v5, %v866_v52  ;;  %v5394_v20 = vpop.permute.xlu0 %5393  ;;  %v931_v16 = vmul.f32 %v5655_v1, %v915_v6  ;;  %964 = vst [vmem:[%s6423_s16 + $0x48] sm:$0xff] %v948_v14 }
 0x412   : > { %v5396_v10 = vunpack.i.h.bf16 %v5394_v20  ;;  %v5395_v25 = vunpack.i.l.bf16 %v5394_v20 }
 0x413   : > { %v918_v22 = vsub.f32 2.0, %v902_v13  ;;  %v947_v42 = vmul.f32 %v6362_v28, %v931_v16 }
 0x414   : > { %v5659_v47 = vpop.eup %5658  ;;  %v5000_v50 = vpack.c.bf16 %v5396_v10, %v5395_v25 }
 0x415   : > { %v904_v37 = vmul.f32 %v5659_v47, %v870_v63  ;;  %963 = vst [vmem:[%s6423_s16 + $0x40] sm:$0xff] %v947_v42  ;;  %4496 = vmatprep.mubr.f32.mxu0 %v947_v42  ;;  %v934_v57 = vmul.f32 %v5657_v5, %v918_v22  ;;  %v1189_v1 = vpop.permute.xlu0 %1188 }
 0x416   : > { %4497 = vmatmul.mubr.f32.gmra.mrb[24].mxu0 %v948_v14  ;;  %5002 = vmatprep.subr.msk.bf16.mxu0 %vm6172_vm2, %v5000_v50 }
 0x417   : > { %v920_v52 = vsub.f32 2.0, %v904_v37  ;;  %4499 = vmatprep.mubr.f32.mxu0 %v949_v8  ;;  %5005 = vmatpush3.bf16.xpose.msk.msra.mxu0 %vm6172_vm2, %v5000_v50  ;;  %v950_v28 = vmul.f32 %v6365_v18, %v934_v57 }
 0x418   : > { %v5661_v7 = vpop.eup %5660  ;;  %5008 = vmatprep.subr.msk.bf16.mxu0 %vm6172_vm2, %v5006_v23 }
 0x419   : > { %v903_v45 = vmul.f32 %v5661_v7, %v868_v11  ;;  %966 = vst [vmem:[%s6423_s16 + $0x58] sm:$0xff] %v950_v28  ;;  %v936_v40 = vmul.f32 %v5659_v47, %v920_v52  ;;  %v1193_v6 = vpop.permute.xlu0 %1192 }
 0x41a   : > { %4500 = vmatmul.mubr.f32.gmra.mrb[26].mxu0 %v950_v28 }
 0x41b   : > { %v919_v9 = vsub.f32 2.0, %v903_v45  ;;  %v952_v63 = vmul.f32 %v6370_v15, %v936_v40 }
 0x41d   : > { %v935_v60 = vmul.f32 %v5661_v7, %v919_v9  ;;  %968 = vst [vmem:[%s6423_s16 + $0x68] sm:$0xff] %v952_v63  ;;  %v1197_v35 = vpop.permute.xlu0 %1196 }
 0x41f   : > { %5011 = vmatpush3.bf16.xpose.msk.msra.mxu0 %vm6172_vm2, %v5006_v23  ;;  %v951_v8 = vmul.f32 %v6373_v33, %v935_v60 }
 0x421   : > { %967 = vst [vmem:[%s6423_s16 + $0x60] sm:$0xff] %v951_v8  ;;  %4502 = vmatprep.mubr.f32.mxu0 %v951_v8  ;;  %v1201_v22 = vpop.permute.xlu0 %1200 }
 0x422   : > { %4503 = vmatmul.mubr.f32.gmra.mrb[28].mxu0 %v952_v63 }
 0x429   : > { %v874_v18 = vpop.xlane.xlu1 %873 }
 0x42a   : > { %5662 = vrcp.f32 %v874_v18 }
 0x42d   : > { %v872_v55 = vpop.xlane.xlu1 %871 }
 0x42e   : > { %5664 = vrcp.f32 %v872_v55 }
 0x431   : > { %v1181_v0 = vpop.permute.xlu1 %1180 }
 0x434   : > { %v5663_v17 = vpop.eup %5662 }
 0x435   : > { %v906_v15 = vmul.f32 %v5663_v17, %v874_v18  ;;  %v1183_v11 = vpop.permute.xlu1 %1182 }
 0x437   : > { %v922_v3 = vsub.f32 2.0, %v906_v15 }
 0x438   : > { %v5665_v4 = vpop.eup %5664 }
 0x439   : > { %v905_v14 = vmul.f32 %v5665_v4, %v872_v55  ;;  %v1185_v5 = vpop.permute.xlu1 %1184  ;;  %v938_v33 = vmul.f32 %v5663_v17, %v922_v3 }
 0x43b   : > { %v921_v13 = vsub.f32 2.0, %v905_v14  ;;  %v954_v20 = vmul.f32 %v6382_v12, %v938_v33  ;;  %v1205_v12 = vpop.permute.xlu0 %1204 }
 0x43d   : > { %v1187_v16 = vpop.permute.xlu1 %1186  ;;  %v937_v21 = vmul.f32 %v5665_v4, %v921_v13  ;;  %970 = vst [vmem:[%s6423_s16 + $0x78] sm:$0xff] %v954_v20 }
 0x43f   : > { %v953_v10 = vmul.f32 %v6387_v19, %v937_v21  ;;  %v1209_v19 = vpop.permute.xlu0 %1208 }
 0x441   : > { %969 = vst [vmem:[%s6423_s16 + $0x70] sm:$0xff] %v953_v10  ;;  %4505 = vmatprep.mubr.f32.mxu0 %v953_v10  ;;  %v1191_v25 = vpop.permute.xlu1 %1190 }
 0x442   : > { %4506 = vmatmul.mubr.f32.gmra.mrb[30].mxu0 %v954_v20 }
 0x443   : > { %4540 = vmatprep.mubr.msk.f32.mxu0 %vm535_vm1, %v1181_v0  ;;  %v5409_v23 = vpop.permute.xlu0 %5408 }
 0x444   : > { %v5411_v28 = vunpack.i.h.bf16 %v5409_v23  ;;  %v5410_v7 = vunpack.i.l.bf16 %v5409_v23 }
 0x445   : > { %v1195_v42 = vpop.permute.xlu1 %1194 }
 0x446   : > { %4541 = vmatmul.mubr.msk.f32.vlgmr.msra.gmra.mrb[32].mxu0 %vm535_vm1, %v1183_v11  ;;  %v5016_v18 = vpack.c.bf16 %v5411_v28, %v5410_v7 }
 0x447   : > { %4543 = vmatprep.mubr.msk.f32.mxu0 %vm535_vm1, %v1185_v5  ;;  %v5419_v55 = vpop.permute.xlu0 %5418 }
 0x448   : > { %v5420_v17 = vunpack.i.l.bf16 %v5419_v55 }
 0x449   : > { %v1199_v47 = vpop.permute.xlu1 %1198 }
 0x44a   : > { %4544 = vmatmul.mubr.msk.f32.gmra.mrb[34].mxu0 %vm535_vm1, %v1187_v16 }
 0x44b   : > { %4546 = vmatprep.mubr.msk.f32.mxu0 %vm535_vm1, %v1189_v1  ;;  %v5421_v1 = vunpack.i.h.bf16 %v5419_v55  ;;  %v5434_v13 = vpop.permute.xlu0 %5433 }
 0x44c   : > { %v5436_v20 = vunpack.i.h.bf16 %v5434_v13  ;;  %v5435_v16 = vunpack.i.l.bf16 %v5434_v13 }
 0x44d   : > { %v1203_v50 = vpop.permute.xlu1 %1202  ;;  %v5024_v4 = vpack.c.bf16 %v5421_v1, %v5420_v17 }
 0x44e   : > { %4547 = vmatmul.mubr.msk.f32.gmra.mrb[36].mxu0 %vm535_vm1, %v1191_v25 }
 0x44f   : > { %4549 = vmatprep.mubr.msk.f32.mxu0 %vm535_vm1, %v1193_v6 }
 0x451   : > { %v1207_v37 = vpop.permute.xlu1 %1206 }
 0x452   : > { %4550 = vmatmul.mubr.msk.f32.gmra.mrb[38].mxu0 %vm535_vm1, %v1195_v42 }
 0x453   : > { %4552 = vmatprep.mubr.msk.f32.mxu0 %vm535_vm1, %v1197_v35 }
 0x455   : > { %v1211_v57 = vpop.permute.xlu1 %1210 }
 0x456   : > { %4553 = vmatmul.mubr.msk.f32.gmra.mrb[40].mxu0 %vm535_vm1, %v1199_v47 }
 0x457   : > { %4555 = vmatprep.mubr.msk.f32.mxu0 %vm535_vm1, %v1201_v22  ;;  %v5036_v22 = vpack.c.bf16 %v5436_v20, %v5435_v16 }
 0x459   : > { %v5404_v52 = vpop.permute.xlu1 %5403 }
 0x45a   : > { %v5406_v45 = vunpack.i.h.bf16 %v5404_v52  ;;  %v5405_v40 = vunpack.i.l.bf16 %v5404_v52  ;;  %4556 = vmatmul.mubr.msk.f32.gmra.mrb[42].mxu0 %vm535_vm1, %v1203_v50 }
 0x45b   : > { %4558 = vmatprep.mubr.msk.f32.mxu0 %vm535_vm1, %v1205_v12 }
 0x45c   : > { %v5012_v9 = vpack.c.bf16 %v5406_v45, %v5405_v40 }
 0x45d   : > { %v5414_v63 = vpop.permute.xlu1 %5413 }
 0x45e   : > { %v5416_v60 = vunpack.i.h.bf16 %v5414_v63  ;;  %v5415_v8 = vunpack.i.l.bf16 %v5414_v63  ;;  %4559 = vmatmul.mubr.msk.f32.gmra.mrb[44].mxu0 %vm535_vm1, %v1207_v37  ;;  %5013 = vmatprep.subr.bf16.mxu1 %v5012_v9 }
 0x45f   : > { %4561 = vmatprep.mubr.msk.f32.mxu0 %vm535_vm1, %v1209_v19  ;;  %5015 = vmatpush3.bf16.msra.mxu1 %v5012_v9 }
 0x460   : > { %5017 = vmatprep.subr.bf16.mxu1 %v5016_v18  ;;  %v5020_v15 = vpack.c.bf16 %v5416_v60, %v5415_v8 }
 0x461   : > { %v5424_v0 = vpop.permute.xlu1 %5423 }
 0x462   : > { %4562 = vmatmul.mubr.msk.f32.gmra.mrb[46].mxu0 %vm535_vm1, %v1211_v57  ;;  %v5426_v11 = vunpack.i.h.bf16 %v5424_v0  ;;  %v5425_v3 = vunpack.i.l.bf16 %v5424_v0 }
 0x463   : > { %5019 = vmatpush3.bf16.msra.mxu1 %v5016_v18 }
 0x464   : > { %5021 = vmatprep.subr.bf16.mxu1 %v5020_v15  ;;  %v5028_v33 = vpack.c.bf16 %v5426_v11, %v5425_v3 }
 0x465   : > { %v5429_v6 = vpop.permute.xlu1 %5428 }
 0x466   : > { %v5431_v14 = vunpack.i.h.bf16 %v5429_v6  ;;  %v5430_v5 = vunpack.i.l.bf16 %v5429_v6 }
 0x467   : > { %5023 = vmatpush3.bf16.msra.mxu1 %v5020_v15 }
 0x468   : > { %5025 = vmatprep.subr.bf16.mxu1 %v5024_v4  ;;  %v5032_v21 = vpack.c.bf16 %v5431_v14, %v5430_v5 }
 0x469   : > { %v5439_v35 = vpop.permute.xlu1 %5438 }
 0x46a   : > { %v5441_v10 = vunpack.i.h.bf16 %v5439_v35  ;;  %v5440_v25 = vunpack.i.l.bf16 %v5439_v35 }
 0x46b   : > { %5027 = vmatpush3.bf16.msra.mxu1 %v5024_v4 }
 0x46c   : > { %5029 = vmatprep.subr.bf16.mxu1 %v5028_v33  ;;  %v5040_v42 = vpack.c.bf16 %v5441_v10, %v5440_v25 }
 0x46f   : > { %5031 = vmatpush3.bf16.msra.mxu1 %v5028_v33 }
 0x470   : > { %5033 = vmatprep.subr.bf16.mxu1 %v5032_v21 }
 0x473   : > { %5035 = vmatpush3.bf16.msra.mxu1 %v5032_v21 }
 0x474   : > { %5037 = vmatprep.subr.bf16.mxu1 %v5036_v22 }
 0x477   : > { %5039 = vmatpush3.bf16.msra.mxu1 %v5036_v22 }
 0x478   : > { %5041 = vmatprep.subr.bf16.mxu1 %v5040_v42 }
 0x47b   : > { %5043 = vmatpush3.bf16.msra.mxu1 %v5040_v42 }
 0x498   : > { %v4486_v47 = vpop.f32.mrb[16].mxu0 }
 0x499   : > { %1165 = vst.msk [vmem:[#allocation2 + $0x8] sm:$0xff] %vm535_vm1, %v4486_v47  ;;  %v1085_v12 = vpop.f32.mrb[17].mxu0 }
 0x49a   : > { %1164 = vst.msk [vmem:[#allocation2] sm:$0xff] %vm535_vm1, %v1085_v12 }
 0x4d1   : > { %v4489_v50 = vpop.f32.mrb[18].mxu0 }
 0x4d2   : > { %1167 = vst.msk [vmem:[#allocation2 + $0x18] sm:$0xff] %vm535_vm1, %v4489_v50  ;;  %v1095_v19 = vpop.f32.mrb[19].mxu0 }
 0x4d3   : > { %1166 = vst.msk [vmem:[#allocation2 + $0x10] sm:$0xff] %vm535_vm1, %v1095_v19 }
 0x4d9   : > { %v4492_v37 = vpop.f32.mrb[20].mxu0 }
 0x4da   : > { %1169 = vst.msk [vmem:[#allocation2 + $0x28] sm:$0xff] %vm535_vm1, %v4492_v37  ;;  %v1105_v57 = vpop.f32.mrb[21].mxu0 }
 0x4db   : > { %1168 = vst.msk [vmem:[#allocation2 + $0x20] sm:$0xff] %vm535_vm1, %v1105_v57 }
 0x4e1   : > { %v4495_v23 = vpop.f32.mrb[22].mxu0 }
 0x4e2   : > { %1171 = vst.msk [vmem:[#allocation2 + $0x38] sm:$0xff] %vm535_vm1, %v4495_v23  ;;  %v1115_v52 = vpop.f32.mrb[23].mxu0 }
 0x4e3   : > { %1170 = vst.msk [vmem:[#allocation2 + $0x30] sm:$0xff] %vm535_vm1, %v1115_v52 }
 0x4e9   : > { %v4498_v28 = vpop.f32.mrb[24].mxu0 }
 0x4ea   : > { %1173 = vst.msk [vmem:[#allocation2 + $0x48] sm:$0xff] %vm535_vm1, %v4498_v28  ;;  %v1125_v7 = vpop.f32.mrb[25].mxu0 }
 0x4eb   : > { %1172 = vst.msk [vmem:[#allocation2 + $0x40] sm:$0xff] %vm535_vm1, %v1125_v7 }
 0x4ed   : > { %v4501_v45 = vpop.f32.mrb[26].mxu0 }
 0x4ee   : > { %1175 = vst.msk [vmem:[#allocation2 + $0x58] sm:$0xff] %vm535_vm1, %v4501_v45  ;;  %v1135_v40 = vpop.f32.mrb[27].mxu0 }
 0x4ef   : > { %1174 = vst.msk [vmem:[#allocation2 + $0x50] sm:$0xff] %vm535_vm1, %v1135_v40 }
 0x4f5   : > { %v4504_v9 = vpop.f32.mrb[28].mxu0 }
 0x4f6   : > { %1177 = vst.msk [vmem:[#allocation2 + $0x68] sm:$0xff] %vm535_vm1, %v4504_v9  ;;  %v1145_v63 = vpop.f32.mrb[29].mxu0 }
 0x4f7   : > { %1176 = vst.msk [vmem:[#allocation2 + $0x60] sm:$0xff] %vm535_vm1, %v1145_v63 }
 0x515   : > { %v4507_v60 = vpop.f32.mrb[30].mxu0 }
 0x516   : > { %1179 = vst.msk [vmem:[#allocation2 + $0x78] sm:$0xff] %vm535_vm1, %v4507_v60  ;;  %v1155_v8 = vpop.f32.mrb[31].mxu0 }
 0x517   : > { %1178 = vst.msk [vmem:[#allocation2 + $0x70] sm:$0xff] %vm535_vm1, %v1155_v8 }
 0x519   : > { %v4542_v18 = vpop.f32.mrb[32].mxu0 }
 0x51a   : > { %v1374_v55 = vpop.f32.mrb[33].mxu0  ;;  %v1454_v0 = vsel %vm486_vm3, %v4542_v18, -1e+30 }
 0x51b   : > { %1471 = vmax.xlane.f32.xlu1 %v1454_v0  ;;  %v1453_v1 = vsel %vm486_vm3, %v1374_v55, -1e+30 }
 0x51c   : > { %1469 = vmax.xlane.f32.xlu0 %v1453_v1 }
 0x51d   : > { %v4545_v17 = vpop.f32.mrb[34].mxu0 }
 0x51e   : > { %v1384_v15 = vpop.f32.mrb[35].mxu0  ;;  %v1456_v10 = vsel %vm486_vm3, %v4545_v17, -1e+30 }
 0x51f   : > { %v1455_v22 = vsel %vm486_vm3, %v1384_v15, -1e+30 }
 0x521   : > { %v4548_v11 = vpop.f32.mrb[36].mxu0 }
 0x522   : > { %v1394_v3 = vpop.f32.mrb[37].mxu0  ;;  %v1458_v47 = vsel %vm486_vm3, %v4548_v11, -1e+30 }
 0x523   : > { %v6556_v25 = vsel %vm486_vm3, %v1394_v3, -1e+30 }
 0x525   : > { %v4551_v4 = vpop.f32.mrb[38].mxu0 }
 0x526   : > { %v1404_v6 = vpop.f32.mrb[39].mxu0  ;;  %v6575_v50 = vsel %vm486_vm3, %v4551_v4, -1e+30 }
 0x527   : > { %v6563_v42 = vsel %vm486_vm3, %v1404_v6, -1e+30 }
 0x529   : > { %v4554_v14 = vpop.f32.mrb[40].mxu0 }
 0x52a   : > { %v1414_v5 = vpop.f32.mrb[41].mxu0  ;;  %v6582_v37 = vsel %vm486_vm3, %v4554_v14, -1e+30 }
 0x52b   : > { %v6570_v12 = vsel %vm486_vm3, %v1414_v5, -1e+30 }
 0x52c   : > { %5448 = vrot.lane.b32.xlu1 %v6098_v32, %s5927_s19 }
 0x52d   : > { %v4557_v33 = vpop.f32.mrb[42].mxu0 }
 0x52e   : > { %v1424_v13 = vpop.f32.mrb[43].mxu0  ;;  %v6592_v23 = vsel %vm486_vm3, %v4557_v33, -1e+30 }
 0x52f   : > { %v1463_v19 = vsel %vm486_vm3, %v1424_v13, -1e+30 }
 0x530   : > { %5453 = vrot.lane.b32.xlu1 %v6108_v38, %s5927_s19 }
 0x531   : > { %v4560_v20 = vpop.f32.mrb[44].mxu0 }
 0x532   : > { %5443 = vrot.lane.b32.xlu0 %v6088_v27, %s5927_s19  ;;  %v1434_v16 = vpop.f32.mrb[45].mxu0  ;;  %v6602_v28 = vsel %vm486_vm3, %v4560_v20, -1e+30 }
 0x533   : > { %v6587_v57 = vsel %vm486_vm3, %v1434_v16, -1e+30 }
 0x535   : > { %v4563_v21 = vpop.f32.mrb[46].mxu0 }
 0x536   : > { %v1444_v35 = vpop.f32.mrb[47].mxu0  ;;  %v6607_v7 = vsel %vm486_vm3, %v4563_v21, -1e+30 }
 0x537   : > { %v6597_v52 = vsel %vm486_vm3, %v1444_v35, -1e+30 }
 0x551   : > { %1475 = vmax.xlane.f32.xlu0 %v1456_v10 }
 0x554   : > { %1477 = vmax.xlane.f32.xlu1 %v6556_v25 }
 0x555   : > { %1473 = vmax.xlane.f32.xlu0 %v1455_v22 }
 0x558   : > { %1481 = vmax.xlane.f32.xlu1 %v6563_v42 }
 0x559   : > { %1479 = vmax.xlane.f32.xlu0 %v1458_v47 }
 0x55c   : > { %1485 = vmax.xlane.f32.xlu1 %v6570_v12 }
 0x55d   : > { %1483 = vmax.xlane.f32.xlu0 %v6575_v50 }
 0x560   : > { %1489 = vmax.xlane.f32.xlu1 %v1463_v19 }
 0x561   : > { %1487 = vmax.xlane.f32.xlu0 %v6582_v37 }
 0x564   : > { %1493 = vmax.xlane.f32.xlu1 %v6587_v57 }
 0x565   : > { %1491 = vmax.xlane.f32.xlu0 %v6592_v23 }
 0x568   : > { %1497 = vmax.xlane.f32.xlu1 %v6597_v52 }
 0x569   : > { %1495 = vmax.xlane.f32.xlu0 %v6602_v28 }
 0x56d   : > { %1499 = vmax.xlane.f32.xlu0 %v6607_v7 }
 0x579   : > { %5463 = vrot.lane.b32.xlu1 %v6128_v48, %s5927_s19 }
 0x57d   : > { %5468 = vrot.lane.b32.xlu1 %v6138_v53, %s5927_s19 }
 0x5a8   : > { %v1472_v45 = vpop.xlane.xlu1 %1471 }
 0x5a9   : > { %v1502_v40 = vsub.f32 %v1454_v0, %v1472_v45  ;;  %v1470_v9 = vpop.xlane.xlu0 %1469 }
 0x5aa   : > { %v1501_v63 = vsub.f32 %v1453_v1, %v1470_v9 }
 0x5ab   : > { %v1519_v60 = vmul.f32 1.442695, %v1502_v40 }
 0x5ac   : > { %v1517_v8 = vmul.f32 1.442695, %v1501_v63  ;;  %v6627_v0 = vpop.permute.xlu1 %5448 }
 0x5ad   : > { %5666 = vpow2.f32 %v1519_v60  ;;  %v5444_v18 = vpop.permute.xlu0 %5443 }
 0x5ae   : > { %5668 = vpow2.f32 %v1517_v8  ;;  %v5446_v55 = vunpack.i.h.bf16 %v5444_v18  ;;  %v5445_v17 = vunpack.i.l.bf16 %v5444_v18 }
 0x5b0   : > { %v6614_v15 = vpack.c.bf16 %v5446_v55, %v5445_v17  ;;  %v6629_v1 = vpop.permute.xlu1 %5453 }
 0x5b2   : > { %5046 = vmatprep.subr.msk.bf16.mxu1 %vm6172_vm2, %v6614_v15 }
 0x5b7   : > { %v6619_v11 = vpop.eup %5666 }
 0x5b8   : > { %v6621_v3 = vpop.eup %5668  ;;  %1551 = vadd.xlane.f32.xlu0 %v6619_v11 }
 0x5b9   : > { %1549 = vadd.xlane.f32.xlu1 %v6621_v3 }
 0x5ce   : > { %5458 = vrot.lane.b32.xlu0 %v6118_v43, %s5927_s19 }
 0x5de   : > { %v1476_v4 = vpop.xlane.xlu0 %1475 }
 0x5df   : > { %v1504_v6 = vsub.f32 %v1456_v10, %v1476_v4 }
 0x5e1   : > { %v1523_v14 = vmul.f32 1.442695, %v1504_v6  ;;  %v1478_v5 = vpop.xlane.xlu1 %1477 }
 0x5e2   : > { %v1474_v33 = vpop.xlane.xlu0 %1473  ;;  %v1505_v35 = vsub.f32 %v6556_v25, %v1478_v5 }
 0x5e3   : > { %5670 = vpow2.f32 %v1523_v14  ;;  %v1503_v13 = vsub.f32 %v1455_v22, %v1474_v33 }
 0x5e4   : > { %v1525_v60 = vmul.f32 1.442695, %v1505_v35 }
 0x5e5   : > { %v1521_v20 = vmul.f32 1.442695, %v1503_v13  ;;  %v1482_v16 = vpop.xlane.xlu1 %1481 }
 0x5e6   : > { %v1480_v21 = vpop.xlane.xlu0 %1479  ;;  %v1507_v22 = vsub.f32 %v6563_v42, %v1482_v16 }
 0x5e7   : > { %5672 = vpow2.f32 %v1521_v20  ;;  %v1506_v45 = vsub.f32 %v1458_v47, %v1480_v21 }
 0x5e8   : > { %v1529_v6 = vmul.f32 1.442695, %v1507_v22 }
 0x5e9   : > { %v1527_v40 = vmul.f32 1.442695, %v1506_v45  ;;  %v1486_v9 = vpop.xlane.xlu1 %1485 }
 0x5ea   : > { %v1484_v63 = vpop.xlane.xlu0 %1483  ;;  %v1509_v42 = vsub.f32 %v6570_v12, %v1486_v9 }
 0x5eb   : > { %5674 = vpow2.f32 %v1527_v40  ;;  %v1508_v8 = vsub.f32 %v6575_v50, %v1484_v63 }
 0x5ec   : > { %5676 = vpow2.f32 %v1525_v60  ;;  %v1533_v13 = vmul.f32 1.442695, %v1509_v42 }
 0x5ed   : > { %v6633_v10 = vpop.eup %5670  ;;  %v1490_v18 = vpop.xlane.xlu1 %1489  ;;  %v1531_v17 = vmul.f32 1.442695, %v1508_v8 }
 0x5ee   : > { %v1511_v55 = vsub.f32 %v1463_v19, %v1490_v18  ;;  %1555 = vadd.xlane.f32.xlu0 %v6633_v10  ;;  %v1488_v4 = vpop.xlane.xlu0 %1487 }
 0x5ef   : > { %v1510_v50 = vsub.f32 %v6582_v37, %v1488_v4 }
 0x5f0   : > { %v1537_v25 = vmul.f32 1.442695, %v1511_v55 }
 0x5f1   : > { %v6637_v47 = vpop.eup %5672  ;;  %v1535_v5 = vmul.f32 1.442695, %v1510_v50  ;;  %v1494_v45 = vpop.xlane.xlu1 %1493 }
 0x5f2   : > { %5678 = vpow2.f32 %v1537_v25  ;;  %1553 = vadd.xlane.f32.xlu1 %v6637_v47  ;;  %v1492_v19 = vpop.xlane.xlu0 %1491 }
 0x5f3   : > { %5680 = vpow2.f32 %v1531_v17  ;;  %v1512_v20 = vsub.f32 %v6592_v23, %v1492_v19  ;;  %v1513_v23 = vsub.f32 %v6587_v57, %v1494_v45 }
 0x5f4   : > { %5682 = vpow2.f32 %v1529_v6 }
 0x5f5   : > { %v6641_v14 = vpop.eup %5674  ;;  %5684 = vpow2.f32 %v1535_v5  ;;  %v1539_v12 = vmul.f32 1.442695, %v1512_v20  ;;  %v1541_v60 = vmul.f32 1.442695, %v1513_v23  ;;  %v1498_v17 = vpop.xlane.xlu1 %1497 }
 0x5f6   : > { %1559 = vadd.xlane.f32.xlu0 %v6641_v14  ;;  %v6645_v33 = vpop.eup %5676  ;;  %v1496_v37 = vpop.xlane.xlu0 %1495  ;;  %5686 = vpow2.f32 %v1533_v13  ;;  %v1515_v25 = vsub.f32 %v6597_v52, %v1498_v17 }
 0x5f7   : > { %v1514_v35 = vsub.f32 %v6602_v28, %v1496_v37  ;;  %5688 = vpow2.f32 %v1539_v12 }
 0x5f8   : > { %v1545_v6 = vmul.f32 1.442695, %v1515_v25 }
 0x5f9   : > { %v1543_v9 = vmul.f32 1.442695, %v1514_v35  ;;  %v5464_v52 = vpop.permute.xlu1 %5463 }
 0x5fa   : > { %1557 = vadd.xlane.f32.xlu0 %v6645_v33  ;;  %v1500_v55 = vpop.xlane.xlu0 %1499 }
 0x5fb   : > { %5690 = vpow2.f32 %v1543_v9  ;;  %v1516_v22 = vsub.f32 %v6607_v7, %v1500_v55  ;;  %v5450_v55 = vunpack.i.l.bf16 %v6627_v0 }
 0x5fc   : > { %v6649_v16 = vpop.eup %5678  ;;  %5692 = vpow2.f32 %v1541_v60  ;;  %v5451_v60 = vunpack.i.h.bf16 %v6627_v0  ;;  %v5455_v0 = vunpack.i.l.bf16 %v6629_v1 }
 0x5fd   : > { %v6651_v21 = vpop.eup %5680  ;;  %1569 = vadd.xlane.f32.xlu1 %v6649_v16  ;;  %v1547_v4 = vmul.f32 1.442695, %v1516_v22  ;;  %v5469_v19 = vpop.permute.xlu1 %5468 }
 0x5fe   : > { %1563 = vadd.xlane.f32.xlu0 %v6651_v21  ;;  %v6656_v40 = vpop.eup %5682  ;;  %v5050_v25 = vpack.c.bf16 %v5451_v60, %v5450_v55 }
 0x5ff   : > { %v6660_v63 = vpop.eup %5684  ;;  %5694 = vpow2.f32 %v1547_v4 }
 0x600   : > { %v6663_v8 = vpop.eup %5686  ;;  %5696 = vpow2.f32 %v1545_v6 }
 0x601   : > { %v6666_v28 = vpop.eup %5688 }
 0x602   : > { %1561 = vadd.xlane.f32.xlu0 %v6656_v40 }
 0x605   : > { %v6671_v57 = vpop.eup %5690 }
 0x606   : > { %1567 = vadd.xlane.f32.xlu0 %v6660_v63  ;;  %v6674_v18 = vpop.eup %5692 }
 0x609   : > { %v6683_v50 = vpop.eup %5694 }
 0x60a   : > { %1565 = vadd.xlane.f32.xlu0 %v6663_v8  ;;  %v6688_v7 = vpop.eup %5696 }
 0x60e   : > { %1571 = vadd.xlane.f32.xlu0 %v6666_v28  ;;  %5478 = vrot.lane.b32.xlu1 %v6158_v62, %s5927_s19 }
 0x612   : > { %1575 = vadd.xlane.f32.xlu0 %v6671_v57 }
 0x616   : > { %1573 = vadd.xlane.f32.xlu0 %v6674_v18 }
 0x62c   : > { %5473 = vrot.lane.b32.xlu0 %v6148_v58, %s5927_s19  ;;  %s3754_s19 = sshll.u32 %s6423_s16, 4  ;;  %s7489_s19 = int_to_ptr.vmem [resolvable:$true] %s3754_s19 }
 0x630   : > { %1960 = vrot.lane.b32.xlu0 %v6104_v36, %s5928_s20 }
 0x632   : > { %1579 = vadd.xlane.f32.xlu1 %v6683_v50 }
 0x634   : > { %1964 = vrot.lane.b32.xlu0 %v6112_v41, %s5928_s20 }
 0x636   : > { %1577 = vadd.xlane.f32.xlu1 %v6688_v7 }
 0x638   : > { %1968 = vrot.lane.b32.xlu0 %v6122_v46, %s5928_s20 }
 0x63c   : > { %1972 = vrot.lane.b32.xlu0 %v6132_v51, %s5928_s20 }
 0x640   : > { %1976 = vrot.lane.b32.xlu0 %v6142_v56, %s5928_s20 }
 0x644   : > { %1980 = vrot.lane.b32.xlu0 %v6152_v61, %s5928_s20 }
 0x645   : > { %v1552_v42 = vpop.xlane.xlu0 %1551 }
 0x646   : > { %5698 = vrcp.f32 %v1552_v42  ;;  %v1550_v5 = vpop.xlane.xlu1 %1549 }
 0x647   : > { %5700 = vrcp.f32 %v1550_v5  ;;  %1952 = vrot.lane.b32.xlu1 %v6082_v26, %s5928_s20 }
 0x648   : > { %5488 = vrot.lane.b32.xlu0 %v6098_v32, %s5929_s26 }
 0x649   : > { %v5459_v4 = vpop.permute.xlu0 %5458 }
 0x64a   : > { %v5460_v6 = vunpack.i.l.bf16 %v5459_v4 }
 0x64b   : > { %1954 = vrot.lane.b32.xlu1 %v6080_v24, %s5928_s20 }
 0x64c   : > { %5498 = vrot.lane.b32.xlu0 %v6118_v43, %s5929_s26 }
 0x64f   : > { %1956 = vrot.lane.b32.xlu1 %v6094_v31, %s5928_s20 }
 0x650   : > { %v5699_v13 = vpop.eup %5698  ;;  %5513 = vrot.lane.b32.xlu0 %v6148_v58, %s5929_s26 }
 0x651   : > { %v5701_v20 = vpop.eup %5700  ;;  %v1598_v37 = vmul.f32 %v5699_v13, %v1552_v42  ;;  %v5466_v42 = vunpack.i.h.bf16 %v5464_v52 }
 0x652   : > { %v1597_v12 = vmul.f32 %v5701_v20, %v1550_v5  ;;  %v5465_v5 = vunpack.i.l.bf16 %v5464_v52 }
 0x653   : > { %v1614_v35 = vsub.f32 2.0, %v1598_v37  ;;  %1958 = vrot.lane.b32.xlu1 %v6090_v29, %s5928_s20  ;;  %v5470_v37 = vunpack.i.l.bf16 %v5469_v19 }
 0x654   : > { %v1613_v45 = vsub.f32 2.0, %v1597_v12 }
 0x655   : > { %v1630_v23 = vmul.f32 %v5699_v13, %v1614_v35  ;;  %v5068_v13 = vpack.c.bf16 %v5466_v42, %v5465_v5 }
 0x656   : > { %v1629_v9 = vmul.f32 %v5701_v20, %v1613_v45  ;;  %v5471_v20 = vunpack.i.h.bf16 %v5469_v19 }
 0x657   : > { %v1646_v22 = vmul.f32 %v6619_v11, %v1630_v23  ;;  %1962 = vrot.lane.b32.xlu1 %v6100_v34, %s5928_s20  ;;  %v5456_v11 = vunpack.i.h.bf16 %v6629_v1 }
 0x658   : > { %v1645_v17 = vmul.f32 %v6621_v3, %v1629_v9  ;;  %v5074_v12 = vpack.c.bf16 %v5471_v20, %v5470_v37 }
 0x659   : > { %3932 = vst [vmem:[%s6423_s16 + $0x88] sm:$0xff] %v1646_v22  ;;  %v5056_v3 = vpack.c.bf16 %v5456_v11, %v5455_v0 }
 0x65a   : > { %3931 = vst [vmem:[%s6423_s16 + $0x80] sm:$0xff] %v1645_v17  ;;  %4596 = vmatprep.mubr.f32.mxu1 %v1645_v17 }
 0x65b   : > { %1966 = vrot.lane.b32.xlu1 %v6110_v39, %s5928_s20  ;;  %4597 = vmatmul.mubr.f32.vlgmr.msra.gmra.mrb[16].mxu1 %v1646_v22 }
 0x65c   : > { %5049 = vmatpush3.bf16.xpose.msk.msra.mxu1 %vm6172_vm2, %v6614_v15  ;;  %v5461_v15 = vunpack.i.h.bf16 %v5459_v4 }
 0x65d   : > { %5052 = vmatprep.subr.msk.bf16.mxu1 %vm6172_vm2, %v5050_v25 }
 0x65e   : > { %v5062_v1 = vpack.c.bf16 %v5461_v15, %v5460_v6 }
 0x65f   : > { %1970 = vrot.lane.b32.xlu1 %v6120_v44, %s5928_s20 }
 0x663   : > { %1974 = vrot.lane.b32.xlu1 %v6130_v49, %s5928_s20 }
 0x664   : > { %5055 = vmatpush3.bf16.xpose.msk.msra.mxu1 %vm6172_vm2, %v5050_v25 }
 0x665   : > { %5058 = vmatprep.subr.msk.bf16.mxu1 %vm6172_vm2, %v5056_v3 }
 0x667   : > { %1978 = vrot.lane.b32.xlu1 %v6140_v54, %s5928_s20 }
 0x66b   : > { %1982 = vrot.lane.b32.xlu1 %v6150_v59, %s5928_s20  ;;  %s7493_s20 = scalar_lea.sflag [#allocation4], %s250_s14 }
 0x66c   : > { %5061 = vmatpush3.bf16.xpose.msk.msra.mxu1 %vm6172_vm2, %v5056_v3 }
 0x66d   : > { %5064 = vmatprep.subr.msk.bf16.mxu1 %vm6172_vm2, %v5062_v1 }
 0x66f   : > { %5483 = vrot.lane.b32.xlu1 %v6088_v27, %s5929_s26 }
 0x673   : > { %5493 = vrot.lane.b32.xlu1 %v6108_v38, %s5929_s26 }
 0x674   : > { %5067 = vmatpush3.bf16.xpose.msk.msra.mxu1 %vm6172_vm2, %v5062_v1 }
 0x675   : > { %5070 = vmatprep.subr.msk.bf16.mxu1 %vm6172_vm2, %v5068_v13 }
 0x677   : > { %5503 = vrot.lane.b32.xlu1 %v6128_v48, %s5929_s26 }
 0x67b   : > { %v1556_v52 = vpop.xlane.xlu0 %1555  ;;  %5508 = vrot.lane.b32.xlu1 %v6138_v53, %s5929_s26 }
 0x67c   : > { %5702 = vrcp.f32 %v1556_v52  ;;  %5073 = vmatpush3.bf16.xpose.msk.msra.mxu1 %vm6172_vm2, %v5068_v13 }
 0x67d   : > { %5076 = vmatprep.subr.msk.bf16.mxu1 %vm6172_vm2, %v5074_v12 }
 0x67f   : > { %5518 = vrot.lane.b32.xlu1 %v6158_v62, %s5929_s26  ;;  %v1554_v35 = vpop.xlane.xlu1 %1553  ;;  %s5858_s26 = scalar_lea.vmem %s7489_s19, 8192 }
 0x680   : > { %5704 = vrcp.f32 %v1554_v35  ;;  %p5859_p11 = scmp.ne.s32.totalorder %s7489_s19, %s5858_s26 }
 0x682   : > { %p5860_p12 = pnand %p5859_p11, %p6011_p5 }
 0x683   : > { %v1560_v19 = vpop.xlane.xlu0 %1559 }
 0x684   : > { %5706 = vrcp.f32 %v1560_v19  ;;  %5079 = vmatpush3.bf16.xpose.msk.msra.mxu1 %vm6172_vm2, %v5074_v12  ;;  %p5861_p13 = pneg %p5860_p12 }
 0x686   : > { %v5703_v45 = vpop.eup %5702 }
 0x687   : > { %v1600_v23 = vmul.f32 %v5703_v45, %v1556_v52  ;;  %v1558_v9 = vpop.xlane.xlu0 %1557 }
 0x688   : > { %5708 = vrcp.f32 %v1558_v9 }
 0x689   : > { %v1616_v60 = vsub.f32 2.0, %v1600_v23 }
 0x68a   : > { %v5705_v55 = vpop.eup %5704  ;;  %v1570_v22 = vpop.xlane.xlu1 %1569 }
 0x68b   : > { %v1599_v17 = vmul.f32 %v5705_v55, %v1554_v35  ;;  %5710 = vrcp.f32 %v1570_v22  ;;  %v1564_v25 = vpop.xlane.xlu0 %1563  ;;  %v1632_v11 = vmul.f32 %v5703_v45, %v1616_v60 }
 0x68c   : > { %5712 = vrcp.f32 %v1564_v25 }
 0x68d   : > { %v1615_v0 = vsub.f32 2.0, %v1599_v17  ;;  %v1648_v3 = vmul.f32 %v6633_v10, %v1632_v11 }
 0x68e   : > { %v5707_v4 = vpop.eup %5706 }
 0x68f   : > { %v1602_v15 = vmul.f32 %v5707_v4, %v1560_v19  ;;  %v1562_v6 = vpop.xlane.xlu0 %1561  ;;  %v1631_v1 = vmul.f32 %v5705_v55, %v1615_v0  ;;  %3934 = vst [vmem:[%s6423_s16 + $0x98] sm:$0xff] %v1648_v3 }
 0x690   : > { %5714 = vrcp.f32 %v1562_v6 }
 0x691   : > { %v1618_v42 = vsub.f32 2.0, %v1602_v15  ;;  %v1647_v5 = vmul.f32 %v6637_v47, %v1631_v1 }
 0x692   : > { %v5709_v13 = vpop.eup %5708 }
 0x693   : > { %v1601_v20 = vmul.f32 %v5709_v13, %v1558_v9  ;;  %v1568_v37 = vpop.xlane.xlu0 %1567  ;;  %3933 = vst [vmem:[%s6423_s16 + $0x90] sm:$0xff] %v1647_v5  ;;  %4599 = vmatprep.mubr.f32.mxu1 %v1647_v5  ;;  %v1634_v12 = vmul.f32 %v5707_v4, %v1618_v42 }
 0x694   : > { %5716 = vrcp.f32 %v1568_v37  ;;  %4600 = vmatmul.mubr.f32.gmra.mrb[18].mxu1 %v1648_v3 }
 0x695   : > { %v5711_v52 = vpop.eup %5710  ;;  %v1617_v10 = vsub.f32 2.0, %v1601_v20  ;;  %v1650_v35 = vmul.f32 %v6641_v14, %v1634_v12 }
 0x696   : > { %v5713_v19 = vpop.eup %5712  ;;  %v1607_v45 = vmul.f32 %v5711_v52, %v1570_v22 }
 0x697   : > { %v1604_v23 = vmul.f32 %v5713_v19, %v1564_v25  ;;  %v1566_v60 = vpop.xlane.xlu0 %1565  ;;  %v1633_v55 = vmul.f32 %v5709_v13, %v1617_v10  ;;  %3936 = vst [vmem:[%s6423_s16 + $0xa8] sm:$0xff] %v1650_v35 }
 0x698   : > { %v1623_v47 = vsub.f32 2.0, %v1607_v45  ;;  %5718 = vrcp.f32 %v1566_v60 }
 0x699   : > { %v1620_v9 = vsub.f32 2.0, %v1604_v23  ;;  %v1649_v17 = vmul.f32 %v6645_v33, %v1633_v55 }
 0x69a   : > { %v5715_v11 = vpop.eup %5714  ;;  %v1639_v0 = vmul.f32 %v5711_v52, %v1623_v47 }
 0x69b   : > { %v1603_v3 = vmul.f32 %v5715_v11, %v1562_v6  ;;  %v1572_v4 = vpop.xlane.xlu0 %1571  ;;  %3935 = vst [vmem:[%s6423_s16 + $0xa0] sm:$0xff] %v1649_v17  ;;  %4602 = vmatprep.mubr.f32.mxu1 %v1649_v17  ;;  %v1636_v14 = vmul.f32 %v5713_v19, %v1620_v9 }
 0x69c   : > { %5720 = vrcp.f32 %v1572_v4  ;;  %4603 = vmatmul.mubr.f32.gmra.mrb[20].mxu1 %v1650_v35  ;;  %v1655_v22 = vmul.f32 %v6649_v16, %v1639_v0 }
 0x69d   : > { %v1619_v25 = vsub.f32 2.0, %v1603_v3  ;;  %v1652_v15 = vmul.f32 %v6651_v21, %v1636_v14  ;;  %v5479_v21 = vpop.permute.xlu1 %5478 }
 0x69e   : > { %v5717_v1 = vpop.eup %5716  ;;  %3941 = vst [vmem:[%s6423_s16 + $0xd0] sm:$0xff] %v1655_v22  ;;  %v5480_v55 = vunpack.i.l.bf16 %v5479_v21 }
 0x69f   : > { %v1606_v42 = vmul.f32 %v5717_v1, %v1568_v37  ;;  %v1576_v33 = vpop.xlane.xlu0 %1575  ;;  %v1635_v5 = vmul.f32 %v5715_v11, %v1619_v25  ;;  %3938 = vst [vmem:[%s6423_s16 + $0xb8] sm:$0xff] %v1652_v15 }
 0x6a0   : > { %5722 = vrcp.f32 %v1576_v33 }
 0x6a1   : > { %v1622_v6 = vsub.f32 2.0, %v1606_v42  ;;  %v1651_v13 = vmul.f32 %v6656_v40, %v1635_v5  ;;  %v5481_v40 = vunpack.i.h.bf16 %v5479_v21 }
 0x6a2   : > { %v5719_v20 = vpop.eup %5718 }
 0x6a3   : > { %v1605_v12 = vmul.f32 %v5719_v20, %v1566_v60  ;;  %v1574_v52 = vpop.xlane.xlu0 %1573  ;;  %3937 = vst [vmem:[%s6423_s16 + $0xb0] sm:$0xff] %v1651_v13  ;;  %4605 = vmatprep.mubr.f32.mxu1 %v1651_v13  ;;  %v1638_v16 = vmul.f32 %v5717_v1, %v1622_v6 }
 0x6a4   : > { %5724 = vrcp.f32 %v1574_v52  ;;  %4606 = vmatmul.mubr.f32.gmra.mrb[22].mxu1 %v1652_v15 }
 0x6a5   : > { %v1621_v10 = vsub.f32 2.0, %v1605_v12  ;;  %v1654_v37 = vmul.f32 %v6660_v63, %v1638_v16  ;;  %v5086_v63 = vpack.c.bf16 %v5481_v40, %v5480_v55 }
 0x6a6   : > { %v5721_v35 = vpop.eup %5720 }
 0x6a7   : > { %v1608_v19 = vmul.f32 %v5721_v35, %v1572_v4  ;;  %v5474_v45 = vpop.permute.xlu0 %5473  ;;  %v1637_v23 = vmul.f32 %v5719_v20, %v1621_v10  ;;  %3940 = vst [vmem:[%s6423_s16 + $0xc8] sm:$0xff] %v1654_v37 }
 0x6a8   : > { %v5476_v47 = vunpack.i.h.bf16 %v5474_v45  ;;  %v5475_v60 = vunpack.i.l.bf16 %v5474_v45 }
 0x6a9   : > { %v1624_v9 = vsub.f32 2.0, %v1608_v19  ;;  %v1653_v17 = vmul.f32 %v6663_v8, %v1637_v23 }
 0x6aa   : > { %v5723_v11 = vpop.eup %5722  ;;  %v5080_v0 = vpack.c.bf16 %v5476_v47, %v5475_v60 }
 0x6ab   : > { %v1610_v3 = vmul.f32 %v5723_v11, %v1576_v33  ;;  %3939 = vst [vmem:[%s6423_s16 + $0xc0] sm:$0xff] %v1653_v17  ;;  %4608 = vmatprep.mubr.f32.mxu1 %v1653_v17  ;;  %v1640_v14 = vmul.f32 %v5721_v35, %v1624_v9  ;;  %v1961_v20 = vpop.permute.xlu0 %1960 }
 0x6ac   : > { %4609 = vmatmul.mubr.f32.gmra.mrb[24].mxu1 %v1654_v37  ;;  %5082 = vmatprep.subr.msk.bf16.mxu1 %vm6172_vm2, %v5080_v0 }
 0x6ad   : > { %v1626_v4 = vsub.f32 2.0, %v1610_v3  ;;  %4611 = vmatprep.mubr.f32.mxu1 %v1655_v22  ;;  %5085 = vmatpush3.bf16.xpose.msk.msra.mxu1 %vm6172_vm2, %v5080_v0  ;;  %v1656_v8 = vmul.f32 %v6666_v28, %v1640_v14 }
 0x6ae   : > { %v5725_v25 = vpop.eup %5724  ;;  %5088 = vmatprep.subr.msk.bf16.mxu1 %vm6172_vm2, %v5086_v63 }
 0x6af   : > { %v1609_v15 = vmul.f32 %v5725_v25, %v1574_v52  ;;  %3942 = vst [vmem:[%s6423_s16 + $0xd8] sm:$0xff] %v1656_v8  ;;  %v1642_v1 = vmul.f32 %v5723_v11, %v1626_v4  ;;  %v1965_v10 = vpop.permute.xlu0 %1964 }
 0x6b0   : > { %4612 = vmatmul.mubr.f32.gmra.mrb[26].mxu1 %v1656_v8 }
 0x6b1   : > { %v1625_v42 = vsub.f32 2.0, %v1609_v15  ;;  %v1658_v33 = vmul.f32 %v6671_v57, %v1642_v1 }
 0x6b3   : > { %v1641_v5 = vmul.f32 %v5725_v25, %v1625_v42  ;;  %3944 = vst [vmem:[%s6423_s16 + $0xe8] sm:$0xff] %v1658_v33  ;;  %v1969_v55 = vpop.permute.xlu0 %1968 }
 0x6b5   : > { %5091 = vmatpush3.bf16.xpose.msk.msra.mxu1 %vm6172_vm2, %v5086_v63  ;;  %v1657_v22 = vmul.f32 %v6674_v18, %v1641_v5 }
 0x6b7   : > { %3943 = vst [vmem:[%s6423_s16 + $0xe0] sm:$0xff] %v1657_v22  ;;  %4614 = vmatprep.mubr.f32.mxu1 %v1657_v22  ;;  %v1973_v9 = vpop.permute.xlu0 %1972 }
 0x6b8   : > { %4615 = vmatmul.mubr.f32.gmra.mrb[28].mxu1 %v1658_v33 }
 0x6bf   : > { %v1580_v28 = vpop.xlane.xlu1 %1579 }
 0x6c0   : > { %5726 = vrcp.f32 %v1580_v28 }
 0x6c3   : > { %v1578_v6 = vpop.xlane.xlu1 %1577 }
 0x6c4   : > { %5728 = vrcp.f32 %v1578_v6 }
 0x6c7   : > { %v1953_v13 = vpop.permute.xlu1 %1952 }
 0x6ca   : > { %v5727_v12 = vpop.eup %5726 }
 0x6cb   : > { %v1612_v57 = vmul.f32 %v5727_v12, %v1580_v28  ;;  %v1955_v52 = vpop.permute.xlu1 %1954 }
 0x6cd   : > { %v1628_v16 = vsub.f32 2.0, %v1612_v57 }
 0x6ce   : > { %v5729_v21 = vpop.eup %5728 }
 0x6cf   : > { %v1611_v37 = vmul.f32 %v5729_v21, %v1578_v6  ;;  %v1957_v35 = vpop.permute.xlu1 %1956  ;;  %v1644_v18 = vmul.f32 %v5727_v12, %v1628_v16 }
 0x6d1   : > { %v1627_v19 = vsub.f32 2.0, %v1611_v37  ;;  %v1660_v45 = vmul.f32 %v6683_v50, %v1644_v18  ;;  %v1977_v50 = vpop.permute.xlu0 %1976 }
 0x6d3   : > { %v1959_v23 = vpop.permute.xlu1 %1958  ;;  %v1643_v40 = vmul.f32 %v5729_v21, %v1627_v19  ;;  %3946 = vst [vmem:[%s6423_s16 + $0xf8] sm:$0xff] %v1660_v45 }
 0x6d5   : > { %v1659_v47 = vmul.f32 %v6688_v7, %v1643_v40  ;;  %v1981_v7 = vpop.permute.xlu0 %1980 }
 0x6d7   : > { %3945 = vst [vmem:[%s6423_s16 + $0xf0] sm:$0xff] %v1659_v47  ;;  %4617 = vmatprep.mubr.f32.mxu1 %v1659_v47  ;;  %v1963_v60 = vpop.permute.xlu1 %1962 }
 0x6d8   : > { %4618 = vmatmul.mubr.f32.gmra.mrb[30].mxu1 %v1660_v45 }
 0x6d9   : > { %4652 = vmatprep.mubr.msk.f32.mxu1 %vm535_vm1, %v1953_v13  ;;  %v5489_v63 = vpop.permute.xlu0 %5488 }
 0x6da   : > { %v5491_v8 = vunpack.i.h.bf16 %v5489_v63  ;;  %v5490_v25 = vunpack.i.l.bf16 %v5489_v63 }
 0x6db   : > { %v1967_v17 = vpop.permute.xlu1 %1966 }
 0x6dc   : > { %4653 = vmatmul.mubr.msk.f32.vlgmr.msra.gmra.mrb[32].mxu1 %vm535_vm1, %v1955_v52  ;;  %v5096_v28 = vpack.c.bf16 %v5491_v8, %v5490_v25 }
 0x6dd   : > { %4655 = vmatprep.mubr.msk.f32.mxu1 %vm535_vm1, %v1957_v35  ;;  %v5499_v6 = vpop.permute.xlu0 %5498 }
 0x6de   : > { %v5500_v12 = vunpack.i.l.bf16 %v5499_v6 }
 0x6df   : > { %v1971_v11 = vpop.permute.xlu1 %1970 }
 0x6e0   : > { %4656 = vmatmul.mubr.msk.f32.gmra.mrb[34].mxu1 %vm535_vm1, %v1959_v23 }
 0x6e1   : > { %4658 = vmatprep.mubr.msk.f32.mxu1 %vm535_vm1, %v1961_v20  ;;  %v5501_v20 = vunpack.i.h.bf16 %v5499_v6  ;;  %v5514_v19 = vpop.permute.xlu0 %5513 }
 0x6e2   : > { %v5516_v45 = vunpack.i.h.bf16 %v5514_v19  ;;  %v5515_v23 = vunpack.i.l.bf16 %v5514_v19 }
 0x6e3   : > { %v1975_v0 = vpop.permute.xlu1 %1974  ;;  %v5104_v21 = vpack.c.bf16 %v5501_v20, %v5500_v12 }
 0x6e4   : > { %4659 = vmatmul.mubr.msk.f32.gmra.mrb[36].mxu1 %vm535_vm1, %v1963_v60 }
 0x6e5   : > { %4661 = vmatprep.mubr.msk.f32.mxu1 %vm535_vm1, %v1965_v10 }
 0x6e7   : > { %v1979_v3 = vpop.permute.xlu1 %1978 }
 0x6e8   : > { %4662 = vmatmul.mubr.msk.f32.gmra.mrb[38].mxu1 %vm535_vm1, %v1967_v17 }
 0x6e9   : > { %4664 = vmatprep.mubr.msk.f32.mxu1 %vm535_vm1, %v1969_v55 }
 0x6eb   : > { %v1983_v14 = vpop.permute.xlu1 %1982 }
 0x6ec   : > { %4665 = vmatmul.mubr.msk.f32.gmra.mrb[40].mxu1 %vm535_vm1, %v1971_v11 }
 0x6ed   : > { %4667 = vmatprep.mubr.msk.f32.mxu1 %vm535_vm1, %v1973_v9  ;;  %v5116_v9 = vpack.c.bf16 %v5516_v45, %v5515_v23 }
 0x6ef   : > { %v5484_v4 = vpop.permute.xlu1 %5483 }
 0x6f0   : > { %v5486_v15 = vunpack.i.h.bf16 %v5484_v4  ;;  %v5485_v1 = vunpack.i.l.bf16 %v5484_v4  ;;  %4668 = vmatmul.mubr.msk.f32.gmra.mrb[42].mxu1 %vm535_vm1, %v1975_v0 }
 0x6f1   : > { %4670 = vmatprep.mubr.msk.f32.mxu1 %vm535_vm1, %v1977_v50 }
 0x6f2   : > { %v5092_v42 = vpack.c.bf16 %v5486_v15, %v5485_v1 }
 0x6f3   : > { %v5494_v33 = vpop.permute.xlu1 %5493 }
 0x6f4   : > { %v5496_v5 = vunpack.i.h.bf16 %v5494_v33  ;;  %v5495_v22 = vunpack.i.l.bf16 %v5494_v33  ;;  %4671 = vmatmul.mubr.msk.f32.gmra.mrb[44].mxu1 %vm535_vm1, %v1979_v3  ;;  %5093 = vmatprep.subr.bf16.mxu0 %v5092_v42 }
 0x6f5   : > { %4673 = vmatprep.mubr.msk.f32.mxu1 %vm535_vm1, %v1981_v7  ;;  %5095 = vmatpush3.bf16.msra.mxu0 %v5092_v42 }
 0x6f6   : > { %5097 = vmatprep.subr.bf16.mxu0 %v5096_v28  ;;  %v5100_v57 = vpack.c.bf16 %v5496_v5, %v5495_v22 }
 0x6f7   : > { %v5504_v13 = vpop.permute.xlu1 %5503 }
 0x6f8   : > { %4674 = vmatmul.mubr.msk.f32.gmra.mrb[46].mxu1 %vm535_vm1, %v1983_v14  ;;  %v5506_v52 = vunpack.i.h.bf16 %v5504_v13  ;;  %v5505_v16 = vunpack.i.l.bf16 %v5504_v13 }
 0x6f9   : > { %5099 = vmatpush3.bf16.msra.mxu0 %v5096_v28 }
 0x6fa   : > { %5101 = vmatprep.subr.bf16.mxu0 %v5100_v57  ;;  %v5108_v18 = vpack.c.bf16 %v5506_v52, %v5505_v16 }
 0x6fb   : > { %v5509_v10 = vpop.permute.xlu1 %5508 }
 0x6fc   : > { %v5511_v37 = vunpack.i.h.bf16 %v5509_v10  ;;  %v5510_v35 = vunpack.i.l.bf16 %v5509_v10 }
 0x6fd   : > { %5103 = vmatpush3.bf16.msra.mxu0 %v5100_v57 }
 0x6fe   : > { %5105 = vmatprep.subr.bf16.mxu0 %v5104_v21  ;;  %v5112_v40 = vpack.c.bf16 %v5511_v37, %v5510_v35 }
 0x6ff   : > { %v5519_v55 = vpop.permute.xlu1 %5518 }
 0x700   : > { %v5521_v47 = vunpack.i.h.bf16 %v5519_v55  ;;  %v5520_v60 = vunpack.i.l.bf16 %v5519_v55 }
 0x701   : > { %5107 = vmatpush3.bf16.msra.mxu0 %v5104_v21 }
 0x702   : > { %5109 = vmatprep.subr.bf16.mxu0 %v5108_v18  ;;  %v5120_v17 = vpack.c.bf16 %v5521_v47, %v5520_v60 }
 0x705   : > { %5111 = vmatpush3.bf16.msra.mxu0 %v5108_v18 }
 0x706   : > { %5113 = vmatprep.subr.bf16.mxu0 %v5112_v40 }
 0x709   : > { %5115 = vmatpush3.bf16.msra.mxu0 %v5112_v40 }
 0x70a   : > { %5117 = vmatprep.subr.bf16.mxu0 %v5116_v9 }
 0x70d   : > { %5119 = vmatpush3.bf16.msra.mxu0 %v5116_v9 }
 0x70e   : > { %5121 = vmatprep.subr.bf16.mxu0 %v5120_v17 }
 0x711   : > { %5123 = vmatpush3.bf16.msra.mxu0 %v5120_v17 }
 0x72e   : > { %v6818_v11 = vpop.f32.mrb[16].mxu1 }
 0x72f   : > { %7588 = vst [vmem:[#allocation6_spill] sm:$0xff] %v6818_v11  ;;  %v6820_v50 = vpop.f32.mrb[17].mxu1 }
 0x767   : > { %v6822_v0 = vpop.f32.mrb[18].mxu1 }
 0x768   : > { %7589 = vst [vmem:[#allocation7_spill] sm:$0xff] %v6822_v0  ;;  %v6824_v7 = vpop.f32.mrb[19].mxu1 }
 0x76f   : > { %v6826_v3 = vpop.f32.mrb[20].mxu1 }
 0x770   : > { %7590 = vst [vmem:[#allocation8_spill] sm:$0xff] %v6826_v3  ;;  %v6828_v14 = vpop.f32.mrb[21].mxu1 }
 0x777   : > { %v6830_v63 = vpop.f32.mrb[22].mxu1 }
 0x778   : > { %7591 = vst [vmem:[#allocation9_spill] sm:$0xff] %v6830_v63  ;;  %v6832_v4 = vpop.f32.mrb[23].mxu1 }
 0x779   : > { %7592 = vst [vmem:[#allocation10_spill] sm:$0xff] %v6832_v4 }
 0x77f   : > { %v6834_v8 = vpop.f32.mrb[24].mxu1 }
 0x780   : > { %7593 = vst [vmem:[#allocation11_spill] sm:$0xff] %v6834_v8  ;;  %v6836_v25 = vpop.f32.mrb[25].mxu1 }
 0x781   : > { %7594 = vst [vmem:[#allocation12_spill] sm:$0xff] %v6836_v25 }
 0x783   : > { %v6838_v15 = vpop.f32.mrb[26].mxu1 }
 0x784   : > { %7595 = vst [vmem:[#allocation13_spill] sm:$0xff] %v6838_v15  ;;  %v6840_v1 = vpop.f32.mrb[27].mxu1 }
 0x785   : > { %7596 = vst [vmem:[#allocation14_spill] sm:$0xff] %v6840_v1 }
 0x78b   : > { %v6842_v42 = vpop.f32.mrb[28].mxu1 }
 0x78c   : > { %7597 = vst [vmem:[#allocation15_spill] sm:$0xff] %v6842_v42  ;;  %v6844_v33 = vpop.f32.mrb[29].mxu1 }
 0x78d   : > { %7598 = vst [vmem:[#allocation16_spill] sm:$0xff] %v6844_v33 }
 0x7ab   : > { %v6846_v5 = vpop.f32.mrb[30].mxu1 }
 0x7ac   : > { %7599 = vst [vmem:[#allocation17_spill] sm:$0xff] %v6846_v5  ;;  %v6848_v22 = vpop.f32.mrb[31].mxu1 }
 0x7ad   : > { %7600 = vst [vmem:[#allocation18_spill] sm:$0xff] %v6848_v22 }
 0x7af   : > { %v4654_v28 = vpop.f32.mrb[32].mxu1 }
 0x7b0   : > { %v2226_v6 = vsel %vm486_vm3, %v4654_v28, -1e+30  ;;  %v2146_v13 = vpop.f32.mrb[33].mxu1 }
 0x7b1   : > { %v2225_v20 = vsel %vm486_vm3, %v2146_v13, -1e+30  ;;  %2243 = vmax.xlane.f32.xlu1 %v2226_v6 }
 0x7b2   : > { %2241 = vmax.xlane.f32.xlu0 %v2225_v20 }
 0x7b3   : > { %v4657_v12 = vpop.f32.mrb[34].mxu1 }
 0x7b4   : > { %v2156_v57 = vpop.f32.mrb[35].mxu1  ;;  %v2228_v47 = vsel %vm486_vm3, %v4657_v12, -1e+30 }
 0x7b5   : > { %v2227_v9 = vsel %vm486_vm3, %v2156_v57, -1e+30 }
 0x7b7   : > { %v4660_v52 = vpop.f32.mrb[36].mxu1 }
 0x7b8   : > { %v2166_v16 = vpop.f32.mrb[37].mxu1  ;;  %v2230_v28 = vsel %vm486_vm3, %v4660_v52, -1e+30 }
 0x7b9   : > { %v6864_v60 = vsel %vm486_vm3, %v2166_v16, -1e+30 }
 0x7bb   : > { %v4663_v21 = vpop.f32.mrb[38].mxu1 }
 0x7bc   : > { %v2176_v10 = vpop.f32.mrb[39].mxu1  ;;  %v6882_v12 = vsel %vm486_vm3, %v4663_v21, -1e+30 }
 0x7bd   : > { %v6871_v17 = vsel %vm486_vm3, %v2176_v10, -1e+30 }
 0x7bf   : > { %v4666_v37 = vpop.f32.mrb[40].mxu1 }
 0x7c0   : > { %v2186_v35 = vpop.f32.mrb[41].mxu1  ;;  %v6890_v52 = vsel %vm486_vm3, %v4666_v37, -1e+30 }
 0x7c1   : > { %v6878_v13 = vsel %vm486_vm3, %v2186_v35, -1e+30 }
 0x7c2   : > { %5528 = vrot.lane.b32.xlu1 %v6098_v32, %s5930_s28 }
 0x7c3   : > { %v4669_v18 = vpop.f32.mrb[42].mxu1 }
 0x7c4   : > { %v2196_v19 = vpop.f32.mrb[43].mxu1  ;;  %v6899_v21 = vsel %vm486_vm3, %v4669_v18, -1e+30 }
 0x7c5   : > { %v2235_v57 = vsel %vm486_vm3, %v2196_v19, -1e+30 }
 0x7c6   : > { %5533 = vrot.lane.b32.xlu1 %v6108_v38, %s5930_s28 }
 0x7c7   : > { %v4672_v45 = vpop.f32.mrb[44].mxu1 }
 0x7c8   : > { %5523 = vrot.lane.b32.xlu0 %v6088_v27, %s5930_s28  ;;  %v2206_v23 = vpop.f32.mrb[45].mxu1  ;;  %v6909_v37 = vsel %vm486_vm3, %v4672_v45, -1e+30 }
 0x7c9   : > { %v6895_v16 = vsel %vm486_vm3, %v2206_v23, -1e+30 }
 0x7cb   : > { %v4675_v40 = vpop.f32.mrb[46].mxu1 }
 0x7cc   : > { %v2216_v55 = vpop.f32.mrb[47].mxu1  ;;  %v6915_v35 = vsel %vm486_vm3, %v4675_v40, -1e+30 }
 0x7cd   : > { %v6905_v10 = vsel %vm486_vm3, %v2216_v55, -1e+30 }
 0x7e7   : > { %2247 = vmax.xlane.f32.xlu0 %v2228_v47 }
 0x7ea   : > { %2249 = vmax.xlane.f32.xlu1 %v6864_v60 }
 0x7eb   : > { %2245 = vmax.xlane.f32.xlu0 %v2227_v9 }
 0x7ee   : > { %2253 = vmax.xlane.f32.xlu1 %v6871_v17 }
 0x7ef   : > { %2251 = vmax.xlane.f32.xlu0 %v2230_v28 }
 0x7f2   : > { %2257 = vmax.xlane.f32.xlu1 %v6878_v13 }
 0x7f3   : > { %2255 = vmax.xlane.f32.xlu0 %v6882_v12 }
 0x7f6   : > { %2261 = vmax.xlane.f32.xlu1 %v2235_v57 }
 0x7f7   : > { %2259 = vmax.xlane.f32.xlu0 %v6890_v52 }
 0x7fa   : > { %2265 = vmax.xlane.f32.xlu1 %v6895_v16 }
 0x7fb   : > { %2263 = vmax.xlane.f32.xlu0 %v6899_v21 }
 0x7fe   : > { %2269 = vmax.xlane.f32.xlu1 %v6905_v10 }
 0x7ff   : > { %2267 = vmax.xlane.f32.xlu0 %v6909_v37 }
 0x803   : > { %2271 = vmax.xlane.f32.xlu0 %v6915_v35 }
 0x80f   : > { %5543 = vrot.lane.b32.xlu1 %v6128_v48, %s5930_s28 }
 0x813   : > { %5548 = vrot.lane.b32.xlu1 %v6138_v53, %s5930_s28 }
 0x83e   : > { %v2244_v18 = vpop.xlane.xlu1 %2243 }
 0x83f   : > { %v2274_v19 = vsub.f32 %v2226_v6, %v2244_v18  ;;  %v2242_v45 = vpop.xlane.xlu0 %2241 }
 0x840   : > { %v2273_v23 = vsub.f32 %v2225_v20, %v2242_v45 }
 0x841   : > { %v2291_v55 = vmul.f32 1.442695, %v2274_v19 }
 0x842   : > { %v2289_v5 = vmul.f32 1.442695, %v2273_v23 }
 0x843   : > { %5730 = vpow2.f32 %v2291_v55  ;;  %v5524_v42 = vpop.permute.xlu0 %5523 }
 0x844   : > { %5732 = vpow2.f32 %v2289_v5  ;;  %v5526_v15 = vunpack.i.h.bf16 %v5524_v42  ;;  %v5525_v40 = vunpack.i.l.bf16 %v5524_v42  ;;  %v6935_v5 = vpop.permute.xlu1 %5528 }
 0x846   : > { %v6922_v8 = vpack.c.bf16 %v5526_v15, %v5525_v40 }
 0x848   : > { %5126 = vmatprep.subr.msk.bf16.mxu0 %vm6172_vm2, %v6922_v8  ;;  %v6937_v42 = vpop.permute.xlu1 %5533 }
 0x84d   : > { %v6927_v63 = vpop.eup %5730 }
 0x84e   : > { %v6929_v3 = vpop.eup %5732  ;;  %2323 = vadd.xlane.f32.xlu0 %v6927_v63 }
 0x84f   : > { %2321 = vadd.xlane.f32.xlu1 %v6929_v3 }
 0x864   : > { %5538 = vrot.lane.b32.xlu0 %v6118_v43, %s5930_s28 }
 0x874   : > { %v2248_v15 = vpop.xlane.xlu0 %2247 }
 0x875   : > { %v2276_v6 = vsub.f32 %v2228_v47, %v2248_v15 }
 0x877   : > { %v2295_v20 = vmul.f32 1.442695, %v2276_v6  ;;  %v2250_v18 = vpop.xlane.xlu1 %2249 }
 0x878   : > { %v2246_v19 = vpop.xlane.xlu0 %2245  ;;  %v2277_v22 = vsub.f32 %v6864_v60, %v2250_v18 }
 0x879   : > { %5734 = vpow2.f32 %v2295_v20  ;;  %v2275_v45 = vsub.f32 %v2227_v9, %v2246_v19 }
 0x87a   : > { %v2297_v25 = vmul.f32 1.442695, %v2277_v22 }
 0x87b   : > { %v2293_v23 = vmul.f32 1.442695, %v2275_v45  ;;  %v2254_v55 = vpop.xlane.xlu1 %2253 }
 0x87c   : > { %v2252_v40 = vpop.xlane.xlu0 %2251  ;;  %v2279_v9 = vsub.f32 %v6871_v17, %v2254_v55 }
 0x87d   : > { %5736 = vpow2.f32 %v2293_v23  ;;  %v2278_v0 = vsub.f32 %v2230_v28, %v2252_v40 }
 0x87f   : > { %v2299_v11 = vmul.f32 1.442695, %v2278_v0  ;;  %v2258_v33 = vpop.xlane.xlu1 %2257 }
 0x880   : > { %v2256_v1 = vpop.xlane.xlu0 %2255 }
 0x881   : > { %5738 = vpow2.f32 %v2299_v11  ;;  %v2280_v4 = vsub.f32 %v6882_v12, %v2256_v1  ;;  %v2301_v11 = vmul.f32 1.442695, %v2279_v9 }
 0x882   : > { %5740 = vpow2.f32 %v2297_v25  ;;  %v2281_v25 = vsub.f32 %v6878_v13, %v2258_v33 }
 0x883   : > { %v6941_v47 = vpop.eup %5734  ;;  %v2262_v15 = vpop.xlane.xlu1 %2261  ;;  %v2303_v20 = vmul.f32 1.442695, %v2280_v4 }
 0x884   : > { %v2283_v6 = vsub.f32 %v2235_v57, %v2262_v15  ;;  %2327 = vadd.xlane.f32.xlu0 %v6941_v47  ;;  %v2260_v18 = vpop.xlane.xlu0 %2259  ;;  %v2305_v12 = vmul.f32 1.442695, %v2281_v25 }
 0x885   : > { %v2282_v0 = vsub.f32 %v6890_v52, %v2260_v18 }
 0x886   : > { %v2309_v60 = vmul.f32 1.442695, %v2283_v6 }
 0x887   : > { %v6945_v28 = vpop.eup %5736  ;;  %v2307_v4 = vmul.f32 1.442695, %v2282_v0  ;;  %v2266_v23 = vpop.xlane.xlu1 %2265 }
 0x888   : > { %5742 = vpow2.f32 %v2309_v60  ;;  %2325 = vadd.xlane.f32.xlu1 %v6945_v28  ;;  %v2264_v22 = vpop.xlane.xlu0 %2263 }
 0x889   : > { %5744 = vpow2.f32 %v2303_v20  ;;  %v2284_v57 = vsub.f32 %v6899_v21, %v2264_v22  ;;  %v2285_v21 = vsub.f32 %v6895_v16, %v2266_v23 }
 0x88a   : > { %5746 = vpow2.f32 %v2301_v11 }
 0x88b   : > { %v6949_v1 = vpop.eup %5738  ;;  %5748 = vpow2.f32 %v2307_v4  ;;  %v2311_v33 = vmul.f32 1.442695, %v2284_v57  ;;  %v2313_v6 = vmul.f32 1.442695, %v2285_v21  ;;  %v2270_v11 = vpop.xlane.xlu1 %2269 }
 0x88c   : > { %2331 = vadd.xlane.f32.xlu0 %v6949_v1  ;;  %v6953_v17 = vpop.eup %5740  ;;  %v2268_v52 = vpop.xlane.xlu0 %2267  ;;  %5750 = vpow2.f32 %v2305_v12  ;;  %v2287_v0 = vsub.f32 %v6905_v10, %v2270_v11 }
 0x88d   : > { %v2286_v13 = vsub.f32 %v6909_v37, %v2268_v52  ;;  %5752 = vpow2.f32 %v2311_v33 }
 0x88e   : > { %v2317_v25 = vmul.f32 1.442695, %v2287_v0 }
 0x88f   : > { %v2315_v40 = vmul.f32 1.442695, %v2286_v13 }
 0x890   : > { %2329 = vadd.xlane.f32.xlu0 %v6953_v17  ;;  %v2272_v60 = vpop.xlane.xlu0 %2271 }
 0x891   : > { %5754 = vpow2.f32 %v2315_v40  ;;  %v2288_v18 = vsub.f32 %v6915_v35, %v2272_v60  ;;  %v5544_v35 = vpop.permute.xlu1 %5543 }
 0x892   : > { %v6957_v19 = vpop.eup %5742  ;;  %5756 = vpow2.f32 %v2313_v6 }
 0x893   : > { %v6959_v45 = vpop.eup %5744  ;;  %2341 = vadd.xlane.f32.xlu1 %v6957_v19  ;;  %v2319_v22 = vmul.f32 1.442695, %v2288_v18 }
 0x894   : > { %2335 = vadd.xlane.f32.xlu0 %v6959_v45  ;;  %v6964_v55 = vpop.eup %5746 }
 0x895   : > { %v6968_v15 = vpop.eup %5748  ;;  %5758 = vpow2.f32 %v2319_v22 }
 0x896   : > { %v6971_v9 = vpop.eup %5750  ;;  %5760 = vpow2.f32 %v2317_v25 }
 0x897   : > { %v6974_v37 = vpop.eup %5752 }
 0x898   : > { %2333 = vadd.xlane.f32.xlu0 %v6964_v55 }
 0x89b   : > { %v6979_v16 = vpop.eup %5754 }
 0x89c   : > { %2339 = vadd.xlane.f32.xlu0 %v6968_v15  ;;  %v6984_v20 = vpop.eup %5756 }
 0x8a0   : > { %2337 = vadd.xlane.f32.xlu0 %v6971_v9 }
 0x8a4   : > { %2343 = vadd.xlane.f32.xlu0 %v6974_v37  ;;  %5558 = vrot.lane.b32.xlu1 %v6158_v62, %s5930_s28 }
 0x8a8   : > { %2347 = vadd.xlane.f32.xlu0 %v6979_v16  ;;  %2724 = vrot.lane.b32.xlu1 %v6082_v26, %s5931_s29  ;;  %v6995_v26 = vpop.eup %5758 }
 0x8a9   : > { %v7000_v10 = vpop.eup %5760 }
 0x8ac   : > { %2345 = vadd.xlane.f32.xlu0 %v6984_v20 }
 0x8c2   : > { %5553 = vrot.lane.b32.xlu0 %v6148_v58, %s5930_s28 }
 0x8c6   : > { %2732 = vrot.lane.b32.xlu0 %v6104_v36, %s5931_s29  ;;  %v5549_v36 = vpop.permute.xlu1 %5548 }
 0x8ca   : > { %2736 = vrot.lane.b32.xlu0 %v6112_v41, %s5931_s29 }
 0x8cc   : > { %2351 = vadd.xlane.f32.xlu1 %v6995_v26 }
 0x8ce   : > { %2740 = vrot.lane.b32.xlu0 %v6122_v46, %s5931_s29 }
 0x8d0   : > { %2349 = vadd.xlane.f32.xlu1 %v7000_v10 }
 0x8d2   : > { %2744 = vrot.lane.b32.xlu0 %v6132_v51, %s5931_s29 }
 0x8d6   : > { %2748 = vrot.lane.b32.xlu0 %v6142_v56, %s5931_s29 }
 0x8da   : > { %2752 = vrot.lane.b32.xlu0 %v6152_v61, %s5931_s29 }
 0x8db   : > { %v2324_v41 = vpop.xlane.xlu0 %2323 }
 0x8dc   : > { %5762 = vrcp.f32 %v2324_v41  ;;  %v2322_v4 = vpop.xlane.xlu1 %2321 }
 0x8dd   : > { %5764 = vrcp.f32 %v2322_v4 }
 0x8de   : > { %5563 = vrot.lane.b32.xlu0 %v6088_v27, %s5932_s9 }
 0x8e1   : > { %2726 = vrot.lane.b32.xlu1 %v6080_v24, %s5931_s29 }
 0x8e2   : > { %5573 = vrot.lane.b32.xlu0 %v6108_v38, %s5932_s9  ;;  %v5531_v38 = vunpack.i.h.bf16 %v6935_v5 }
 0x8e5   : > { %2728 = vrot.lane.b32.xlu1 %v6094_v31, %s5931_s29  ;;  %v5530_v31 = vunpack.i.l.bf16 %v6935_v5 }
 0x8e6   : > { %v5763_v46 = vpop.eup %5762  ;;  %5583 = vrot.lane.b32.xlu0 %v6128_v48, %s5932_s9 }
 0x8e7   : > { %v5765_v51 = vpop.eup %5764  ;;  %v2370_v56 = vmul.f32 %v5763_v46, %v2324_v41  ;;  %v5130_v33 = vpack.c.bf16 %v5531_v38, %v5530_v31 }
 0x8e8   : > { %v2369_v61 = vmul.f32 %v5765_v51, %v2322_v4 }
 0x8e9   : > { %v2386_v12 = vsub.f32 2.0, %v2370_v56  ;;  %2730 = vrot.lane.b32.xlu1 %v6090_v29, %s5931_s29  ;;  %v5536_v29 = vunpack.i.h.bf16 %v6937_v42 }
 0x8ea   : > { %v2385_v24 = vsub.f32 2.0, %v2369_v61 }
 0x8eb   : > { %v2402_v27 = vmul.f32 %v5763_v46, %v2386_v12 }
 0x8ec   : > { %v2401_v57 = vmul.f32 %v5765_v51, %v2385_v24 }
 0x8ed   : > { %v2418_v52 = vmul.f32 %v6927_v63, %v2402_v27  ;;  %2734 = vrot.lane.b32.xlu1 %v6100_v34, %s5931_s29  ;;  %v5535_v34 = vunpack.i.l.bf16 %v6937_v42 }
 0x8ee   : > { %v2417_v48 = vmul.f32 %v6929_v3, %v2401_v57 }
 0x8ef   : > { %3980 = vst [vmem:[%s6423_s16 + $0x108] sm:$0xff] %v2418_v52  ;;  %v5136_v3 = vpack.c.bf16 %v5536_v29, %v5535_v34 }
 0x8f0   : > { %3979 = vst [vmem:[%s6423_s16 + $0x100] sm:$0xff] %v2417_v48  ;;  %4708 = vmatprep.mubr.f32.mxu0 %v2417_v48 }
 0x8f1   : > { %2738 = vrot.lane.b32.xlu1 %v6110_v39, %s5931_s29  ;;  %4709 = vmatmul.mubr.f32.vlgmr.msra.gmra.mrb[48].mxu0 %v2418_v52  ;;  %v5539_v39 = vpop.permute.xlu0 %5538 }
 0x8f2   : > { %5129 = vmatpush3.bf16.xpose.msk.msra.mxu0 %vm6172_vm2, %v6922_v8  ;;  %v5541_v63 = vunpack.i.h.bf16 %v5539_v39  ;;  %v5540_v8 = vunpack.i.l.bf16 %v5539_v39 }
 0x8f3   : > { %5132 = vmatprep.subr.msk.bf16.mxu0 %vm6172_vm2, %v5130_v33 }
 0x8f4   : > { %v5142_v5 = vpack.c.bf16 %v5541_v63, %v5540_v8 }
 0x8f5   : > { %2742 = vrot.lane.b32.xlu1 %v6120_v44, %s5931_s29  ;;  %v5546_v44 = vunpack.i.h.bf16 %v5544_v35 }
 0x8f9   : > { %2746 = vrot.lane.b32.xlu1 %v6130_v49, %s5931_s29  ;;  %v5545_v49 = vunpack.i.l.bf16 %v5544_v35 }
 0x8fa   : > { %5135 = vmatpush3.bf16.xpose.msk.msra.mxu0 %vm6172_vm2, %v5130_v33 }
 0x8fb   : > { %5138 = vmatprep.subr.msk.bf16.mxu0 %vm6172_vm2, %v5136_v3  ;;  %v5148_v42 = vpack.c.bf16 %v5546_v44, %v5545_v49 }
 0x8fd   : > { %2750 = vrot.lane.b32.xlu1 %v6140_v54, %s5931_s29  ;;  %v5551_v54 = vunpack.i.h.bf16 %v5549_v36 }
 0x901   : > { %2754 = vrot.lane.b32.xlu1 %v6150_v59, %s5931_s29  ;;  %v5550_v59 = vunpack.i.l.bf16 %v5549_v36 }
 0x902   : > { %5141 = vmatpush3.bf16.xpose.msk.msra.mxu0 %vm6172_vm2, %v5136_v3 }
 0x903   : > { %5144 = vmatprep.subr.msk.bf16.mxu0 %vm6172_vm2, %v5142_v5  ;;  %v5154_v13 = vpack.c.bf16 %v5551_v54, %v5550_v59 }
 0x905   : > { %5568 = vrot.lane.b32.xlu1 %v6098_v32, %s5932_s9 }
 0x909   : > { %5578 = vrot.lane.b32.xlu1 %v6118_v43, %s5932_s9 }
 0x90a   : > { %5147 = vmatpush3.bf16.xpose.msk.msra.mxu0 %vm6172_vm2, %v5142_v5 }
 0x90b   : > { %5150 = vmatprep.subr.msk.bf16.mxu0 %vm6172_vm2, %v5148_v42 }
 0x911   : > { %v2328_v23 = vpop.xlane.xlu0 %2327 }
 0x912   : > { %5766 = vrcp.f32 %v2328_v23  ;;  %5153 = vmatpush3.bf16.xpose.msk.msra.mxu0 %vm6172_vm2, %v5148_v42 }
 0x913   : > { %5156 = vmatprep.subr.msk.bf16.mxu0 %vm6172_vm2, %v5154_v13 }
 0x915   : > { %v2326_v32 = vpop.xlane.xlu1 %2325 }
 0x916   : > { %5768 = vrcp.f32 %v2326_v32 }
 0x919   : > { %v2332_v43 = vpop.xlane.xlu0 %2331 }
 0x91a   : > { %5770 = vrcp.f32 %v2332_v43  ;;  %5159 = vmatpush3.bf16.xpose.msk.msra.mxu0 %vm6172_vm2, %v5154_v13 }
 0x91c   : > { %v5767_v21 = vpop.eup %5766 }
 0x91d   : > { %v2372_v40 = vmul.f32 %v5767_v21, %v2328_v23  ;;  %v2330_v6 = vpop.xlane.xlu0 %2329 }
 0x91e   : > { %5772 = vrcp.f32 %v2330_v6 }
 0x91f   : > { %v2388_v60 = vsub.f32 2.0, %v2372_v40 }
 0x920   : > { %v5769_v18 = vpop.eup %5768  ;;  %v2342_v11 = vpop.xlane.xlu1 %2341 }
 0x921   : > { %v2371_v0 = vmul.f32 %v5769_v18, %v2326_v32  ;;  %5774 = vrcp.f32 %v2342_v11  ;;  %v2336_v22 = vpop.xlane.xlu0 %2335  ;;  %v2404_v25 = vmul.f32 %v5767_v21, %v2388_v60 }
 0x922   : > { %5776 = vrcp.f32 %v2336_v22 }
 0x923   : > { %v2387_v35 = vsub.f32 2.0, %v2371_v0  ;;  %v2420_v36 = vmul.f32 %v6941_v47, %v2404_v25 }
 0x924   : > { %v5771_v41 = vpop.eup %5770 }
 0x925   : > { %v2374_v4 = vmul.f32 %v5771_v41, %v2332_v43  ;;  %v2334_v46 = vpop.xlane.xlu0 %2333  ;;  %v2403_v51 = vmul.f32 %v5769_v18, %v2387_v35  ;;  %3982 = vst [vmem:[%s6423_s16 + $0x118] sm:$0xff] %v2420_v36 }
 0x926   : > { %5778 = vrcp.f32 %v2334_v46 }
 0x927   : > { %v2390_v56 = vsub.f32 2.0, %v2374_v4  ;;  %v2419_v61 = vmul.f32 %v6945_v28, %v2403_v51 }
 0x928   : > { %v5773_v12 = vpop.eup %5772 }
 0x929   : > { %v2373_v24 = vmul.f32 %v5773_v12, %v2330_v6  ;;  %v2340_v27 = vpop.xlane.xlu0 %2339  ;;  %3981 = vst [vmem:[%s6423_s16 + $0x110] sm:$0xff] %v2419_v61  ;;  %4711 = vmatprep.mubr.f32.mxu0 %v2419_v61  ;;  %v2406_v57 = vmul.f32 %v5771_v41, %v2390_v56 }
 0x92a   : > { %5780 = vrcp.f32 %v2340_v27  ;;  %4712 = vmatmul.mubr.f32.gmra.mrb[50].mxu0 %v2420_v36 }
 0x92b   : > { %v5775_v38 = vpop.eup %5774  ;;  %v2389_v47 = vsub.f32 2.0, %v2373_v24  ;;  %v2422_v31 = vmul.f32 %v6949_v1, %v2406_v57 }
 0x92c   : > { %v5777_v52 = vpop.eup %5776  ;;  %v2379_v48 = vmul.f32 %v5775_v38, %v2342_v11 }
 0x92d   : > { %v2376_v33 = vmul.f32 %v5777_v52, %v2336_v22  ;;  %v2338_v29 = vpop.xlane.xlu0 %2337  ;;  %v2405_v34 = vmul.f32 %v5773_v12, %v2389_v47  ;;  %3984 = vst [vmem:[%s6423_s16 + $0x128] sm:$0xff] %v2422_v31 }
 0x92e   : > { %v2395_v28 = vsub.f32 2.0, %v2379_v48  ;;  %5782 = vrcp.f32 %v2338_v29 }
 0x92f   : > { %v2392_v3 = vsub.f32 2.0, %v2376_v33  ;;  %v2421_v39 = vmul.f32 %v6953_v17, %v2405_v34 }
 0x930   : > { %v5779_v63 = vpop.eup %5778  ;;  %v2411_v8 = vmul.f32 %v5775_v38, %v2395_v28 }
 0x931   : > { %v2375_v5 = vmul.f32 %v5779_v63, %v2334_v46  ;;  %v2344_v44 = vpop.xlane.xlu0 %2343  ;;  %3983 = vst [vmem:[%s6423_s16 + $0x120] sm:$0xff] %v2421_v39  ;;  %4714 = vmatprep.mubr.f32.mxu0 %v2421_v39  ;;  %v2408_v1 = vmul.f32 %v5777_v52, %v2392_v3 }
 0x932   : > { %5784 = vrcp.f32 %v2344_v44  ;;  %4715 = vmatmul.mubr.f32.gmra.mrb[52].mxu0 %v2422_v31  ;;  %v2427_v49 = vmul.f32 %v6957_v19, %v2411_v8 }
 0x933   : > { %v2391_v42 = vsub.f32 2.0, %v2375_v5  ;;  %v2424_v54 = vmul.f32 %v6959_v45, %v2408_v1  ;;  %v5559_v45 = vpop.permute.xlu1 %5558 }
 0x934   : > { %v5781_v59 = vpop.eup %5780  ;;  %3989 = vst [vmem:[%s6423_s16 + $0x150] sm:$0xff] %v2427_v49  ;;  %v5560_v35 = vunpack.i.l.bf16 %v5559_v45 }
 0x935   : > { %v2378_v13 = vmul.f32 %v5781_v59, %v2340_v27  ;;  %v2348_v17 = vpop.xlane.xlu0 %2347  ;;  %v2407_v23 = vmul.f32 %v5779_v63, %v2391_v42  ;;  %3986 = vst [vmem:[%s6423_s16 + $0x138] sm:$0xff] %v2424_v54 }
 0x936   : > { %5786 = vrcp.f32 %v2348_v17 }
 0x937   : > { %v2394_v32 = vsub.f32 2.0, %v2378_v13  ;;  %v2423_v43 = vmul.f32 %v6964_v55, %v2407_v23  ;;  %v5561_v55 = vunpack.i.h.bf16 %v5559_v45  ;;  %v2725_v3 = vpop.permute.xlu1 %2724 }
 0x938   : > { %v5783_v21 = vpop.eup %5782 }
 0x939   : > { %v2377_v40 = vmul.f32 %v5783_v21, %v2338_v29  ;;  %v2346_v6 = vpop.xlane.xlu0 %2345  ;;  %3985 = vst [vmem:[%s6423_s16 + $0x130] sm:$0xff] %v2423_v43  ;;  %4717 = vmatprep.mubr.f32.mxu0 %v2423_v43  ;;  %v2410_v19 = vmul.f32 %v5781_v59, %v2394_v32  ;;  %v5166_v24 = vpack.c.bf16 %v5561_v55, %v5560_v35 }
 0x93a   : > { %5788 = vrcp.f32 %v2346_v6  ;;  %4718 = vmatmul.mubr.f32.gmra.mrb[54].mxu0 %v2424_v54 }
 0x93b   : > { %v2393_v60 = vsub.f32 2.0, %v2377_v40  ;;  %v2426_v18 = vmul.f32 %v6968_v15, %v2410_v19 }
 0x93c   : > { %v5785_v11 = vpop.eup %5784 }
 0x93d   : > { %v2380_v0 = vmul.f32 %v5785_v11, %v2344_v44  ;;  %v5554_v22 = vpop.permute.xlu0 %5553  ;;  %v2409_v25 = vmul.f32 %v5783_v21, %v2393_v60  ;;  %3988 = vst [vmem:[%s6423_s16 + $0x148] sm:$0xff] %v2426_v18 }
 0x93e   : > { %v5556_v36 = vunpack.i.h.bf16 %v5554_v22  ;;  %v5555_v41 = vunpack.i.l.bf16 %v5554_v22 }
 0x93f   : > { %v2396_v4 = vsub.f32 2.0, %v2380_v0  ;;  %v2425_v46 = vmul.f32 %v6971_v9, %v2409_v25 }
 0x940   : > { %v5787_v51 = vpop.eup %5786  ;;  %v5160_v56 = vpack.c.bf16 %v5556_v36, %v5555_v41 }
 0x941   : > { %v2382_v61 = vmul.f32 %v5787_v51, %v2348_v17  ;;  %v7085_v12 = vpop.permute.xlu0 %2732  ;;  %3987 = vst [vmem:[%s6423_s16 + $0x140] sm:$0xff] %v2425_v46  ;;  %4720 = vmatprep.mubr.f32.mxu0 %v2425_v46  ;;  %v2412_v15 = vmul.f32 %v5785_v11, %v2396_v4 }
 0x942   : > { %4721 = vmatmul.mubr.f32.gmra.mrb[56].mxu0 %v2426_v18  ;;  %5162 = vmatprep.subr.msk.bf16.mxu0 %vm6172_vm2, %v5160_v56 }
 0x943   : > { %v2398_v27 = vsub.f32 2.0, %v2382_v61  ;;  %4723 = vmatprep.mubr.f32.mxu0 %v2427_v49  ;;  %5165 = vmatpush3.bf16.xpose.msk.msra.mxu0 %vm6172_vm2, %v5160_v56  ;;  %v2428_v9 = vmul.f32 %v6974_v37, %v2412_v15 }
 0x944   : > { %v5789_v57 = vpop.eup %5788  ;;  %5168 = vmatprep.subr.msk.bf16.mxu0 %vm6172_vm2, %v5166_v24 }
 0x945   : > { %v2381_v38 = vmul.f32 %v5789_v57, %v2346_v6  ;;  %v2737_v47 = vpop.permute.xlu0 %2736  ;;  %3990 = vst [vmem:[%s6423_s16 + $0x158] sm:$0xff] %v2428_v9  ;;  %v2414_v31 = vmul.f32 %v5787_v51, %v2398_v27 }
 0x946   : > { %4724 = vmatmul.mubr.f32.gmra.mrb[58].mxu0 %v2428_v9 }
 0x947   : > { %v2397_v52 = vsub.f32 2.0, %v2381_v38  ;;  %v2430_v48 = vmul.f32 %v6979_v16, %v2414_v31 }
 0x949   : > { %v2741_v33 = vpop.permute.xlu0 %2740  ;;  %v2413_v29 = vmul.f32 %v5789_v57, %v2397_v52  ;;  %3992 = vst [vmem:[%s6423_s16 + $0x168] sm:$0xff] %v2430_v48 }
 0x94b   : > { %5171 = vmatpush3.bf16.xpose.msk.msra.mxu0 %vm6172_vm2, %v5166_v24  ;;  %v2429_v37 = vmul.f32 %v6984_v20, %v2413_v29 }
 0x94d   : > { %v2745_v34 = vpop.permute.xlu0 %2744  ;;  %3991 = vst [vmem:[%s6423_s16 + $0x160] sm:$0xff] %v2429_v37  ;;  %4726 = vmatprep.mubr.f32.mxu0 %v2429_v37 }
 0x94e   : > { %4727 = vmatmul.mubr.f32.gmra.mrb[60].mxu0 %v2430_v48 }
 0x951   : > { %v7102_v28 = vpop.permute.xlu0 %2748 }
 0x955   : > { %v7104_v39 = vpop.permute.xlu0 %2752 }
 0x959   : > { %v5564_v63 = vpop.permute.xlu0 %5563  ;;  %v2352_v8 = vpop.xlane.xlu1 %2351 }
 0x95a   : > { %v5566_v16 = vunpack.i.h.bf16 %v5564_v63  ;;  %v5565_v5 = vunpack.i.l.bf16 %v5564_v63  ;;  %5790 = vrcp.f32 %v2352_v8 }
 0x95c   : > { %v5172_v44 = vpack.c.bf16 %v5566_v16, %v5565_v5 }
 0x95d   : > { %v2350_v1 = vpop.xlane.xlu1 %2349  ;;  %v5574_v18 = vpop.permute.xlu0 %5573 }
 0x95e   : > { %5792 = vrcp.f32 %v2350_v1  ;;  %5173 = vmatprep.subr.bf16.mxu0 %v5172_v44  ;;  %5212 = vmatprep.subr.bf16.mxu1 %v5172_v44  ;;  %v5576_v25 = vunpack.i.h.bf16 %v5574_v18  ;;  %v5575_v55 = vunpack.i.l.bf16 %v5574_v18 }
 0x95f   : > { %5220 = vmatpush3.bf16.msra.mxu1 %v5172_v44 }
 0x960   : > { %v5180_v41 = vpack.c.bf16 %v5576_v25, %v5575_v55 }
 0x961   : > { %v2727_v2 = vpop.permute.xlu1 %2726  ;;  %v5584_v51 = vpop.permute.xlu0 %5583 }
 0x962   : > { %v5586_v56 = vunpack.i.h.bf16 %v5584_v51  ;;  %v5585_v61 = vunpack.i.l.bf16 %v5584_v51 }
 0x964   : > { %v5791_v20 = vpop.eup %5790  ;;  %v5188_v15 = vpack.c.bf16 %v5586_v56, %v5585_v61 }
 0x965   : > { %v2384_v49 = vmul.f32 %v5791_v20, %v2352_v8  ;;  %v2729_v42 = vpop.permute.xlu1 %2728 }
 0x967   : > { %v2400_v54 = vsub.f32 2.0, %v2384_v49 }
 0x968   : > { %v5793_v59 = vpop.eup %5792 }
 0x969   : > { %v2383_v13 = vmul.f32 %v5793_v59, %v2350_v1  ;;  %v2731_v17 = vpop.permute.xlu1 %2730  ;;  %v2416_v23 = vmul.f32 %v5791_v20, %v2400_v54 }
 0x96b   : > { %v2399_v32 = vsub.f32 2.0, %v2383_v13  ;;  %v2432_v43 = vmul.f32 %v6995_v26, %v2416_v23 }
 0x96d   : > { %v2735_v21 = vpop.permute.xlu1 %2734  ;;  %v2415_v40 = vmul.f32 %v5793_v59, %v2399_v32  ;;  %3994 = vst [vmem:[%s6423_s16 + $0x178] sm:$0xff] %v2432_v43 }
 0x96f   : > { %v2431_v6 = vmul.f32 %v7000_v10, %v2415_v40 }
 0x971   : > { %3993 = vst [vmem:[%s6423_s16 + $0x170] sm:$0xff] %v2431_v6  ;;  %4729 = vmatprep.mubr.f32.mxu0 %v2431_v6  ;;  %v2739_v19 = vpop.permute.xlu1 %2738 }
 0x972   : > { %4730 = vmatmul.mubr.f32.gmra.mrb[62].mxu0 %v2432_v43 }
 0x973   : > { %4764 = vmatprep.mubr.msk.f32.mxu0 %vm535_vm1, %v2725_v3 }
 0x975   : > { %v2743_v45 = vpop.permute.xlu1 %2742 }
 0x976   : > { %4765 = vmatmul.mubr.msk.f32.vlgmr.msra.gmra.mrb[64].mxu0 %vm535_vm1, %v2727_v2 }
 0x977   : > { %5175 = vmatpush3.bf16.msra.mxu0 %v5172_v44  ;;  %4767 = vmatprep.mubr.msk.f32.mxu0 %vm535_vm1, %v2729_v42 }
 0x979   : > { %v2747_v60 = vpop.permute.xlu1 %2746 }
 0x97a   : > { %4768 = vmatmul.mubr.msk.f32.gmra.mrb[66].mxu0 %vm535_vm1, %v2731_v17 }
 0x97b   : > { %4770 = vmatprep.mubr.msk.f32.mxu0 %vm535_vm1, %v7085_v12 }
 0x97d   : > { %v2751_v26 = vpop.permute.xlu1 %2750 }
 0x97e   : > { %4771 = vmatmul.mubr.msk.f32.gmra.mrb[68].mxu0 %vm535_vm1, %v2735_v21 }
 0x97f   : > { %4773 = vmatprep.mubr.msk.f32.mxu0 %vm535_vm1, %v2737_v47 }
 0x981   : > { %v2755_v10 = vpop.permute.xlu1 %2754 }
 0x982   : > { %4774 = vmatmul.mubr.msk.f32.gmra.mrb[70].mxu0 %vm535_vm1, %v2739_v19 }
 0x983   : > { %4776 = vmatprep.mubr.msk.f32.mxu0 %vm535_vm1, %v2741_v33 }
 0x985   : > { %v5569_v11 = vpop.permute.xlu1 %5568 }
 0x986   : > { %v5571_v0 = vunpack.i.h.bf16 %v5569_v11  ;;  %v5570_v22 = vunpack.i.l.bf16 %v5569_v11  ;;  %4777 = vmatmul.mubr.msk.f32.gmra.mrb[72].mxu0 %vm535_vm1, %v2743_v45 }
 0x987   : > { %4779 = vmatprep.mubr.msk.f32.mxu0 %vm535_vm1, %v2745_v34 }
 0x988   : > { %v5176_v35 = vpack.c.bf16 %v5571_v0, %v5570_v22 }
 0x989   : > { %v5579_v36 = vpop.permute.xlu1 %5578 }
 0x98a   : > { %4780 = vmatmul.mubr.msk.f32.gmra.mrb[74].mxu0 %vm535_vm1, %v2747_v60  ;;  %5177 = vmatprep.subr.bf16.mxu0 %v5176_v35  ;;  %v5581_v4 = vunpack.i.h.bf16 %v5579_v36  ;;  %v5580_v46 = vunpack.i.l.bf16 %v5579_v36 }
 0x98b   : > { %5213 = vmatprep.subr.bf16.mxu1 %v5176_v35  ;;  %4782 = vmatprep.mubr.msk.f32.mxu0 %vm535_vm1, %v7102_v28 }
 0x98c   : > { %5179 = vmatpush3.bf16.msra.mxu0 %v5176_v35  ;;  %5221 = vmatpush3.bf16.msra.mxu1 %v5176_v35  ;;  %v5184_v12 = vpack.c.bf16 %v5581_v4, %v5580_v46 }
 0x98d   : > { %5181 = vmatprep.subr.bf16.mxu0 %v5180_v41  ;;  %5214 = vmatprep.subr.bf16.mxu1 %v5180_v41 }
 0x98e   : > { %4783 = vmatmul.mubr.msk.f32.gmra.mrb[76].mxu0 %vm535_vm1, %v2751_v26 }
 0x98f   : > { %4785 = vmatprep.mubr.msk.f32.mxu0 %vm535_vm1, %v7104_v39 }
 0x990   : > { %5183 = vmatpush3.bf16.msra.mxu0 %v5180_v41  ;;  %5222 = vmatpush3.bf16.msra.mxu1 %v5180_v41 }
 0x991   : > { %5185 = vmatprep.subr.bf16.mxu0 %v5184_v12  ;;  %5215 = vmatprep.subr.bf16.mxu1 %v5184_v12 }
 0x992   : > { %4786 = vmatmul.mubr.msk.f32.gmra.mrb[78].mxu0 %vm535_vm1, %v2755_v10 }
 0x994   : > { %5187 = vmatpush3.bf16.msra.mxu0 %v5184_v12  ;;  %5223 = vmatpush3.bf16.msra.mxu1 %v5184_v12 }
 0x995   : > { %5189 = vmatprep.subr.bf16.mxu0 %v5188_v15  ;;  %5216 = vmatprep.subr.bf16.mxu1 %v5188_v15 }
 0x998   : > { %5191 = vmatpush3.bf16.msra.mxu0 %v5188_v15  ;;  %5224 = vmatpush3.bf16.msra.mxu1 %v5188_v15 }
 0x9c4   : > { %v7129_v24 = vpop.f32.mrb[48].mxu0 }
 0x9c5   : > { %v7131_v27 = vpop.f32.mrb[49].mxu0 }
 0x9fd   : > { %v7133_v9 = vpop.f32.mrb[50].mxu0 }
 0x9fe   : > { %v7135_v57 = vpop.f32.mrb[51].mxu0 }
 0xa05   : > { %v7137_v38 = vpop.f32.mrb[52].mxu0 }
 0xa06   : > { %v7139_v47 = vpop.f32.mrb[53].mxu0 }
 0xa0d   : > { %v7141_v31 = vpop.f32.mrb[54].mxu0 }
 0xa0e   : > { %v7143_v52 = vpop.f32.mrb[55].mxu0 }
 0xa15   : > { %v7145_v48 = vpop.f32.mrb[56].mxu0 }
 0xa16   : > { %v7147_v33 = vpop.f32.mrb[57].mxu0 }
 0xa19   : > { %v7149_v29 = vpop.f32.mrb[58].mxu0 }
 0xa1a   : > { %v7151_v37 = vpop.f32.mrb[59].mxu0 }
 0xa21   : > { %v7153_v34 = vpop.f32.mrb[60].mxu0 }
 0xa22   : > { %v7155_v28 = vpop.f32.mrb[61].mxu0 }
 0xa45   : > { %v7157_v3 = vpop.f32.mrb[62].mxu0 }
 0xa46   : > { %v7159_v39 = vpop.f32.mrb[63].mxu0 }
 0xa49   : > { %v4766_v63 = vpop.f32.mrb[64].mxu0 }
 0xa4a   : > { %v2998_v8 = vsel %vm486_vm3, %v4766_v63, -1e+30  ;;  %v2918_v16 = vpop.f32.mrb[65].mxu0 }
 0xa4b   : > { %v2997_v5 = vsel %vm486_vm3, %v2918_v16, -1e+30  ;;  %3015 = vmax.xlane.f32.xlu1 %v2998_v8 }
 0xa4c   : > { %3013 = vmax.xlane.f32.xlu0 %v2997_v5 }
 0xa4d   : > { %v4769_v44 = vpop.f32.mrb[66].mxu0 }
 0xa4e   : > { %v3000_v1 = vsel %vm486_vm3, %v4769_v44, -1e+30  ;;  %v2928_v2 = vpop.f32.mrb[67].mxu0 }
 0xa4f   : > { %v2999_v42 = vsel %vm486_vm3, %v2928_v2, -1e+30 }
 0xa50   : > { %3019 = vmax.xlane.f32.xlu0 %v3000_v1 }
 0xa51   : > { %v4772_v20 = vpop.f32.mrb[68].mxu0 }
 0xa52   : > { %v2938_v49 = vpop.f32.mrb[69].mxu0  ;;  %v3002_v17 = vsel %vm486_vm3, %v4772_v20, -1e+30 }
 0xa53   : > { %v3001_v54 = vsel %vm486_vm3, %v2938_v49, -1e+30 }
 0xa54   : > { %3017 = vmax.xlane.f32.xlu0 %v2999_v42  ;;  %3021 = vmax.xlane.f32.xlu1 %v3001_v54 }
 0xa55   : > { %v4775_v59 = vpop.f32.mrb[70].mxu0 }
 0xa56   : > { %v2948_v13 = vpop.f32.mrb[71].mxu0  ;;  %v3004_v21 = vsel %vm486_vm3, %v4775_v59, -1e+30 }
 0xa57   : > { %v7175_v23 = vsel %vm486_vm3, %v2948_v13, -1e+30 }
 0xa58   : > { %3023 = vmax.xlane.f32.xlu0 %v3002_v17  ;;  %3025 = vmax.xlane.f32.xlu1 %v7175_v23 }
 0xa59   : > { %v4778_v32 = vpop.f32.mrb[72].mxu0 }
 0xa5a   : > { %v2958_v43 = vpop.f32.mrb[73].mxu0  ;;  %v7187_v45 = vsel %vm486_vm3, %v4778_v32, -1e+30 }
 0xa5b   : > { %v7182_v40 = vsel %vm486_vm3, %v2958_v43, -1e+30 }
 0xa5c   : > { %3027 = vmax.xlane.f32.xlu0 %v3004_v21  ;;  %3029 = vmax.xlane.f32.xlu1 %v7182_v40 }
 0xa5d   : > { %v4781_v6 = vpop.f32.mrb[74].mxu0 }
 0xa5e   : > { %v2968_v19 = vpop.f32.mrb[75].mxu0  ;;  %v7197_v18 = vsel %vm486_vm3, %v4781_v6, -1e+30 }
 0xa5f   : > { %v7191_v60 = vsel %vm486_vm3, %v2968_v19, -1e+30 }
 0xa60   : > { %3031 = vmax.xlane.f32.xlu0 %v7187_v45  ;;  %3033 = vmax.xlane.f32.xlu1 %v7191_v60 }
 0xa61   : > { %v4784_v26 = vpop.f32.mrb[76].mxu0 }
 0xa62   : > { %v2978_v10 = vpop.f32.mrb[77].mxu0  ;;  %v7204_v25 = vsel %vm486_vm3, %v4784_v26, -1e+30 }
 0xa63   : > { %v3009_v11 = vsel %vm486_vm3, %v2978_v10, -1e+30 }
 0xa64   : > { %3035 = vmax.xlane.f32.xlu0 %v7197_v18  ;;  %3037 = vmax.xlane.f32.xlu1 %v3009_v11 }
 0xa65   : > { %v4787_v0 = vpop.f32.mrb[78].mxu0 }
 0xa66   : > { %v2988_v22 = vpop.f32.mrb[79].mxu0  ;;  %v7214_v35 = vsel %vm486_vm3, %v4787_v0, -1e+30 }
 0xa67   : > { %v7208_v55 = vsel %vm486_vm3, %v2988_v22, -1e+30 }
 0xa68   : > { %3039 = vmax.xlane.f32.xlu0 %v7204_v25  ;;  %3041 = vmax.xlane.f32.xlu1 %v7208_v55 }
 0xa6c   : > { %3043 = vmax.xlane.f32.xlu0 %v7214_v35 }
 0xa82   : > { %5588 = vrot.lane.b32.xlu0 %v6138_v53, %s5932_s9 }
 0xad8   : > { %v3016_v36 = vpop.xlane.xlu1 %3015 }
 0xad9   : > { %v3046_v41 = vsub.f32 %v2998_v8, %v3016_v36  ;;  %v3014_v4 = vpop.xlane.xlu0 %3013 }
 0xada   : > { %v3045_v46 = vsub.f32 %v2997_v5, %v3014_v4 }
 0xadb   : > { %v3063_v51 = vmul.f32 1.442695, %v3046_v41 }
 0xadc   : > { %v3061_v56 = vmul.f32 1.442695, %v3045_v46 }
 0xadd   : > { %5794 = vpow2.f32 %v3063_v51  ;;  %v3020_v61 = vpop.xlane.xlu0 %3019 }
 0xade   : > { %v3048_v12 = vsub.f32 %v3000_v1, %v3020_v61  ;;  %5796 = vpow2.f32 %v3061_v56 }
 0xae0   : > { %v3067_v15 = vmul.f32 1.442695, %v3048_v12 }
 0xae1   : > { %v3018_v63 = vpop.xlane.xlu0 %3017  ;;  %v3022_v30 = vpop.xlane.xlu1 %3021 }
 0xae2   : > { %5798 = vpow2.f32 %v3067_v15  ;;  %v3047_v16 = vsub.f32 %v2999_v42, %v3018_v63  ;;  %v3049_v2 = vsub.f32 %v3001_v54, %v3022_v30 }
 0xae4   : > { %v3065_v44 = vmul.f32 1.442695, %v3047_v16  ;;  %v3069_v59 = vmul.f32 1.442695, %v3049_v2 }
 0xae5   : > { %v3024_v20 = vpop.xlane.xlu0 %3023  ;;  %v3026_v49 = vpop.xlane.xlu1 %3025 }
 0xae6   : > { %5800 = vpow2.f32 %v3065_v44  ;;  %v3050_v53 = vsub.f32 %v3002_v17, %v3024_v20  ;;  %v3051_v32 = vsub.f32 %v7175_v23, %v3026_v49 }
 0xae7   : > { %v7219_v8 = vpop.eup %5794 }
 0xae8   : > { %v3071_v5 = vmul.f32 1.442695, %v3050_v53  ;;  %3095 = vadd.xlane.f32.xlu1 %v7219_v8  ;;  %v7223_v6 = vpop.eup %5796  ;;  %v3073_v26 = vmul.f32 1.442695, %v3051_v32 }
 0xae9   : > { %v3028_v13 = vpop.xlane.xlu0 %3027  ;;  %v3030_v1 = vpop.xlane.xlu1 %3029 }
 0xaea   : > { %5802 = vpow2.f32 %v3071_v5  ;;  %v3052_v43 = vsub.f32 %v3004_v21, %v3028_v13  ;;  %v3053_v22 = vsub.f32 %v7182_v40, %v3030_v1 }
 0xaeb   : > { %5804 = vpow2.f32 %v3069_v59 }
 0xaec   : > { %v7225_v42 = vpop.eup %5798  ;;  %v3075_v54 = vmul.f32 1.442695, %v3052_v43  ;;  %3093 = vadd.xlane.f32.xlu1 %v7223_v6  ;;  %v3077_v61 = vmul.f32 1.442695, %v3053_v22 }
 0xaed   : > { %v3032_v17 = vpop.xlane.xlu0 %3031  ;;  %v3034_v19 = vpop.xlane.xlu1 %3033  ;;  %3099 = vadd.xlane.f32.xlu0 %v7225_v42 }
 0xaee   : > { %5806 = vpow2.f32 %v3075_v54  ;;  %v3054_v10 = vsub.f32 %v7187_v45, %v3032_v17  ;;  %v3055_v30 = vsub.f32 %v7191_v60, %v3034_v19 }
 0xaef   : > { %5808 = vpow2.f32 %v3073_v26 }
 0xaf0   : > { %v7230_v0 = vpop.eup %5800  ;;  %v3079_v36 = vmul.f32 1.442695, %v3054_v10  ;;  %v7612_v10 = vld [vmem:[#allocation15_spill] sm:$0xff] }
 0xaf1   : > { %v3036_v23 = vpop.xlane.xlu0 %3035  ;;  %v3038_v21 = vpop.xlane.xlu1 %3037  ;;  %3097 = vadd.xlane.f32.xlu1 %v7230_v0 }
 0xaf2   : > { %v3057_v41 = vsub.f32 %v3009_v11, %v3038_v21  ;;  %5810 = vpow2.f32 %v3079_v36  ;;  %v3056_v45 = vsub.f32 %v7197_v18, %v3036_v23 }
 0xaf4   : > { %v7234_v4 = vpop.eup %5802  ;;  %v3085_v46 = vmul.f32 1.442695, %v3057_v41  ;;  %v3083_v16 = vmul.f32 1.442695, %v3056_v45 }
 0xaf5   : > { %v3040_v51 = vpop.xlane.xlu0 %3039  ;;  %3103 = vadd.xlane.f32.xlu1 %v7234_v4  ;;  %v3042_v56 = vpop.xlane.xlu1 %3041 }
 0xaf6   : > { %v3059_v12 = vsub.f32 %v7208_v55, %v3042_v56  ;;  %v7239_v15 = vpop.eup %5804  ;;  %5812 = vpow2.f32 %v3085_v46  ;;  %v3081_v55 = vmul.f32 1.442695, %v3055_v30  ;;  %v3058_v32 = vsub.f32 %v7204_v25, %v3040_v51  ;;  %v7606_v25 = vld [vmem:[#allocation7_spill] sm:$0xff] }
 0xaf7   : > { %5814 = vpow2.f32 %v3077_v61 }
 0xaf8   : > { %v7241_v63 = vpop.eup %5806  ;;  %v3089_v40 = vmul.f32 1.442695, %v3059_v12 }
 0xaf9   : > { %3107 = vadd.xlane.f32.xlu0 %v7241_v63  ;;  %v3044_v11 = vpop.xlane.xlu0 %3043  ;;  %3101 = vadd.xlane.f32.xlu1 %v7239_v15  ;;  %v7246_v44 = vpop.eup %5808 }
 0xafa   : > { %5816 = vpow2.f32 %v3089_v40 }
 0xafb   : > { %5818 = vpow2.f32 %v3083_v16 }
 0xafc   : > { %v7249_v49 = vpop.eup %5810  ;;  %5820 = vpow2.f32 %v3081_v55 }
 0xafd   : > { %v5589_v18 = vpop.permute.xlu0 %5588  ;;  %3105 = vadd.xlane.f32.xlu1 %v7246_v44 }
 0xafe   : > { %v5591_v2 = vunpack.i.h.bf16 %v5589_v18  ;;  %v5590_v20 = vunpack.i.l.bf16 %v5589_v18 }
 0xb00   : > { %v5192_v53 = vpack.c.bf16 %v5591_v2, %v5590_v20  ;;  %v7251_v5 = vpop.eup %5812 }
 0xb01   : > { %3111 = vadd.xlane.f32.xlu1 %v7249_v49  ;;  %3117 = vadd.xlane.f32.xlu0 %v7251_v5  ;;  %v7255_v60 = vpop.eup %5814 }
 0xb02   : > { %5193 = vmatprep.subr.bf16.mxu0 %v5192_v53  ;;  %5217 = vmatprep.subr.bf16.mxu1 %v5192_v53 }
 0xb03   : > { %5195 = vmatpush3.bf16.msra.mxu0 %v5192_v53  ;;  %5225 = vmatpush3.bf16.msra.mxu1 %v5192_v53 }
 0xb04   : > { %v7257_v59 = vpop.eup %5816 }
 0xb05   : > { %3109 = vadd.xlane.f32.xlu1 %v7255_v60  ;;  %3121 = vadd.xlane.f32.xlu0 %v7257_v59  ;;  %v7261_v13 = vpop.eup %5818 }
 0xb06   : > { %v7264_v1 = vpop.eup %5820 }
 0xb09   : > { %3115 = vadd.xlane.f32.xlu1 %v7261_v13 }
 0xb0d   : > { %3113 = vadd.xlane.f32.xlu1 %v7264_v1 }
 0xb1b   : > { %5598 = vrot.lane.b32.xlu0 %v6158_v62, %s5932_s9  ;;  %v3060_v62 = vsub.f32 %v7214_v35, %v3044_v11  ;;  %v7610_v35 = vld [vmem:[#allocation11_spill] sm:$0xff] }
 0xb1e   : > { %5593 = vrot.lane.b32.xlu1 %v6148_v58, %s5932_s9  ;;  %v3087_v58 = vmul.f32 1.442695, %v3058_v32  ;;  %s5935_s9 = smov 24  }
 0xb1f   : > { %1887 = vrot.lane.b32.xlu0 %v6820_v50, %s5933_s10  ;;  %v3091_v50 = vmul.f32 1.442695, %v3060_v62 }
 0xb20   : > { %5822 = vpow2.f32 %v3087_v58 }
 0xb21   : > { %5824 = vpow2.f32 %v3091_v50 }
 0xb23   : > { %2659 = vrot.lane.b32.xlu0 %v7131_v27, %s5934_s11  ;;  %v7602_v27 = vld [vmem:[#allocation12_spill] sm:$0xff] }
 0xb27   : > { %2661 = vrot.lane.b32.xlu0 %v7129_v24, %s5934_s11  ;;  %v7601_v24 = vld [vmem:[#allocation10_spill] sm:$0xff] }
 0xb2b   : > { %1891 = vrot.lane.b32.xlu0 %v6824_v7, %s5933_s10  ;;  %v7291_v7 = vpop.eup %5822 }
 0xb2f   : > { %2663 = vrot.lane.b32.xlu0 %v7135_v57, %s5934_s11  ;;  %v7603_v57 = vld [vmem:[#allocation14_spill] sm:$0xff] }
 0xb33   : > { %1895 = vrot.lane.b32.xlu0 %v6828_v14, %s5933_s10  ;;  %v7296_v14 = vpop.eup %5824 }
 0xb37   : > { %2667 = vrot.lane.b32.xlu0 %v7139_v47, %s5934_s11  ;;  %v7604_v47 = vld [vmem:[#allocation16_spill] sm:$0xff] }
 0xb3b   : > { %1899 = vrot.lane.b32.xlu0 %v7601_v24, %s5933_s10 }
 0xb3f   : > { %2671 = vrot.lane.b32.xlu0 %v7143_v52, %s5934_s11  ;;  %v7605_v52 = vld [vmem:[#allocation6_spill] sm:$0xff] }
 0xb42   : > { %3119 = vadd.xlane.f32.xlu1 %v7291_v7 }
 0xb43   : > { %1903 = vrot.lane.b32.xlu0 %v7602_v27, %s5933_s10 }
 0xb46   : > { %3123 = vadd.xlane.f32.xlu1 %v7296_v14 }
 0xb47   : > { %2675 = vrot.lane.b32.xlu0 %v7147_v33, %s5934_s11  ;;  %v7607_v33 = vld [vmem:[#allocation18_spill] sm:$0xff] }
 0xb4b   : > { %1907 = vrot.lane.b32.xlu0 %v7603_v57, %s5933_s10 }
 0xb4f   : > { %2679 = vrot.lane.b32.xlu0 %v7151_v37, %s5934_s11  ;;  %v7608_v37 = vld [vmem:[#allocation8_spill] sm:$0xff] }
 0xb53   : > { %1911 = vrot.lane.b32.xlu0 %v7604_v47, %s5933_s10 }
 0xb57   : > { %1889 = vrot.lane.b32.xlu1 %v7605_v52, %s5933_s10  ;;  %2683 = vrot.lane.b32.xlu0 %v7155_v28, %s5934_s11  ;;  %v7609_v28 = vld [vmem:[#allocation9_spill] sm:$0xff] }
 0xb5b   : > { %1893 = vrot.lane.b32.xlu1 %v7606_v25, %s5933_s10  ;;  %1915 = vrot.lane.b32.xlu0 %v7607_v33, %s5933_s10 }
 0xb5f   : > { %2665 = vrot.lane.b32.xlu1 %v7133_v9, %s5934_s11  ;;  %2687 = vrot.lane.b32.xlu0 %v7159_v39, %s5934_s11 }
 0xb63   : > { %1897 = vrot.lane.b32.xlu1 %v7608_v37, %s5933_s10 }
 0xb67   : > { %2669 = vrot.lane.b32.xlu1 %v7137_v38, %s5934_s11  ;;  %v7611_v38 = vld [vmem:[#allocation13_spill] sm:$0xff] }
 0xb6b   : > { %1901 = vrot.lane.b32.xlu1 %v7609_v28, %s5933_s10 }
 0xb6f   : > { %2673 = vrot.lane.b32.xlu1 %v7141_v31, %s5934_s11 }
 0xb73   : > { %1905 = vrot.lane.b32.xlu1 %v7610_v35, %s5933_s10 }
 0xb75   : > { %v3096_v43 = vpop.xlane.xlu1 %3095 }
 0xb76   : > { %5826 = vrcp.f32 %v3096_v43 }
 0xb77   : > { %2677 = vrot.lane.b32.xlu1 %v7145_v48, %s5934_s11 }
 0xb79   : > { %v3094_v9 = vpop.xlane.xlu1 %3093 }
 0xb7a   : > { %5828 = vrcp.f32 %v3094_v9  ;;  %v3100_v39 = vpop.xlane.xlu0 %3099 }
 0xb7b   : > { %5830 = vrcp.f32 %v3100_v39  ;;  %1909 = vrot.lane.b32.xlu1 %v7611_v38, %s5933_s10 }
 0xb7e   : > { %v3098_v54 = vpop.xlane.xlu1 %3097 }
 0xb7f   : > { %5832 = vrcp.f32 %v3098_v54  ;;  %2681 = vrot.lane.b32.xlu1 %v7149_v29, %s5934_s11 }
 0xb80   : > { %v5827_v31 = vpop.eup %5826 }
 0xb81   : > { %v3142_v17 = vmul.f32 %v5827_v31, %v3096_v43 }
 0xb82   : > { %v3104_v19 = vpop.xlane.xlu1 %3103 }
 0xb83   : > { %v3158_v26 = vsub.f32 2.0, %v3142_v17  ;;  %5834 = vrcp.f32 %v3104_v19  ;;  %1913 = vrot.lane.b32.xlu1 %v7612_v10, %s5933_s10 }
 0xb84   : > { %v5829_v48 = vpop.eup %5828 }
 0xb85   : > { %v5831_v23 = vpop.eup %5830  ;;  %v3174_v21 = vmul.f32 %v5827_v31, %v3158_v26  ;;  %v3141_v22 = vmul.f32 %v5829_v48, %v3094_v9 }
 0xb86   : > { %v3144_v36 = vmul.f32 %v5831_v23, %v3100_v39  ;;  %v3108_v41 = vpop.xlane.xlu0 %3107  ;;  %v3102_v46 = vpop.xlane.xlu1 %3101 }
 0xb87   : > { %v7338_v51 = vmul.f32 %v7219_v8, %v3174_v21  ;;  %v3157_v29 = vsub.f32 2.0, %v3141_v22  ;;  %5836 = vrcp.f32 %v3108_v41  ;;  %2685 = vrot.lane.b32.xlu1 %v7153_v34, %s5934_s11  ;;  %v7613_v8 = vld [vmem:[#allocation17_spill] sm:$0xff] }
 0xb88   : > { %v3160_v56 = vsub.f32 2.0, %v3144_v36  ;;  %5838 = vrcp.f32 %v3102_v46 }
 0xb89   : > { %v5833_v61 = vpop.eup %5832  ;;  %4028 = vst [vmem:[%s6423_s16 + $0x188] sm:$0xff] %v7338_v51  ;;  %v3173_v45 = vmul.f32 %v5829_v48, %v3157_v29 }
 0xb8a   : > { %v3176_v12 = vmul.f32 %v5831_v23, %v3160_v56  ;;  %v3143_v40 = vmul.f32 %v5833_v61, %v3098_v54  ;;  %v3106_v11 = vpop.xlane.xlu1 %3105 }
 0xb8b   : > { %5840 = vrcp.f32 %v3106_v11  ;;  %1917 = vrot.lane.b32.xlu1 %v7613_v8, %s5933_s10  ;;  %v3189_v30 = vmul.f32 %v7223_v6, %v3173_v45 }
 0xb8c   : > { %v3159_v16 = vsub.f32 2.0, %v3143_v40  ;;  %v7348_v18 = vmul.f32 %v7225_v42, %v3176_v12 }
 0xb8d   : > { %v5835_v34 = vpop.eup %5834  ;;  %4027 = vst [vmem:[%s6423_s16 + $0x180] sm:$0xff] %v3189_v30  ;;  %4820 = vmatprep.mubr.f32.mxu0 %v3189_v30 }
 0xb8e   : > { %v3175_v55 = vmul.f32 %v5833_v61, %v3159_v16  ;;  %v3146_v2 = vmul.f32 %v5835_v34, %v3104_v19  ;;  %v3112_v20 = vpop.xlane.xlu1 %3111  ;;  %4030 = vst [vmem:[%s6423_s16 + $0x198] sm:$0xff] %v7348_v18  ;;  %v3118_v53 = vpop.xlane.xlu0 %3117 }
 0xb8f   : > { %5842 = vrcp.f32 %v3112_v20  ;;  %2689 = vrot.lane.b32.xlu1 %v7157_v3, %s5934_s11  ;;  %s4067_s11 = sshll.u32 %s5994_s25, 13  ;;  %s5936_s25 = smov [#allocation3]  }
 0xb90   : > { %v3162_v32 = vsub.f32 2.0, %v3146_v2  ;;  %5844 = vrcp.f32 %v3118_v53  ;;  %v7356_v6 = vmul.f32 %v7230_v0, %v3175_v55  ;;  %s7486_s15 = scalar_lea.hbm %s7583_s6, %s4067_s11  ;;  %s5862_s28 = sshll.u32 %s5936_s25, 4  ;;  %s5863_s28 = int_to_ptr.vmem [resolvable:$false] %s5862_s28 }
 0xb91   : > { %v5837_v42 = vpop.eup %5836  ;;  %s5864_s29 = scalar_lea.vmem %s5863_s28, 16384  ;;  %p5865_p0 = scmp.lt.s32.totalorder %s7489_s19, %s5863_s28 }
 0xb92   : > { %v5839_v58 = vpop.eup %5838  ;;  %v3178_v62 = vmul.f32 %v5835_v34, %v3162_v32  ;;  %v3148_v50 = vmul.f32 %v5837_v42, %v3108_v41  ;;  %v3110_v24 = vpop.xlane.xlu1 %3109  ;;  %4029 = vst [vmem:[%s6423_s16 + $0x190] sm:$0xff] %v7356_v6  ;;  %p5866_p1 = scmp.lt.s32.totalorder %s5864_s29, %s5858_s26 }
 0xb93   : > { %v3145_v27 = vmul.f32 %v5839_v58, %v3102_v46  ;;  %v3122_v57 = vpop.xlane.xlu0 %3121  ;;  %5846 = vrcp.f32 %v3110_v24 }
 0xb94   : > { %v3164_v47 = vsub.f32 2.0, %v3148_v50  ;;  %5848 = vrcp.f32 %v3122_v57  ;;  %v7361_v3 = vmul.f32 %v7234_v4, %v3178_v62  ;;  %p5867_p2 = por %p5866_p1, %p5865_p0 }
 0xb95   : > { %v5841_v52 = vpop.eup %5840  ;;  %v3161_v0 = vsub.f32 2.0, %v3145_v27 }
 0xb96   : > { %v3180_v25 = vmul.f32 %v5837_v42, %v3164_v47  ;;  %v3147_v33 = vmul.f32 %v5841_v52, %v3106_v11  ;;  %v3116_v37 = vpop.xlane.xlu1 %3115  ;;  %4032 = vst [vmem:[%s6423_s16 + $0x1a8] sm:$0xff] %v7361_v3  ;;  %p5868_p3 = pnand %p5867_p2, %p5861_p13 }
 0xb97   : > { %v3177_v28 = vmul.f32 %v5839_v58, %v3161_v0  ;;  %v5599_v35 = vpop.permute.xlu0 %5598  ;;  %5850 = vrcp.f32 %v3116_v37 }
 0xb98   : > { %v7366_v43 = vmul.f32 %v7241_v63, %v3180_v25  ;;  %v3163_v9 = vsub.f32 2.0, %v3147_v33  ;;  %v5601_v36 = vunpack.i.h.bf16 %v5599_v35  ;;  %v5600_v41 = vunpack.i.l.bf16 %v5599_v35 }
 0xb99   : > { %v5843_v39 = vpop.eup %5842  ;;  %v7369_v4 = vmul.f32 %v7239_v15, %v3177_v28 }
 0xb9a   : > { %v5845_v38 = vpop.eup %5844  ;;  %4034 = vst [vmem:[%s6423_s16 + $0x1b8] sm:$0xff] %v7366_v43  ;;  %v3179_v54 = vmul.f32 %v5841_v52, %v3163_v9  ;;  %v3150_v31 = vmul.f32 %v5843_v39, %v3112_v20  ;;  %v3114_v17 = vpop.xlane.xlu1 %3113  ;;  %v5200_v20 = vpack.c.bf16 %v5601_v36, %v5600_v41 }
 0xb9b   : > { %v3153_v19 = vmul.f32 %v5845_v38, %v3118_v53  ;;  %v1888_v26 = vpop.permute.xlu0 %1887  ;;  %5852 = vrcp.f32 %v3114_v17  ;;  %4031 = vst [vmem:[%s6423_s16 + $0x1a0] sm:$0xff] %v7369_v4 }
 0xb9c   : > { %v3166_v63 = vsub.f32 2.0, %v3150_v31  ;;  %1936 = vst.msk [vmem:[#allocation2] sm:$0xff] %vm1935_vm4, %v1888_v26  ;;  %v3195_v10 = vmul.f32 %v7246_v44, %v3179_v54 }
 0xb9d   : > { %v5847_v48 = vpop.eup %5846  ;;  %v3169_v15 = vsub.f32 2.0, %v3153_v19 }
 0xb9e   : > { %v5849_v23 = vpop.eup %5848  ;;  %v3182_v21 = vmul.f32 %v5843_v39, %v3166_v63  ;;  %v3149_v22 = vmul.f32 %v5847_v48, %v3110_v24  ;;  %4033 = vst [vmem:[%s6423_s16 + $0x1b0] sm:$0xff] %v3195_v10  ;;  %4829 = vmatprep.mubr.f32.mxu1 %v3195_v10  ;;  %v5594_v46 = vpop.permute.xlu1 %5593 }
 0xb9f   : > { %v3185_v29 = vmul.f32 %v5845_v38, %v3169_v15  ;;  %v3155_v56 = vmul.f32 %v5849_v23, %v3122_v57  ;;  %v2660_v61 = vpop.permute.xlu0 %2659  ;;  %v5596_v45 = vunpack.i.h.bf16 %v5594_v46  ;;  %v5595_v12 = vunpack.i.l.bf16 %v5594_v46 }
 0xba0   : > { %v3165_v40 = vsub.f32 2.0, %v3149_v22  ;;  %2708 = vst.msk [vmem:[#allocation2] sm:$0xff] %vm2707_vm5, %v2660_v61  ;;  %v3198_v44 = vmul.f32 %v7249_v49, %v3182_v21 }
 0xba1   : > { %v5851_v11 = vpop.eup %5850  ;;  %v3171_v8 = vsub.f32 2.0, %v3155_v56  ;;  %v5196_v30 = vpack.c.bf16 %v5596_v45, %v5595_v12  ;;  %v3201_v16 = vmul.f32 %v7251_v5, %v3185_v29  ;;  %v3512_v45 = vld [vmem:[%s7580_s3] sm:$0xff]  ;;  %v3513_v12 = vld [vmem:[%s7580_s3 + $0x8] sm:$0xff] }
 0xba2   : > { %v3181_v34 = vmul.f32 %v5847_v48, %v3165_v40  ;;  %v3152_v55 = vmul.f32 %v5851_v11, %v3116_v37  ;;  %4036 = vst [vmem:[%s6423_s16 + $0x1c8] sm:$0xff] %v3198_v44  ;;  %v5204_v40 = vpack.c.bf16 %v3513_v12, %v3512_v45 }
 0xba3   : > { %v3187_v2 = vmul.f32 %v5849_v23, %v3171_v8  ;;  %v7382_v53 = vpop.permute.xlu0 %2661  ;;  %5197 = vmatprep.subr.bf16.mxu0 %v5196_v30  ;;  %5218 = vmatprep.subr.bf16.mxu1 %v5196_v30  ;;  %4039 = vst [vmem:[%s6423_s16 + $0x1e0] sm:$0xff] %v3201_v16 }
 0xba4   : > { %v3168_v32 = vsub.f32 2.0, %v3152_v55  ;;  %5199 = vmatpush3.bf16.msra.mxu0 %v5196_v30  ;;  %5226 = vmatpush3.bf16.msra.mxu1 %v5196_v30  ;;  %v3197_v49 = vmul.f32 %v7255_v60, %v3181_v34 }
 0xba5   : > { %v5853_v42 = vpop.eup %5852  ;;  %5201 = vmatprep.subr.bf16.mxu0 %v5200_v20  ;;  %5219 = vmatprep.subr.bf16.mxu1 %v5200_v20  ;;  %v7387_v5 = vmul.f32 %v7257_v59, %v3187_v2 }
 0xba6   : > { %v3184_v58 = vmul.f32 %v5851_v11, %v3168_v32  ;;  %v3151_v62 = vmul.f32 %v5853_v42, %v3114_v17  ;;  %4035 = vst [vmem:[%s6423_s16 + $0x1c0] sm:$0xff] %v3197_v49  ;;  %v3515_v11 = vld [vmem:[%s7580_s3 + $0x18] sm:$0xff] }
 0xba7   : > { %v1892_v50 = vpop.permute.xlu0 %1891  ;;  %4041 = vst [vmem:[%s6423_s16 + $0x1f0] sm:$0xff] %v7387_v5 }
 0xba8   : > { %v3167_v24 = vsub.f32 2.0, %v3151_v62  ;;  %1938 = vst.msk [vmem:[#allocation2 + $0x10] sm:$0xff] %vm1935_vm4, %v1892_v50  ;;  %5203 = vmatpush3.bf16.msra.mxu0 %v5200_v20  ;;  %5227 = vmatpush3.bf16.msra.mxu1 %v5200_v20  ;;  %v3200_v60 = vmul.f32 %v7261_v13, %v3184_v58 }
 0xba9   : > { %5205 = vmatprep.subr.bf16.mxu1 %v5204_v40 }
 0xbaa   : > { %v3183_v27 = vmul.f32 %v5853_v42, %v3167_v24  ;;  %4038 = vst [vmem:[%s6423_s16 + $0x1d8] sm:$0xff] %v3200_v60 }
 0xbab   : > { %v2664_v57 = vpop.permute.xlu0 %2663  ;;  %4821 = vmatmul.mubr.f32.vlgmr.msra.gmra.mrb[80].mxu0 %v7338_v51  ;;  %4830 = vmatmul.mubr.f32.vlgmr.msra.gmra.mrb[48].mxu1 %v7366_v43 }
 0xbac   : > { %2710 = vst.msk [vmem:[#allocation2 + $0x10] sm:$0xff] %vm2707_vm5, %v2664_v57  ;;  %4823 = vmatprep.mubr.f32.mxu0 %v7356_v6  ;;  %4832 = vmatprep.mubr.f32.mxu1 %v3197_v49  ;;  %v3199_v59 = vmul.f32 %v7264_v1, %v3183_v27 }
 0xbad   : > { %5207 = vmatpush3.bf16.msra.mxu1 %v5204_v40 }
 0xbae   : > { %4037 = vst [vmem:[%s6423_s16 + $0x1d0] sm:$0xff] %v3199_v59 }
 0xbaf   : > { %v1896_v47 = vpop.permute.xlu0 %1895  ;;  %4824 = vmatmul.mubr.f32.gmra.mrb[82].mxu0 %v7348_v18  ;;  %4833 = vmatmul.mubr.f32.gmra.mrb[50].mxu1 %v3198_v44  ;;  %v3514_v44 = vld [vmem:[%s7580_s3 + $0x10] sm:$0xff] }
 0xbb0   : > { %1940 = vst.msk [vmem:[#allocation2 + $0x20] sm:$0xff] %vm1935_vm4, %v1896_v47  ;;  %4826 = vmatprep.mubr.f32.mxu0 %v7369_v4  ;;  %4835 = vmatprep.mubr.f32.mxu1 %v3199_v59  ;;  %v5208_v8 = vpack.c.bf16 %v3515_v11, %v3514_v44 }
 0xbb2   : > { %5209 = vmatprep.subr.bf16.mxu1 %v5208_v8 }
 0xbb3   : > { %v2668_v13 = vpop.permute.xlu0 %2667  ;;  %4827 = vmatmul.mubr.f32.gmra.mrb[84].mxu0 %v7361_v3  ;;  %4836 = vmatmul.mubr.f32.gmra.mrb[52].mxu1 %v3200_v60 }
 0xbb4   : > { %2712 = vst.msk [vmem:[#allocation2 + $0x20] sm:$0xff] %vm2707_vm5, %v2668_v13  ;;  %4838 = vmatprep.mubr.f32.mxu1 %v3201_v16  ;;  %5211 = vmatpush3.bf16.msra.mxu1 %v5208_v8 }
 0xbb7   : > { %v1900_v51 = vpop.permute.xlu0 %1899 }
 0xbb8   : > { %1942 = vst.msk [vmem:[#allocation2 + $0x30] sm:$0xff] %vm1935_vm4, %v1900_v51 }
 0xbbb   : > { %v2672_v1 = vpop.permute.xlu0 %2671 }
 0xbbc   : > { %2714 = vst.msk [vmem:[#allocation2 + $0x30] sm:$0xff] %vm2707_vm5, %v2672_v1 }
 0xbbf   : > { %v1904_v18 = vpop.permute.xlu0 %1903 }
 0xbc0   : > { %1944 = vst.msk [vmem:[#allocation2 + $0x40] sm:$0xff] %vm1935_vm4, %v1904_v18 }
 0xbc3   : > { %v2676_v6 = vpop.permute.xlu0 %2675 }
 0xbc4   : > { %2716 = vst.msk [vmem:[#allocation2 + $0x40] sm:$0xff] %vm2707_vm5, %v2676_v6 }
 0xbc7   : > { %v1908_v52 = vpop.permute.xlu0 %1907 }
 0xbc8   : > { %1946 = vst.msk [vmem:[#allocation2 + $0x50] sm:$0xff] %vm1935_vm4, %v1908_v52 }
 0xbcb   : > { %v2680_v3 = vpop.permute.xlu0 %2679 }
 0xbcc   : > { %2718 = vst.msk [vmem:[#allocation2 + $0x50] sm:$0xff] %vm2707_vm5, %v2680_v3 }
 0xbcf   : > { %v1912_v0 = vpop.permute.xlu0 %1911  ;;  %v3120_v25 = vpop.xlane.xlu1 %3119 }
 0xbd0   : > { %1948 = vst.msk [vmem:[#allocation2 + $0x60] sm:$0xff] %vm1935_vm4, %v1912_v0  ;;  %5854 = vrcp.f32 %v3120_v25 }
 0xbd3   : > { %v2684_v33 = vpop.permute.xlu0 %2683  ;;  %v3124_v37 = vpop.xlane.xlu1 %3123 }
 0xbd4   : > { %2720 = vst.msk [vmem:[#allocation2 + $0x60] sm:$0xff] %vm2707_vm5, %v2684_v33  ;;  %5856 = vrcp.f32 %v3124_v37 }
 0xbd7   : > { %v1916_v28 = vpop.permute.xlu0 %1915  ;;  %v1890_v35 = vpop.permute.xlu1 %1889 }
 0xbd8   : > { %1950 = vst.msk [vmem:[#allocation2 + $0x70] sm:$0xff] %vm1935_vm4, %v1916_v28  ;;  %1937 = vst.msk [vmem:[#allocation2 + $0x8] sm:$0xff] %vm1935_vm4, %v1890_v35 }
 0xbd9   : > { %2709 = vst.msk [vmem:[#allocation2 + $0x8] sm:$0xff] %vm2707_vm5, %v7382_v53 }
 0xbda   : > { %v5855_v43 = vpop.eup %5854 }
 0xbdb   : > { %v3154_v9 = vmul.f32 %v5855_v43, %v3120_v25  ;;  %v2688_v39 = vpop.permute.xlu0 %2687  ;;  %v1894_v4 = vpop.permute.xlu1 %1893 }
 0xbdc   : > { %2722 = vst.msk [vmem:[#allocation2 + $0x70] sm:$0xff] %vm2707_vm5, %v2688_v39 }
 0xbdd   : > { %1939 = vst.msk [vmem:[#allocation2 + $0x18] sm:$0xff] %vm1935_vm4, %v1894_v4  ;;  %v3170_v38 = vsub.f32 2.0, %v3154_v9 }
 0xbde   : > { %v5857_v54 = vpop.eup %5856 }
 0xbdf   : > { %v3186_v31 = vmul.f32 %v5855_v43, %v3170_v38  ;;  %v3156_v17 = vmul.f32 %v5857_v54, %v3124_v37  ;;  %v2666_v19 = vpop.permute.xlu1 %2665 }
 0xbe0   : > { %2711 = vst.msk [vmem:[#allocation2 + $0x18] sm:$0xff] %vm2707_vm5, %v2666_v19 }
 0xbe1   : > { %v3172_v26 = vsub.f32 2.0, %v3156_v17  ;;  %v3202_v63 = vmul.f32 %v7291_v7, %v3186_v31 }
 0xbe3   : > { %v3188_v10 = vmul.f32 %v5857_v54, %v3172_v26  ;;  %v1898_v48 = vpop.permute.xlu1 %1897  ;;  %4040 = vst [vmem:[%s6423_s16 + $0x1e8] sm:$0xff] %v3202_v63  ;;  %4839 = vmatmul.mubr.f32.gmra.mrb[54].mxu1 %v3202_v63 }
 0xbe4   : > { %1941 = vst.msk [vmem:[#allocation2 + $0x28] sm:$0xff] %vm1935_vm4, %v1898_v48  ;;  %4841 = vmatprep.mubr.f32.mxu1 %v7387_v5 }
 0xbe5   : > { %v3204_v15 = vmul.f32 %v7296_v14, %v3188_v10 }
 0xbe7   : > { %v2670_v23 = vpop.permute.xlu1 %2669  ;;  %4042 = vst [vmem:[%s6423_s16 + $0x1f8] sm:$0xff] %v3204_v15  ;;  %4842 = vmatmul.mubr.f32.gmra.mrb[56].mxu1 %v3204_v15 }
 0xbe8   : > { %2713 = vst.msk [vmem:[#allocation2 + $0x28] sm:$0xff] %vm2707_vm5, %v2670_v23 }
 0xbeb   : > { %v1902_v21 = vpop.permute.xlu1 %1901 }
 0xbec   : > { %1943 = vst.msk [vmem:[#allocation2 + $0x38] sm:$0xff] %vm1935_vm4, %v1902_v21 }
 0xbef   : > { %v2674_v22 = vpop.permute.xlu1 %2673 }
 0xbf0   : > { %2715 = vst.msk [vmem:[#allocation2 + $0x38] sm:$0xff] %vm2707_vm5, %v2674_v22 }
 0xbf3   : > { %v1906_v7 = vpop.permute.xlu1 %1905 }
 0xbf4   : > { %1945 = vst.msk [vmem:[#allocation2 + $0x48] sm:$0xff] %vm1935_vm4, %v1906_v7 }
 0xbf7   : > { %v2678_v36 = vpop.permute.xlu1 %2677 }
 0xbf8   : > { %2717 = vst.msk [vmem:[#allocation2 + $0x48] sm:$0xff] %vm2707_vm5, %v2678_v36 }
 0xbfb   : > { %v1910_v41 = vpop.permute.xlu1 %1909 }
 0xbfc   : > { %1947 = vst.msk [vmem:[#allocation2 + $0x58] sm:$0xff] %vm1935_vm4, %v1910_v41 }
 0xbff   : > { %v2682_v14 = vpop.permute.xlu1 %2681 }
 0xc00   : > { %2719 = vst.msk [vmem:[#allocation2 + $0x58] sm:$0xff] %vm2707_vm5, %v2682_v14 }
 0xc03   : > { %v1914_v46 = vpop.permute.xlu1 %1913 }
 0xc04   : > { %1949 = vst.msk [vmem:[#allocation2 + $0x68] sm:$0xff] %vm1935_vm4, %v1914_v46 }
 0xc07   : > { %v2686_v29 = vpop.permute.xlu1 %2685 }
 0xc08   : > { %2721 = vst.msk [vmem:[#allocation2 + $0x68] sm:$0xff] %vm2707_vm5, %v2686_v29 }
 0xc0b   : > { %v1918_v56 = vpop.permute.xlu1 %1917 }
 0xc0c   : > { %1951 = vst.msk [vmem:[#allocation2 + $0x78] sm:$0xff] %vm1935_vm4, %v1918_v56 }
 0xc0f   : > { %v2690_v61 = vpop.permute.xlu1 %2689 }
 0xc10   : > { %2723 = vst.msk [vmem:[#allocation2 + $0x78] sm:$0xff] %vm2707_vm5, %v2690_v61 }
 0xc7e   : > { %v4822_v30 = vpop.f32.mrb[80].mxu0  ;;  %v4831_v16 = vpop.f32.mrb[48].mxu1 }
 0xc7f   : > { %v3366_v34 = vpop.f32.mrb[49].mxu1  ;;  %3433 = vrot.lane.b32.xlu0 %v4822_v30, %s5935_s9  ;;  %v3336_v55 = vpop.f32.mrb[81].mxu0 }
 0xc82   : > { %v4825_v2 = vpop.f32.mrb[82].mxu0  ;;  %v4834_v20 = vpop.f32.mrb[50].mxu1 }
 0xc83   : > { %v3376_v53 = vpop.f32.mrb[51].mxu1  ;;  %3431 = vrot.lane.b32.xlu0 %v3336_v55, %s5935_s9  ;;  %3437 = vrot.lane.b32.xlu1 %v4825_v2, %s5935_s9  ;;  %v3346_v32 = vpop.f32.mrb[83].mxu0 }
 0xc86   : > { %v4828_v49 = vpop.f32.mrb[84].mxu0  ;;  %v4837_v42 = vpop.f32.mrb[52].mxu1 }
 0xc87   : > { %v3386_v5 = vpop.f32.mrb[53].mxu1  ;;  %3435 = vrot.lane.b32.xlu0 %v3346_v32, %s5935_s9  ;;  %3441 = vrot.lane.b32.xlu1 %v4828_v49, %s5935_s9  ;;  %v3356_v58 = vpop.f32.mrb[85].mxu0 }
 0xc8b   : > { %3445 = vrot.lane.b32.xlu1 %v4831_v16, %s5935_s9  ;;  %3439 = vrot.lane.b32.xlu0 %v3356_v58, %s5935_s9 }
 0xc8f   : > { %3449 = vrot.lane.b32.xlu1 %v4834_v20, %s5935_s9  ;;  %3443 = vrot.lane.b32.xlu0 %v3366_v34, %s5935_s9 }
 0xc93   : > { %3453 = vrot.lane.b32.xlu1 %v4837_v42, %s5935_s9  ;;  %3447 = vrot.lane.b32.xlu0 %v3376_v53, %s5935_s9 }
 0xc97   : > { %3451 = vrot.lane.b32.xlu0 %v3386_v5, %s5935_s9 }
 0xcb6   : > { %v4840_v62 = vpop.f32.mrb[54].mxu1 }
 0xcb7   : > { %v3396_v50 = vpop.f32.mrb[55].mxu1  ;;  %3457 = vrot.lane.b32.xlu1 %v4840_v62, %s5935_s9 }
 0xcb8   : > { %3455 = vrot.lane.b32.xlu0 %v3396_v50, %s5935_s9 }
 0xcba   : > { %v4843_v24 = vpop.f32.mrb[56].mxu1 }
 0xcbb   : > { %v3406_v60 = vpop.f32.mrb[57].mxu1  ;;  %3461 = vrot.lane.b32.xlu1 %v4843_v24, %s5935_s9 }
 0xcbc   : > { %3459 = vrot.lane.b32.xlu0 %v3406_v60, %s5935_s9 }
 0xcf1   : > { %v3434_v27 = vpop.permute.xlu0 %3433 }
 0xcf2   : > { %3481 = vst.msk [vmem:[#allocation2 + $0x8] sm:$0xff] %vm3479_vm6, %v3434_v27 }
 0xcf5   : > { %v3432_v57 = vpop.permute.xlu0 %3431  ;;  %v3438_v59 = vpop.permute.xlu1 %3437 }
 0xcf6   : > { %3480 = vst.msk [vmem:[#allocation2] sm:$0xff] %vm3479_vm6, %v3432_v57  ;;  %3483 = vst.msk [vmem:[#allocation2 + $0x18] sm:$0xff] %vm3479_vm6, %v3438_v59 }
 0xcf9   : > { %v3436_v47 = vpop.permute.xlu0 %3435  ;;  %v3442_v13 = vpop.permute.xlu1 %3441  ;;  %v3497_v6 = vld [vmem:[#allocation2 + $0x8] sm:$0xff] }
 0xcfa   : > { %3482 = vst.msk [vmem:[#allocation2 + $0x10] sm:$0xff] %vm3479_vm6, %v3436_v47  ;;  %3485 = vst.msk [vmem:[#allocation2 + $0x28] sm:$0xff] %vm3479_vm6, %v3442_v13 }
 0xcfd   : > { %v3446_v51 = vpop.permute.xlu1 %3445  ;;  %v3440_v1 = vpop.permute.xlu0 %3439  ;;  %v3496_v18 = vld [vmem:[#allocation2] sm:$0xff]  ;;  %v3499_v25 = vld [vmem:[#allocation2 + $0x18] sm:$0xff] }
 0xcfe   : > { %3487 = vst.msk [vmem:[#allocation2 + $0x38] sm:$0xff] %vm3479_vm6, %v3446_v51  ;;  %3484 = vst.msk [vmem:[#allocation2 + $0x20] sm:$0xff] %vm3479_vm6, %v3440_v1  ;;  %4852 = vmatprep.mubr.msk.f32.mxu1 %vm290_vm0, %v3496_v18 }
 0xcff   : > { %4853 = vmatmul.mubr.msk.f32.vlgmr.msra.gmra.mrb[58].mxu1 %vm290_vm0, %v3497_v6 }
 0xd01   : > { %v3450_v52 = vpop.permute.xlu1 %3449  ;;  %v3444_v3 = vpop.permute.xlu0 %3443  ;;  %v3498_v0 = vld [vmem:[#allocation2 + $0x10] sm:$0xff]  ;;  %v3501_v35 = vld [vmem:[#allocation2 + $0x28] sm:$0xff] }
 0xd02   : > { %3489 = vst.msk [vmem:[#allocation2 + $0x48] sm:$0xff] %vm3479_vm6, %v3450_v52  ;;  %3486 = vst.msk [vmem:[#allocation2 + $0x30] sm:$0xff] %vm3479_vm6, %v3444_v3  ;;  %4855 = vmatprep.mubr.msk.f32.mxu1 %vm290_vm0, %v3498_v0 }
 0xd03   : > { %4856 = vmatmul.mubr.msk.f32.gmra.mrb[60].mxu1 %vm290_vm0, %v3499_v25 }
 0xd05   : > { %v3454_v33 = vpop.permute.xlu1 %3453  ;;  %v3448_v37 = vpop.permute.xlu0 %3447  ;;  %v3500_v28 = vld [vmem:[#allocation2 + $0x20] sm:$0xff]  ;;  %v3503_v39 = vld [vmem:[#allocation2 + $0x38] sm:$0xff] }
 0xd06   : > { %3491 = vst.msk [vmem:[#allocation2 + $0x58] sm:$0xff] %vm3479_vm6, %v3454_v33  ;;  %3488 = vst.msk [vmem:[#allocation2 + $0x40] sm:$0xff] %vm3479_vm6, %v3448_v37  ;;  %4858 = vmatprep.mubr.msk.f32.mxu1 %vm290_vm0, %v3500_v28 }
 0xd07   : > { %4859 = vmatmul.mubr.msk.f32.gmra.mrb[62].mxu1 %vm290_vm0, %v3501_v35 }
 0xd09   : > { %v3452_v43 = vpop.permute.xlu0 %3451  ;;  %v3502_v9 = vld [vmem:[#allocation2 + $0x30] sm:$0xff]  ;;  %v3505_v38 = vld [vmem:[#allocation2 + $0x48] sm:$0xff] }
 0xd0a   : > { %3490 = vst.msk [vmem:[#allocation2 + $0x50] sm:$0xff] %vm3479_vm6, %v3452_v43  ;;  %4861 = vmatprep.mubr.msk.f32.mxu1 %vm290_vm0, %v3502_v9 }
 0xd0b   : > { %4862 = vmatmul.mubr.msk.f32.gmra.mrb[64].mxu1 %vm290_vm0, %v3503_v39 }
 0xd0d   : > { %v3504_v4 = vld [vmem:[#allocation2 + $0x40] sm:$0xff]  ;;  %v3507_v31 = vld [vmem:[#allocation2 + $0x58] sm:$0xff] }
 0xd0e   : > { %4864 = vmatprep.mubr.msk.f32.mxu1 %vm290_vm0, %v3504_v4 }
 0xd0f   : > { %4865 = vmatmul.mubr.msk.f32.gmra.mrb[66].mxu1 %vm290_vm0, %v3505_v38 }
 0xd11   : > { %v3506_v54 = vld [vmem:[#allocation2 + $0x50] sm:$0xff] }
 0xd12   : > { %4867 = vmatprep.mubr.msk.f32.mxu1 %vm290_vm0, %v3506_v54 }
 0xd13   : > { %4868 = vmatmul.mubr.msk.f32.gmra.mrb[68].mxu1 %vm290_vm0, %v3507_v31 }
 0xd29   : > { %v3458_v17 = vpop.permute.xlu1 %3457 }
 0xd2a   : > { %3493 = vst.msk [vmem:[#allocation2 + $0x68] sm:$0xff] %vm3479_vm6, %v3458_v17  ;;  %v3456_v19 = vpop.permute.xlu0 %3455 }
 0xd2b   : > { %3492 = vst.msk [vmem:[#allocation2 + $0x60] sm:$0xff] %vm3479_vm6, %v3456_v19 }
 0xd2d   : > { %v3462_v26 = vpop.permute.xlu1 %3461 }
 0xd2e   : > { %3495 = vst.msk [vmem:[#allocation2 + $0x78] sm:$0xff] %vm3479_vm6, %v3462_v26  ;;  %v3460_v63 = vpop.permute.xlu0 %3459 }
 0xd2f   : > { %3494 = vst.msk [vmem:[#allocation2 + $0x70] sm:$0xff] %vm3479_vm6, %v3460_v63 }
 0xd31   : > { %v3509_v48 = vld [vmem:[#allocation2 + $0x68] sm:$0xff] }
 0xd32   : > { %v3508_v10 = vld [vmem:[#allocation2 + $0x60] sm:$0xff] }
 0xd33   : > { %4870 = vmatprep.mubr.msk.f32.mxu1 %vm290_vm0, %v3508_v10 }
 0xd34   : > { %4871 = vmatmul.mubr.msk.f32.gmra.mrb[70].mxu1 %vm290_vm0, %v3509_v48 }
 0xd35   : > { %v3511_v23 = vld [vmem:[#allocation2 + $0x78] sm:$0xff] }
 0xd36   : > { %v3510_v15 = vld [vmem:[#allocation2 + $0x70] sm:$0xff] }
 0xd37   : > { %4873 = vmatprep.mubr.msk.f32.mxu1 %vm290_vm0, %v3510_v15 }
 0xd38   : > { %4874 = vmatmul.mubr.msk.f32.gmra.mrb[72].mxu1 %vm290_vm0, %v3511_v23 }
 0xd39   : > { %5871 = shalt.err (!%p5868_p3)
}
 0xd3a   : > { %s5872_s14 = scalar_lea.hbm %s7486_s15, 8192  ;;  %s5876_s11 = scalar_lea.hbm %s7583_s6, 16384 }
 0xd3b   : > { %p5873_p4 = scmp.ne.s32.totalorder %s7486_s15, %s5872_s14  ;;  %p5877_p9 = scmp.lt.u32.totalorder %s7486_s15, %s7583_s6 }
 0xd3c   : > { %p5878_p10 = scmp.lt.u32.totalorder %s5876_s11, %s5872_s14  ;;  %p5880_p12 = scmp.lt.u32.totalorder %s5872_s14, %s7486_s15 }
 0xd3d   : > { %p5874_p7 = pnand %p5873_p4, %p6011_p5 }
 0xd3e   : > { %p5879_p11 = por %p5878_p10, %p5877_p9 }
 0xd3f   : > { %p5875_p8 = pneg %p5874_p7 }
 0xd40   : > { %p5881_p13 = por %p5880_p12, %p5879_p11 }
 0xd42   : > { %p5882_p0 = pnand %p5881_p13, %p5875_p8 }
 0xd44   : > { %5885 = shalt.err (!%p5882_p0)
}
 0xd45   : > { %s5937_s26 = smov 128   ;;  %v4043_v21 = vld [vmem:[%s7581_s4] ss:$0 sm:$0xff]  ;;  %s7526_s14 = scalar_lea.vmem %s7582_s5, %s4065_s18 }
 0xd46   : > { %5228 = dma.vmem_to_hbm [thread:$0]  (%p6011_p5), %s7489_s19, 8192, %s7486_s15, %s7493_s20, %s5937_s26, %s5937_s26, %s5933_s10  }
 0xdd2   : > { %v4854_v22 = vpop.f32.mrb[58].mxu1 }
 0xdd3   : > { %v3643_v7 = vadd.f32 %v4854_v22, %v4043_v21  ;;  %v3637_v36 = vpop.f32.mrb[59].mxu1 }
 0xdd4   : > { %v3638_v41 = vadd.f32 %v4043_v21, %v3637_v36 }
 0xdd5   : > { %3717 = vst.msk [vmem:[%s7526_s14 + $0x8] sm:$0xff] %vm290_vm0, %v3643_v7 }
 0xdd6   : > { %3716 = vst.msk [vmem:[%s7526_s14] sm:$0xff] %vm290_vm0, %v3638_v41  ;;  %v4857_v14 = vpop.f32.mrb[60].mxu1 }
 0xdd7   : > { %v3653_v46 = vadd.f32 %v4857_v14, %v4043_v21  ;;  %v3647_v29 = vpop.f32.mrb[61].mxu1 }
 0xdd8   : > { %v3648_v56 = vadd.f32 %v4043_v21, %v3647_v29 }
 0xdd9   : > { %3719 = vst.msk [vmem:[%s7526_s14 + $0x18] sm:$0xff] %vm290_vm0, %v3653_v46 }
 0xdda   : > { %3718 = vst.msk [vmem:[%s7526_s14 + $0x10] sm:$0xff] %vm290_vm0, %v3648_v56  ;;  %v4860_v61 = vpop.f32.mrb[62].mxu1 }
 0xddb   : > { %v3663_v45 = vadd.f32 %v4860_v61, %v4043_v21  ;;  %v3657_v12 = vpop.f32.mrb[63].mxu1 }
 0xddc   : > { %v3658_v40 = vadd.f32 %v4043_v21, %v3657_v12 }
 0xddd   : > { %3721 = vst.msk [vmem:[%s7526_s14 + $0x28] sm:$0xff] %vm290_vm0, %v3663_v45 }
 0xdde   : > { %3720 = vst.msk [vmem:[%s7526_s14 + $0x20] sm:$0xff] %vm290_vm0, %v3658_v40  ;;  %v4863_v44 = vpop.f32.mrb[64].mxu1 }
 0xddf   : > { %v3673_v11 = vadd.f32 %v4863_v44, %v4043_v21  ;;  %v3667_v8 = vpop.f32.mrb[65].mxu1 }
 0xde0   : > { %v3668_v30 = vadd.f32 %v4043_v21, %v3667_v8 }
 0xde1   : > { %3723 = vst.msk [vmem:[%s7526_s14 + $0x38] sm:$0xff] %vm290_vm0, %v3673_v11 }
 0xde2   : > { %3722 = vst.msk [vmem:[%s7526_s14 + $0x30] sm:$0xff] %vm290_vm0, %v3668_v30  ;;  %v4866_v16 = vpop.f32.mrb[66].mxu1 }
 0xde3   : > { %v3683_v34 = vadd.f32 %v4866_v16, %v4043_v21  ;;  %v3677_v55 = vpop.f32.mrb[67].mxu1 }
 0xde4   : > { %v3678_v2 = vadd.f32 %v4043_v21, %v3677_v55 }
 0xde5   : > { %3725 = vst.msk [vmem:[%s7526_s14 + $0x48] sm:$0xff] %vm290_vm0, %v3683_v34 }
 0xde6   : > { %3724 = vst.msk [vmem:[%s7526_s14 + $0x40] sm:$0xff] %vm290_vm0, %v3678_v2  ;;  %v4869_v20 = vpop.f32.mrb[68].mxu1 }
 0xde7   : > { %v3693_v53 = vadd.f32 %v4869_v20, %v4043_v21  ;;  %v3687_v32 = vpop.f32.mrb[69].mxu1 }
 0xde8   : > { %v3688_v49 = vadd.f32 %v4043_v21, %v3687_v32 }
 0xde9   : > { %3727 = vst.msk [vmem:[%s7526_s14 + $0x58] sm:$0xff] %vm290_vm0, %v3693_v53 }
 0xdea   : > { %3726 = vst.msk [vmem:[%s7526_s14 + $0x50] sm:$0xff] %vm290_vm0, %v3688_v49 }
 0xe07   : > { %v4872_v42 = vpop.f32.mrb[70].mxu1 }
 0xe08   : > { %v3703_v5 = vadd.f32 %v4872_v42, %v4043_v21  ;;  %v3697_v58 = vpop.f32.mrb[71].mxu1 }
 0xe09   : > { %v3698_v62 = vadd.f32 %v4043_v21, %v3697_v58 }
 0xe0a   : > { %3729 = vst.msk [vmem:[%s7526_s14 + $0x68] sm:$0xff] %vm290_vm0, %v3703_v5 }
 0xe0b   : > { %3728 = vst.msk [vmem:[%s7526_s14 + $0x60] sm:$0xff] %vm290_vm0, %v3698_v62  ;;  %v4875_v50 = vpop.f32.mrb[72].mxu1 }
 0xe0c   : > { %v3713_v24 = vadd.f32 %v4875_v50, %v4043_v21  ;;  %v3707_v60 = vpop.f32.mrb[73].mxu1 }
 0xe0d   : > { %v3708_v27 = vadd.f32 %v4043_v21, %v3707_v60 }
 0xe0e   : > { %3731 = vst.msk [vmem:[%s7526_s14 + $0x78] sm:$0xff] %vm290_vm0, %v3713_v24 }
 0xe0f   : > { %3730 = vst.msk [vmem:[%s7526_s14 + $0x70] sm:$0xff] %vm290_vm0, %v3708_v27 }
 0xe10 PF: > { %p5234_p5 = scmp.ge.s32.totalorder %s5920_s24, 2  ;;  %s3777_s7 = sand.u32 1, %s5908_s21  }
 0xe11   : > { %s3778_s17 = scalar_lea.sflag [#allocation4], %s3777_s7 }
 0xe12   : > { %p5231_p1 = pnand %p5234_p5, %p6015_p6 }
 0xe14   : > { %5903 = dma.done.wait (!%p5231_p1), %s3778_s17, 8192  }
 0xe15   : > { %5905 = vsyncadd (!%p5231_p1), %s3778_s17, 4294959104  ;;  %p17_p2 = scmp.ge.s32.totalorder %s5998_s27, 4   ;;  %s7614_s21 = smov %s5912_s22 }
 0xe16   : > { %s7615_s22 = smov %s5916_s23  ;;  %s7616_s23 = smov %s6009_s30 }
 0xe17   : > { %s7617_s24 = smov %s5998_s27  ;;  %19 = sbr.rel (!%p17_p2) target bundleno = 3 (0x3), region = 90 }
 0xe1e   :  { %3783 = vsyncpa [#allocation4], 1 }
 0xe1f   :  { %3785 = vsyncpa [#allocation4 + $0x1], 1 }

</bundles_post_ra>
